<compile_context>
chip_gen: v6e
topology: v6e:2x2x1
jax: 0.10.0
libtpu: 0.0.40
codegen_flags: <defaults>
</compile_context>

<pallas_src>
import functools

import jax
import jax.numpy as jnp
from jax import lax
from jax.experimental import pallas as pl
from jax.experimental.pallas import tpu as pltpu

EPS = 1e-5  # torch.nn.LayerNorm default


def _layernorm(x, g, b):
    mu = jnp.mean(x, axis=-1, keepdims=True)
    var = jnp.mean((x - mu) ** 2, axis=-1, keepdims=True)  # biased variance (torch)
    return (x - mu) * lax.rsqrt(var + EPS) * g + b


# ---------------------------------------------------------------------------
# Fused kernel: initial LayerNorm + all encoder layers, whole batch per program
# ---------------------------------------------------------------------------
def transformer_cell_kernel(nhead, batch,
                            x_ref, ln_g_ref, ln_b_ref,
                            wqkv_ref, bqkv_ref, wo_ref, bo_ref,
                            w1_ref, b1_ref, w2_ref, b2_ref,
                            g1_ref, be1_ref, g2_ref, be2_ref,
                            o_ref):
    T, E = x_ref.shape                       # T = S * N tokens, token t = s*N + n
    H = nhead
    hd = E // H
    N = batch
    L = wqkv_ref.shape[0]
    scale = 1.0 / float(hd) ** 0.5

    # Same-batch mask: token t belongs to batch element (t % N).  Attention is computed
    # over all T tokens per head and cross-batch scores are masked to -1e30 (exp -> 0),
    # which is exactly per-batch softmax without any per-batch slicing/relayouts.
    bi = lax.broadcasted_iota(jnp.int32, (T, T), 0)
    bj = lax.broadcasted_iota(jnp.int32, (T, T), 1)
    if (N & (N - 1)) == 0:                   # power of two: use AND (cheapest lowering)
        same_batch = (bi & (N - 1)) == (bj & (N - 1))
    else:
        same_batch = (bi % N) == (bj % N)

    x = _layernorm(x_ref[...].astype(jnp.float32), ln_g_ref[...], ln_b_ref[...])  # (T, E)

    for l in range(L):                       # static unroll over layers (weights resident)
        # --- self-attention: fused in-projection (T, 3E) on the MXU ---
        qkv = jnp.dot(x.astype(jnp.bfloat16), wqkv_ref[l],
                      preferred_element_type=jnp.float32) + bqkv_ref[l]
        q = (qkv[:, :E] * scale).astype(jnp.bfloat16)
        k = qkv[:, E:2 * E].astype(jnp.bfloat16)
        v = qkv[:, 2 * E:].astype(jnp.bfloat16)

        heads = []
        for h in range(H):                   # static, nhead is small
            sl = slice(h * hd, (h + 1) * hd)
            # q_h @ k_h^T via transposed-RHS dot_general (no materialized transpose)
            s = lax.dot_general(q[:, sl], k[:, sl],
                                (((1,), (1,)), ((), ())),
                                preferred_element_type=jnp.float32)      # (T, T)
            s = jnp.where(same_batch, s, -1e30)
            s = s - jnp.max(s, axis=-1, keepdims=True)
            p = jnp.exp(s)
            p = p / jnp.sum(p, axis=-1, keepdims=True)
            heads.append(jnp.dot(p.astype(jnp.bfloat16), v[:, sl],
                                 preferred_element_type=jnp.float32))    # (T, hd)
        attn = jnp.concatenate(heads, axis=-1)                           # (T, E)
        sa = jnp.dot(attn.astype(jnp.bfloat16), wo_ref[l],
                     preferred_element_type=jnp.float32) + bo_ref[l]

        x1 = _layernorm(x + sa, g1_ref[l], be1_ref[l])                   # norm1 (post-norm)

        # --- feed-forward block ---
        h1 = jnp.dot(x1.astype(jnp.bfloat16), w1_ref[l],
                     preferred_element_type=jnp.float32) + b1_ref[l]
        h1 = jnp.maximum(h1, 0.0)                                        # relu
        ff = jnp.dot(h1.astype(jnp.bfloat16), w2_ref[l],
                     preferred_element_type=jnp.float32) + b2_ref[l]

        x = _layernorm(x1 + ff, g2_ref[l], be2_ref[l])                   # norm2

    o_ref[...] = x.astype(o_ref.dtype)


# ---------------------------------------------------------------------------
# Wrapper (single pallas_call, everything resident in VMEM)
# ---------------------------------------------------------------------------
def _full(shape):
    # Whole-array block, independent of the (size-1) grid index.
    return pl.BlockSpec(shape, lambda i: (0,) * len(shape))


def transformer_cell_forward(x_sne, params, nhead):
    """x_sne: (S, N, E) like PyTorch's default (batch_first=False). Returns (output, None)."""
    S, N, E = x_sne.shape
    assert E % nhead == 0
    T = S * N
    L, _, FF = params["w1"].shape

    x2d = x_sne.reshape(T, E)            # contiguous: free reshape, no transpose

    out2d = pl.pallas_call(
        functools.partial(transformer_cell_kernel, nhead, N),
        out_shape=jax.ShapeDtypeStruct((T, E), x_sne.dtype),
        grid=(1,),
        in_specs=[
            pl.BlockSpec((T, E), lambda i: (0, 0)),        # x (all tokens)
            _full((1, E)), _full((1, E)),                  # initial LayerNorm g, b
            _full((L, E, 3 * E)), _full((L, 1, 3 * E)),    # in_proj  (pre-transposed)
            _full((L, E, E)), _full((L, 1, E)),            # out_proj (pre-transposed)
            _full((L, E, FF)), _full((L, 1, FF)),          # linear1  (pre-transposed)
            _full((L, FF, E)), _full((L, 1, E)),           # linear2  (pre-transposed)
            _full((L, 1, E)), _full((L, 1, E)),            # norm1 g, b
            _full((L, 1, E)), _full((L, 1, E)),            # norm2 g, b
        ],
        out_specs=pl.BlockSpec((T, E), lambda i: (0, 0)),
        compiler_params=pltpu.CompilerParams(dimension_semantics=("arbitrary",)),
    )(x2d, params["ln_g"], params["ln_b"],
      params["wqkv"], params["bqkv"], params["wo"], params["bo"],
      params["w1"], params["b1"], params["w2"], params["b2"],
      params["g1"], params["be1"], params["g2"], params["be2"])

    return out2d.reshape(S, N, E), None


# ---------------------------------------------------------------------------
# Deterministic parameter construction (weights pre-transposed to x @ W layout,
# stored bf16; biases / LayerNorm params f32). Pass wdtype=jnp.float32 for full f32.
# ---------------------------------------------------------------------------
def init_params(key, d_model, num_layers, dim_feedforward, wdtype=jnp.bfloat16):
    E, FF, L = d_model, dim_feedforward, num_layers
    wqkv, wo, w1, w2 = [], [], [], []
    for l in range(L):
        k = jax.random.split(jax.random.fold_in(key, l), 4)
        wqkv.append(0.02 * jax.random.normal(k[0], (E, 3 * E), jnp.float32))
        wo.append(0.02 * jax.random.normal(k[1], (E, E), jnp.float32))
        w1.append(0.02 * jax.random.normal(k[2], (E, FF), jnp.float32))
        w2.append(0.02 * jax.random.normal(k[3], (FF, E), jnp.float32))
    return {
        "ln_g": jnp.ones((1, E), jnp.float32),
        "ln_b": jnp.zeros((1, E), jnp.float32),
        "wqkv": jnp.stack(wqkv).astype(wdtype),      # (L, E, 3E)
        "bqkv": jnp.zeros((L, 1, 3 * E), jnp.float32),
        "wo":   jnp.stack(wo).astype(wdtype),        # (L, E, E)
        "bo":   jnp.zeros((L, 1, E), jnp.float32),
        "w1":   jnp.stack(w1).astype(wdtype),        # (L, E, FF)
        "b1":   jnp.zeros((L, 1, FF), jnp.float32),
        "w2":   jnp.stack(w2).astype(wdtype),        # (L, FF, E)
        "b2":   jnp.zeros((L, 1, E), jnp.float32),
        "g1":   jnp.ones((L, 1, E), jnp.float32),
        "be1":  jnp.zeros((L, 1, E), jnp.float32),
        "g2":   jnp.ones((L, 1, E), jnp.float32),
        "be2":  jnp.zeros((L, 1, E), jnp.float32),
    }


# ---------------------------------------------------------------------------
# Pure-JAX reference (f32 math, same bf16-stored weights) for a coarse sanity check
# ---------------------------------------------------------------------------
def reference_forward(x_sne, params, nhead):
    S, N, E = x_sne.shape
    H, hd = nhead, E // nhead

    def ln(x, g, b):
        mu = x.mean(-1, keepdims=True)
        var = ((x - mu) ** 2).mean(-1, keepdims=True)
        return (x - mu) / jnp.sqrt(var + EPS) * g + b

    x = ln(x_sne.astype(jnp.float32), params["ln_g"][0], params["ln_b"][0])
    L = params["wqkv"].shape[0]
    for l in range(L):
        wqkv = params["wqkv"][l].astype(jnp.float32)
        wo = params["wo"][l].astype(jnp.float32)
        w1 = params["w1"][l].astype(jnp.float32)
        w2 = params["w2"][l].astype(jnp.float32)

        qkv = x @ wqkv + params["bqkv"][l][0]
        q = qkv[..., :E] / jnp.sqrt(hd).astype(jnp.float32)
        k = qkv[..., E:2 * E]
        v = qkv[..., 2 * E:]
        q4 = q.reshape(S, N, H, hd)
        k4 = k.reshape(S, N, H, hd)
        v4 = v.reshape(S, N, H, hd)
        s = jnp.einsum('snhd,tnhd->nhst', q4, k4)
        p = jax.nn.softmax(s, axis=-1)
        attn = jnp.einsum('nhst,tnhd->snhd', p, v4).reshape(S, N, E)
        sa = attn @ wo + params["bo"][l][0]
        x1 = ln(x + sa, params["g1"][l][0], params["be1"][l][0])
        h1 = jnp.maximum(x1 @ w1 + params["b1"][l][0], 0.0)
        ff = h1 @ w2 + params["b2"][l][0]
        x = ln(x1 + ff, params["g2"][l][0], params["be2"][l][0])
    return x


if __name__ == "__main__":
    # Module hyper-params: input_size (d_model)=128, hidden_size=60 -> nhead=60//30=2,
    # num_layers=2, dim_feedforward=2048 (torch default).
    S, N, E = 8, 2, 128
    HIDDEN_SIZE = 60
    NHEAD = HIDDEN_SIZE // 30
    NUM_LAYERS = 2
    FFN = 2048

    key = jax.random.PRNGKey(0)
    params = init_params(key, E, NUM_LAYERS, FFN)
    x = jax.random.normal(jax.random.fold_in(key, 999), (S, N, E), dtype=jnp.float32)

    fwd = jax.jit(transformer_cell_forward, static_argnums=2)
    out, state = fwd(x, params, NHEAD)
    out = jax.block_until_ready(out)

    assert out.shape == (S, N, E) and state is None
    assert bool(jnp.all(jnp.isfinite(out)))

    # Coarse numerical sanity check vs. pure-JAX f32 reference (kernel uses bf16 matmul
    # inputs with f32 accumulation, so allow a loose tolerance).
    ref = jax.block_until_ready(reference_forward(x, params, NHEAD))
    max_diff = float(jnp.max(jnp.abs(out - ref)))
    assert max_diff < 0.15, f"max diff vs reference too large: {max_diff}"

    print("KERNEL_OK")
</pallas_src>

<mosaic_0001>
module attributes {stable_mosaic.version = 11 : i64} {
  func.func @transformer_cell_kernel(%arg0: i32, %arg1: memref<16x128xf32, #tpu.memory_space<vmem>>, %arg2: memref<1x128xf32, #tpu.memory_space<vmem>>, %arg3: memref<1x128xf32, #tpu.memory_space<vmem>>, %arg4: memref<2x128x384xbf16, #tpu.memory_space<vmem>>, %arg5: memref<2x1x384xf32, #tpu.memory_space<vmem>>, %arg6: memref<2x128x128xbf16, #tpu.memory_space<vmem>>, %arg7: memref<2x1x128xf32, #tpu.memory_space<vmem>>, %arg8: memref<2x128x2048xbf16, #tpu.memory_space<vmem>>, %arg9: memref<2x1x2048xf32, #tpu.memory_space<vmem>>, %arg10: memref<2x2048x128xbf16, #tpu.memory_space<vmem>>, %arg11: memref<2x1x128xf32, #tpu.memory_space<vmem>>, %arg12: memref<2x1x128xf32, #tpu.memory_space<vmem>>, %arg13: memref<2x1x128xf32, #tpu.memory_space<vmem>>, %arg14: memref<2x1x128xf32, #tpu.memory_space<vmem>>, %arg15: memref<2x1x128xf32, #tpu.memory_space<vmem>>, %arg16: memref<16x128xf32, #tpu.memory_space<vmem>>) attributes {dimension_semantics = [#tpu.dimension_semantics<arbitrary>], iteration_bounds = array<i64: 1>, scalar_prefetch = 0 : i64, scratch_operands = 0 : i64, tpu.core_type = #tpu.core_type<tc>, window_params = [{pipeline_mode = #tpu.pipeline_mode<synchronous>, transform_indices = @transform_0, window_bounds = array<i64: 16, 128>}, {pipeline_mode = #tpu.pipeline_mode<synchronous>, transform_indices = @transform_1, window_bounds = array<i64: 1, 128>}, {pipeline_mode = #tpu.pipeline_mode<synchronous>, transform_indices = @transform_2, window_bounds = array<i64: 1, 128>}, {pipeline_mode = #tpu.pipeline_mode<synchronous>, transform_indices = @transform_3, window_bounds = array<i64: 2, 128, 384>}, {pipeline_mode = #tpu.pipeline_mode<synchronous>, transform_indices = @transform_4, window_bounds = array<i64: 2, 1, 384>}, {pipeline_mode = #tpu.pipeline_mode<synchronous>, transform_indices = @transform_5, window_bounds = array<i64: 2, 128, 128>}, {pipeline_mode = #tpu.pipeline_mode<synchronous>, transform_indices = @transform_6, window_bounds = array<i64: 2, 1, 128>}, {pipeline_mode = #tpu.pipeline_mode<synchronous>, transform_indices = @transform_7, window_bounds = array<i64: 2, 128, 2048>}, {pipeline_mode = #tpu.pipeline_mode<synchronous>, transform_indices = @transform_8, window_bounds = array<i64: 2, 1, 2048>}, {pipeline_mode = #tpu.pipeline_mode<synchronous>, transform_indices = @transform_9, window_bounds = array<i64: 2, 2048, 128>}, {pipeline_mode = #tpu.pipeline_mode<synchronous>, transform_indices = @transform_10, window_bounds = array<i64: 2, 1, 128>}, {pipeline_mode = #tpu.pipeline_mode<synchronous>, transform_indices = @transform_11, window_bounds = array<i64: 2, 1, 128>}, {pipeline_mode = #tpu.pipeline_mode<synchronous>, transform_indices = @transform_12, window_bounds = array<i64: 2, 1, 128>}, {pipeline_mode = #tpu.pipeline_mode<synchronous>, transform_indices = @transform_13, window_bounds = array<i64: 2, 1, 128>}, {pipeline_mode = #tpu.pipeline_mode<synchronous>, transform_indices = @transform_14, window_bounds = array<i64: 2, 1, 128>}, {pipeline_mode = #tpu.pipeline_mode<synchronous>, transform_indices = @transform_15, window_bounds = array<i64: 16, 128>}]} {
    %0 = tpu.iota {dimensions = array<i32: 0>} : vector<16x16xi32>
    %1 = tpu.iota {dimensions = array<i32: 1>} : vector<16x16xi32>
    %c1_i32 = arith.constant 1 : i32
    %2 = vector.broadcast %c1_i32 : i32 to vector<16x16xi32>
    %3 = arith.andi %0, %2 : vector<16x16xi32>
    %c1_i32_0 = arith.constant 1 : i32
    %4 = vector.broadcast %c1_i32_0 : i32 to vector<16x16xi32>
    %5 = arith.andi %1, %4 : vector<16x16xi32>
    %6 = arith.cmpi eq, %3, %5 : vector<16x16xi32>
    %c0 = arith.constant 0 : index
    %c0_1 = arith.constant 0 : index
    %7 = vector.load %arg1[%c0, %c0_1] : memref<16x128xf32, #tpu.memory_space<vmem>>, vector<16x128xf32>
    %c0_2 = arith.constant 0 : index
    %c0_3 = arith.constant 0 : index
    %8 = vector.load %arg2[%c0_2, %c0_3] : memref<1x128xf32, #tpu.memory_space<vmem>>, vector<1x128xf32>
    %c0_4 = arith.constant 0 : index
    %c0_5 = arith.constant 0 : index
    %9 = vector.load %arg3[%c0_4, %c0_5] : memref<1x128xf32, #tpu.memory_space<vmem>>, vector<1x128xf32>
    %cst = arith.constant dense<0.000000e+00> : vector<16xf32>
    %10 = vector.multi_reduction <add>, %7, %cst [1] : vector<16x128xf32> to vector<16xf32>
    %11 = vector.shape_cast %10 : vector<16xf32> to vector<16x1xf32>
    %cst_6 = arith.constant 1.280000e+02 : f32
    %12 = vector.broadcast %cst_6 : f32 to vector<16x1xf32>
    %13 = arith.divf %11, %12 : vector<16x1xf32>
    %14 = vector.broadcast %13 : vector<16x1xf32> to vector<16x128xf32>
    %15 = arith.subf %7, %14 : vector<16x128xf32>
    %16 = arith.mulf %15, %15 : vector<16x128xf32>
    %cst_7 = arith.constant dense<0.000000e+00> : vector<16xf32>
    %17 = vector.multi_reduction <add>, %16, %cst_7 [1] : vector<16x128xf32> to vector<16xf32>
    %18 = vector.shape_cast %17 : vector<16xf32> to vector<16x1xf32>
    %cst_8 = arith.constant 1.280000e+02 : f32
    %19 = vector.broadcast %cst_8 : f32 to vector<16x1xf32>
    %20 = arith.divf %18, %19 : vector<16x1xf32>
    %21 = vector.broadcast %13 : vector<16x1xf32> to vector<16x128xf32>
    %22 = arith.subf %7, %21 : vector<16x128xf32>
    %cst_9 = arith.constant 9.99999974E-6 : f32
    %23 = vector.broadcast %cst_9 : f32 to vector<16x1xf32>
    %24 = arith.addf %20, %23 : vector<16x1xf32>
    %25 = math.rsqrt %24 : vector<16x1xf32>
    %26 = vector.broadcast %25 : vector<16x1xf32> to vector<16x128xf32>
    %27 = arith.mulf %22, %26 : vector<16x128xf32>
    %28 = vector.broadcast %8 : vector<1x128xf32> to vector<16x128xf32>
    %29 = arith.mulf %27, %28 : vector<16x128xf32>
    %30 = vector.broadcast %9 : vector<1x128xf32> to vector<16x128xf32>
    %31 = arith.addf %29, %30 : vector<16x128xf32>
    %32 = arith.truncf %31 : vector<16x128xf32> to vector<16x128xbf16>
    %c0_10 = arith.constant 0 : index
    %c0_11 = arith.constant 0 : index
    %c0_12 = arith.constant 0 : index
    %33 = vector.load %arg4[%c0_10, %c0_11, %c0_12] : memref<2x128x384xbf16, #tpu.memory_space<vmem>>, vector<1x128x384xbf16>
    %34 = vector.shape_cast %33 : vector<1x128x384xbf16> to vector<128x384xbf16>
    %cst_13 = arith.constant dense<0.000000e+00> : vector<16x384xf32>
    %35 = tpu.matmul %32, %34, %cst_13 {dimension_numbers = #tpu.dot_dimension_numbers<[1], [0], [0], [1], [0, 0, 1, 1], [], []>} : vector<16x128xbf16>, vector<128x384xbf16>, vector<16x384xf32> -> vector<16x384xf32>
    %c0_14 = arith.constant 0 : index
    %c0_15 = arith.constant 0 : index
    %c0_16 = arith.constant 0 : index
    %36 = vector.load %arg5[%c0_14, %c0_15, %c0_16] : memref<2x1x384xf32, #tpu.memory_space<vmem>>, vector<1x1x384xf32>
    %37 = vector.shape_cast %36 : vector<1x1x384xf32> to vector<1x384xf32>
    %38 = vector.broadcast %37 : vector<1x384xf32> to vector<16x384xf32>
    %39 = arith.addf %35, %38 : vector<16x384xf32>
    %40 = vector.extract_strided_slice %39 {offsets = [0, 0], sizes = [16, 128], strides = [1, 1]} : vector<16x384xf32> to vector<16x128xf32>
    %cst_17 = arith.constant 1.250000e-01 : f32
    %41 = vector.broadcast %cst_17 : f32 to vector<16x128xf32>
    %42 = arith.mulf %40, %41 : vector<16x128xf32>
    %43 = arith.truncf %42 : vector<16x128xf32> to vector<16x128xbf16>
    %44 = vector.extract_strided_slice %39 {offsets = [0, 128], sizes = [16, 128], strides = [1, 1]} : vector<16x384xf32> to vector<16x128xf32>
    %45 = arith.truncf %44 : vector<16x128xf32> to vector<16x128xbf16>
    %46 = vector.extract_strided_slice %39 {offsets = [0, 256], sizes = [16, 128], strides = [1, 1]} : vector<16x384xf32> to vector<16x128xf32>
    %47 = arith.truncf %46 : vector<16x128xf32> to vector<16x128xbf16>
    %48 = vector.extract_strided_slice %43 {offsets = [0, 0], sizes = [16, 64], strides = [1, 1]} : vector<16x128xbf16> to vector<16x64xbf16>
    %49 = vector.extract_strided_slice %45 {offsets = [0, 0], sizes = [16, 64], strides = [1, 1]} : vector<16x128xbf16> to vector<16x64xbf16>
    %cst_18 = arith.constant dense<0.000000e+00> : vector<16x16xf32>
    %50 = tpu.matmul %48, %49, %cst_18 {dimension_numbers = #tpu.dot_dimension_numbers<[1], [1], [0], [0], [0, 0, 1, 0], [], []>} : vector<16x64xbf16>, vector<16x64xbf16>, vector<16x16xf32> -> vector<16x16xf32>
    %cst_19 = arith.constant -1.000000e+30 : f32
    %51 = vector.broadcast %cst_19 : f32 to vector<16x16xf32>
    %52 = arith.select %6, %50, %51 : vector<16x16xi1>, vector<16x16xf32>
    %cst_20 = arith.constant dense<0xFF800000> : vector<16xf32>
    %53 = vector.multi_reduction <maximumf>, %52, %cst_20 [1] : vector<16x16xf32> to vector<16xf32>
    %54 = vector.shape_cast %53 : vector<16xf32> to vector<16x1xf32>
    %55 = vector.broadcast %54 : vector<16x1xf32> to vector<16x16xf32>
    %56 = arith.subf %52, %55 : vector<16x16xf32>
    %57 = math.exp %56 : vector<16x16xf32>
    %cst_21 = arith.constant dense<0.000000e+00> : vector<16xf32>
    %58 = vector.multi_reduction <add>, %57, %cst_21 [1] : vector<16x16xf32> to vector<16xf32>
    %59 = vector.shape_cast %58 : vector<16xf32> to vector<16x1xf32>
    %60 = vector.broadcast %59 : vector<16x1xf32> to vector<16x16xf32>
    %61 = arith.divf %57, %60 : vector<16x16xf32>
    %62 = arith.truncf %61 : vector<16x16xf32> to vector<16x16xbf16>
    %63 = vector.extract_strided_slice %47 {offsets = [0, 0], sizes = [16, 64], strides = [1, 1]} : vector<16x128xbf16> to vector<16x64xbf16>
    %cst_22 = arith.constant dense<0.000000e+00> : vector<16x64xf32>
    %64 = tpu.matmul %62, %63, %cst_22 {dimension_numbers = #tpu.dot_dimension_numbers<[1], [0], [0], [1], [0, 0, 1, 1], [], []>} : vector<16x16xbf16>, vector<16x64xbf16>, vector<16x64xf32> -> vector<16x64xf32>
    %65 = vector.extract_strided_slice %43 {offsets = [0, 64], sizes = [16, 64], strides = [1, 1]} : vector<16x128xbf16> to vector<16x64xbf16>
    %66 = vector.extract_strided_slice %45 {offsets = [0, 64], sizes = [16, 64], strides = [1, 1]} : vector<16x128xbf16> to vector<16x64xbf16>
    %cst_23 = arith.constant dense<0.000000e+00> : vector<16x16xf32>
    %67 = tpu.matmul %65, %66, %cst_23 {dimension_numbers = #tpu.dot_dimension_numbers<[1], [1], [0], [0], [0, 0, 1, 0], [], []>} : vector<16x64xbf16>, vector<16x64xbf16>, vector<16x16xf32> -> vector<16x16xf32>
    %cst_24 = arith.constant -1.000000e+30 : f32
    %68 = vector.broadcast %cst_24 : f32 to vector<16x16xf32>
    %69 = arith.select %6, %67, %68 : vector<16x16xi1>, vector<16x16xf32>
    %cst_25 = arith.constant dense<0xFF800000> : vector<16xf32>
    %70 = vector.multi_reduction <maximumf>, %69, %cst_25 [1] : vector<16x16xf32> to vector<16xf32>
    %71 = vector.shape_cast %70 : vector<16xf32> to vector<16x1xf32>
    %72 = vector.broadcast %71 : vector<16x1xf32> to vector<16x16xf32>
    %73 = arith.subf %69, %72 : vector<16x16xf32>
    %74 = math.exp %73 : vector<16x16xf32>
    %cst_26 = arith.constant dense<0.000000e+00> : vector<16xf32>
    %75 = vector.multi_reduction <add>, %74, %cst_26 [1] : vector<16x16xf32> to vector<16xf32>
    %76 = vector.shape_cast %75 : vector<16xf32> to vector<16x1xf32>
    %77 = vector.broadcast %76 : vector<16x1xf32> to vector<16x16xf32>
    %78 = arith.divf %74, %77 : vector<16x16xf32>
    %79 = arith.truncf %78 : vector<16x16xf32> to vector<16x16xbf16>
    %80 = vector.extract_strided_slice %47 {offsets = [0, 64], sizes = [16, 64], strides = [1, 1]} : vector<16x128xbf16> to vector<16x64xbf16>
    %cst_27 = arith.constant dense<0.000000e+00> : vector<16x64xf32>
    %81 = tpu.matmul %79, %80, %cst_27 {dimension_numbers = #tpu.dot_dimension_numbers<[1], [0], [0], [1], [0, 0, 1, 1], [], []>} : vector<16x16xbf16>, vector<16x64xbf16>, vector<16x64xf32> -> vector<16x64xf32>
    %82 = tpu.concatenate %64, %81 in 1 : vector<16x64xf32>, vector<16x64xf32> -> vector<16x128xf32>
    %83 = arith.truncf %82 : vector<16x128xf32> to vector<16x128xbf16>
    %c0_28 = arith.constant 0 : index
    %c0_29 = arith.constant 0 : index
    %c0_30 = arith.constant 0 : index
    %84 = vector.load %arg6[%c0_28, %c0_29, %c0_30] : memref<2x128x128xbf16, #tpu.memory_space<vmem>>, vector<1x128x128xbf16>
    %85 = vector.shape_cast %84 : vector<1x128x128xbf16> to vector<128x128xbf16>
    %cst_31 = arith.constant dense<0.000000e+00> : vector<16x128xf32>
    %86 = tpu.matmul %83, %85, %cst_31 {dimension_numbers = #tpu.dot_dimension_numbers<[1], [0], [0], [1], [0, 0, 1, 1], [], []>} : vector<16x128xbf16>, vector<128x128xbf16>, vector<16x128xf32> -> vector<16x128xf32>
    %c0_32 = arith.constant 0 : index
    %c0_33 = arith.constant 0 : index
    %c0_34 = arith.constant 0 : index
    %87 = vector.load %arg7[%c0_32, %c0_33, %c0_34] : memref<2x1x128xf32, #tpu.memory_space<vmem>>, vector<1x1x128xf32>
    %88 = vector.shape_cast %87 : vector<1x1x128xf32> to vector<1x128xf32>
    %89 = vector.broadcast %88 : vector<1x128xf32> to vector<16x128xf32>
    %90 = arith.addf %86, %89 : vector<16x128xf32>
    %91 = arith.addf %31, %90 : vector<16x128xf32>
    %c0_35 = arith.constant 0 : index
    %c0_36 = arith.constant 0 : index
    %c0_37 = arith.constant 0 : index
    %92 = vector.load %arg12[%c0_35, %c0_36, %c0_37] : memref<2x1x128xf32, #tpu.memory_space<vmem>>, vector<1x1x128xf32>
    %93 = vector.shape_cast %92 : vector<1x1x128xf32> to vector<1x128xf32>
    %c0_38 = arith.constant 0 : index
    %c0_39 = arith.constant 0 : index
    %c0_40 = arith.constant 0 : index
    %94 = vector.load %arg13[%c0_38, %c0_39, %c0_40] : memref<2x1x128xf32, #tpu.memory_space<vmem>>, vector<1x1x128xf32>
    %95 = vector.shape_cast %94 : vector<1x1x128xf32> to vector<1x128xf32>
    %cst_41 = arith.constant dense<0.000000e+00> : vector<16xf32>
    %96 = vector.multi_reduction <add>, %91, %cst_41 [1] : vector<16x128xf32> to vector<16xf32>
    %97 = vector.shape_cast %96 : vector<16xf32> to vector<16x1xf32>
    %cst_42 = arith.constant 1.280000e+02 : f32
    %98 = vector.broadcast %cst_42 : f32 to vector<16x1xf32>
    %99 = arith.divf %97, %98 : vector<16x1xf32>
    %100 = vector.broadcast %99 : vector<16x1xf32> to vector<16x128xf32>
    %101 = arith.subf %91, %100 : vector<16x128xf32>
    %102 = arith.mulf %101, %101 : vector<16x128xf32>
    %cst_43 = arith.constant dense<0.000000e+00> : vector<16xf32>
    %103 = vector.multi_reduction <add>, %102, %cst_43 [1] : vector<16x128xf32> to vector<16xf32>
    %104 = vector.shape_cast %103 : vector<16xf32> to vector<16x1xf32>
    %cst_44 = arith.constant 1.280000e+02 : f32
    %105 = vector.broadcast %cst_44 : f32 to vector<16x1xf32>
    %106 = arith.divf %104, %105 : vector<16x1xf32>
    %107 = vector.broadcast %99 : vector<16x1xf32> to vector<16x128xf32>
    %108 = arith.subf %91, %107 : vector<16x128xf32>
    %cst_45 = arith.constant 9.99999974E-6 : f32
    %109 = vector.broadcast %cst_45 : f32 to vector<16x1xf32>
    %110 = arith.addf %106, %109 : vector<16x1xf32>
    %111 = math.rsqrt %110 : vector<16x1xf32>
    %112 = vector.broadcast %111 : vector<16x1xf32> to vector<16x128xf32>
    %113 = arith.mulf %108, %112 : vector<16x128xf32>
    %114 = vector.broadcast %93 : vector<1x128xf32> to vector<16x128xf32>
    %115 = arith.mulf %113, %114 : vector<16x128xf32>
    %116 = vector.broadcast %95 : vector<1x128xf32> to vector<16x128xf32>
    %117 = arith.addf %115, %116 : vector<16x128xf32>
    %118 = arith.truncf %117 : vector<16x128xf32> to vector<16x128xbf16>
    %c0_46 = arith.constant 0 : index
    %c0_47 = arith.constant 0 : index
    %c0_48 = arith.constant 0 : index
    %119 = vector.load %arg8[%c0_46, %c0_47, %c0_48] : memref<2x128x2048xbf16, #tpu.memory_space<vmem>>, vector<1x128x2048xbf16>
    %120 = vector.shape_cast %119 : vector<1x128x2048xbf16> to vector<128x2048xbf16>
    %cst_49 = arith.constant dense<0.000000e+00> : vector<16x2048xf32>
    %121 = tpu.matmul %118, %120, %cst_49 {dimension_numbers = #tpu.dot_dimension_numbers<[1], [0], [0], [1], [0, 0, 1, 1], [], []>} : vector<16x128xbf16>, vector<128x2048xbf16>, vector<16x2048xf32> -> vector<16x2048xf32>
    %c0_50 = arith.constant 0 : index
    %c0_51 = arith.constant 0 : index
    %c0_52 = arith.constant 0 : index
    %122 = vector.load %arg9[%c0_50, %c0_51, %c0_52] : memref<2x1x2048xf32, #tpu.memory_space<vmem>>, vector<1x1x2048xf32>
    %123 = vector.shape_cast %122 : vector<1x1x2048xf32> to vector<1x2048xf32>
    %124 = vector.broadcast %123 : vector<1x2048xf32> to vector<16x2048xf32>
    %125 = arith.addf %121, %124 : vector<16x2048xf32>
    %cst_53 = arith.constant 0.000000e+00 : f32
    %126 = vector.broadcast %cst_53 : f32 to vector<16x2048xf32>
    %127 = arith.maximumf %125, %126 : vector<16x2048xf32>
    %128 = arith.truncf %127 : vector<16x2048xf32> to vector<16x2048xbf16>
    %c0_54 = arith.constant 0 : index
    %c0_55 = arith.constant 0 : index
    %c0_56 = arith.constant 0 : index
    %129 = vector.load %arg10[%c0_54, %c0_55, %c0_56] : memref<2x2048x128xbf16, #tpu.memory_space<vmem>>, vector<1x2048x128xbf16>
    %130 = vector.shape_cast %129 : vector<1x2048x128xbf16> to vector<2048x128xbf16>
    %cst_57 = arith.constant dense<0.000000e+00> : vector<16x128xf32>
    %131 = tpu.matmul %128, %130, %cst_57 {dimension_numbers = #tpu.dot_dimension_numbers<[1], [0], [0], [1], [0, 0, 1, 1], [], []>} : vector<16x2048xbf16>, vector<2048x128xbf16>, vector<16x128xf32> -> vector<16x128xf32>
    %c0_58 = arith.constant 0 : index
    %c0_59 = arith.constant 0 : index
    %c0_60 = arith.constant 0 : index
    %132 = vector.load %arg11[%c0_58, %c0_59, %c0_60] : memref<2x1x128xf32, #tpu.memory_space<vmem>>, vector<1x1x128xf32>
    %133 = vector.shape_cast %132 : vector<1x1x128xf32> to vector<1x128xf32>
    %134 = vector.broadcast %133 : vector<1x128xf32> to vector<16x128xf32>
    %135 = arith.addf %131, %134 : vector<16x128xf32>
    %136 = arith.addf %117, %135 : vector<16x128xf32>
    %c0_61 = arith.constant 0 : index
    %c0_62 = arith.constant 0 : index
    %c0_63 = arith.constant 0 : index
    %137 = vector.load %arg14[%c0_61, %c0_62, %c0_63] : memref<2x1x128xf32, #tpu.memory_space<vmem>>, vector<1x1x128xf32>
    %138 = vector.shape_cast %137 : vector<1x1x128xf32> to vector<1x128xf32>
    %c0_64 = arith.constant 0 : index
    %c0_65 = arith.constant 0 : index
    %c0_66 = arith.constant 0 : index
    %139 = vector.load %arg15[%c0_64, %c0_65, %c0_66] : memref<2x1x128xf32, #tpu.memory_space<vmem>>, vector<1x1x128xf32>
    %140 = vector.shape_cast %139 : vector<1x1x128xf32> to vector<1x128xf32>
    %cst_67 = arith.constant dense<0.000000e+00> : vector<16xf32>
    %141 = vector.multi_reduction <add>, %136, %cst_67 [1] : vector<16x128xf32> to vector<16xf32>
    %142 = vector.shape_cast %141 : vector<16xf32> to vector<16x1xf32>
    %cst_68 = arith.constant 1.280000e+02 : f32
    %143 = vector.broadcast %cst_68 : f32 to vector<16x1xf32>
    %144 = arith.divf %142, %143 : vector<16x1xf32>
    %145 = vector.broadcast %144 : vector<16x1xf32> to vector<16x128xf32>
    %146 = arith.subf %136, %145 : vector<16x128xf32>
    %147 = arith.mulf %146, %146 : vector<16x128xf32>
    %cst_69 = arith.constant dense<0.000000e+00> : vector<16xf32>
    %148 = vector.multi_reduction <add>, %147, %cst_69 [1] : vector<16x128xf32> to vector<16xf32>
    %149 = vector.shape_cast %148 : vector<16xf32> to vector<16x1xf32>
    %cst_70 = arith.constant 1.280000e+02 : f32
    %150 = vector.broadcast %cst_70 : f32 to vector<16x1xf32>
    %151 = arith.divf %149, %150 : vector<16x1xf32>
    %152 = vector.broadcast %144 : vector<16x1xf32> to vector<16x128xf32>
    %153 = arith.subf %136, %152 : vector<16x128xf32>
    %cst_71 = arith.constant 9.99999974E-6 : f32
    %154 = vector.broadcast %cst_71 : f32 to vector<16x1xf32>
    %155 = arith.addf %151, %154 : vector<16x1xf32>
    %156 = math.rsqrt %155 : vector<16x1xf32>
    %157 = vector.broadcast %156 : vector<16x1xf32> to vector<16x128xf32>
    %158 = arith.mulf %153, %157 : vector<16x128xf32>
    %159 = vector.broadcast %138 : vector<1x128xf32> to vector<16x128xf32>
    %160 = arith.mulf %158, %159 : vector<16x128xf32>
    %161 = vector.broadcast %140 : vector<1x128xf32> to vector<16x128xf32>
    %162 = arith.addf %160, %161 : vector<16x128xf32>
    %163 = arith.truncf %162 : vector<16x128xf32> to vector<16x128xbf16>
    %c1 = arith.constant 1 : index
    %c0_72 = arith.constant 0 : index
    %c0_73 = arith.constant 0 : index
    %164 = vector.load %arg4[%c1, %c0_72, %c0_73] : memref<2x128x384xbf16, #tpu.memory_space<vmem>>, vector<1x128x384xbf16>
    %165 = vector.shape_cast %164 : vector<1x128x384xbf16> to vector<128x384xbf16>
    %cst_74 = arith.constant dense<0.000000e+00> : vector<16x384xf32>
    %166 = tpu.matmul %163, %165, %cst_74 {dimension_numbers = #tpu.dot_dimension_numbers<[1], [0], [0], [1], [0, 0, 1, 1], [], []>} : vector<16x128xbf16>, vector<128x384xbf16>, vector<16x384xf32> -> vector<16x384xf32>
    %c1_75 = arith.constant 1 : index
    %c0_76 = arith.constant 0 : index
    %c0_77 = arith.constant 0 : index
    %167 = vector.load %arg5[%c1_75, %c0_76, %c0_77] : memref<2x1x384xf32, #tpu.memory_space<vmem>>, vector<1x1x384xf32>
    %168 = vector.shape_cast %167 : vector<1x1x384xf32> to vector<1x384xf32>
    %169 = vector.broadcast %168 : vector<1x384xf32> to vector<16x384xf32>
    %170 = arith.addf %166, %169 : vector<16x384xf32>
    %171 = vector.extract_strided_slice %170 {offsets = [0, 0], sizes = [16, 128], strides = [1, 1]} : vector<16x384xf32> to vector<16x128xf32>
    %cst_78 = arith.constant 1.250000e-01 : f32
    %172 = vector.broadcast %cst_78 : f32 to vector<16x128xf32>
    %173 = arith.mulf %171, %172 : vector<16x128xf32>
    %174 = arith.truncf %173 : vector<16x128xf32> to vector<16x128xbf16>
    %175 = vector.extract_strided_slice %170 {offsets = [0, 128], sizes = [16, 128], strides = [1, 1]} : vector<16x384xf32> to vector<16x128xf32>
    %176 = arith.truncf %175 : vector<16x128xf32> to vector<16x128xbf16>
    %177 = vector.extract_strided_slice %170 {offsets = [0, 256], sizes = [16, 128], strides = [1, 1]} : vector<16x384xf32> to vector<16x128xf32>
    %178 = arith.truncf %177 : vector<16x128xf32> to vector<16x128xbf16>
    %179 = vector.extract_strided_slice %174 {offsets = [0, 0], sizes = [16, 64], strides = [1, 1]} : vector<16x128xbf16> to vector<16x64xbf16>
    %180 = vector.extract_strided_slice %176 {offsets = [0, 0], sizes = [16, 64], strides = [1, 1]} : vector<16x128xbf16> to vector<16x64xbf16>
    %cst_79 = arith.constant dense<0.000000e+00> : vector<16x16xf32>
    %181 = tpu.matmul %179, %180, %cst_79 {dimension_numbers = #tpu.dot_dimension_numbers<[1], [1], [0], [0], [0, 0, 1, 0], [], []>} : vector<16x64xbf16>, vector<16x64xbf16>, vector<16x16xf32> -> vector<16x16xf32>
    %cst_80 = arith.constant -1.000000e+30 : f32
    %182 = vector.broadcast %cst_80 : f32 to vector<16x16xf32>
    %183 = arith.select %6, %181, %182 : vector<16x16xi1>, vector<16x16xf32>
    %cst_81 = arith.constant dense<0xFF800000> : vector<16xf32>
    %184 = vector.multi_reduction <maximumf>, %183, %cst_81 [1] : vector<16x16xf32> to vector<16xf32>
    %185 = vector.shape_cast %184 : vector<16xf32> to vector<16x1xf32>
    %186 = vector.broadcast %185 : vector<16x1xf32> to vector<16x16xf32>
    %187 = arith.subf %183, %186 : vector<16x16xf32>
    %188 = math.exp %187 : vector<16x16xf32>
    %cst_82 = arith.constant dense<0.000000e+00> : vector<16xf32>
    %189 = vector.multi_reduction <add>, %188, %cst_82 [1] : vector<16x16xf32> to vector<16xf32>
    %190 = vector.shape_cast %189 : vector<16xf32> to vector<16x1xf32>
    %191 = vector.broadcast %190 : vector<16x1xf32> to vector<16x16xf32>
    %192 = arith.divf %188, %191 : vector<16x16xf32>
    %193 = arith.truncf %192 : vector<16x16xf32> to vector<16x16xbf16>
    %194 = vector.extract_strided_slice %178 {offsets = [0, 0], sizes = [16, 64], strides = [1, 1]} : vector<16x128xbf16> to vector<16x64xbf16>
    %cst_83 = arith.constant dense<0.000000e+00> : vector<16x64xf32>
    %195 = tpu.matmul %193, %194, %cst_83 {dimension_numbers = #tpu.dot_dimension_numbers<[1], [0], [0], [1], [0, 0, 1, 1], [], []>} : vector<16x16xbf16>, vector<16x64xbf16>, vector<16x64xf32> -> vector<16x64xf32>
    %196 = vector.extract_strided_slice %174 {offsets = [0, 64], sizes = [16, 64], strides = [1, 1]} : vector<16x128xbf16> to vector<16x64xbf16>
    %197 = vector.extract_strided_slice %176 {offsets = [0, 64], sizes = [16, 64], strides = [1, 1]} : vector<16x128xbf16> to vector<16x64xbf16>
    %cst_84 = arith.constant dense<0.000000e+00> : vector<16x16xf32>
    %198 = tpu.matmul %196, %197, %cst_84 {dimension_numbers = #tpu.dot_dimension_numbers<[1], [1], [0], [0], [0, 0, 1, 0], [], []>} : vector<16x64xbf16>, vector<16x64xbf16>, vector<16x16xf32> -> vector<16x16xf32>
    %cst_85 = arith.constant -1.000000e+30 : f32
    %199 = vector.broadcast %cst_85 : f32 to vector<16x16xf32>
    %200 = arith.select %6, %198, %199 : vector<16x16xi1>, vector<16x16xf32>
    %cst_86 = arith.constant dense<0xFF800000> : vector<16xf32>
    %201 = vector.multi_reduction <maximumf>, %200, %cst_86 [1] : vector<16x16xf32> to vector<16xf32>
    %202 = vector.shape_cast %201 : vector<16xf32> to vector<16x1xf32>
    %203 = vector.broadcast %202 : vector<16x1xf32> to vector<16x16xf32>
    %204 = arith.subf %200, %203 : vector<16x16xf32>
    %205 = math.exp %204 : vector<16x16xf32>
    %cst_87 = arith.constant dense<0.000000e+00> : vector<16xf32>
    %206 = vector.multi_reduction <add>, %205, %cst_87 [1] : vector<16x16xf32> to vector<16xf32>
    %207 = vector.shape_cast %206 : vector<16xf32> to vector<16x1xf32>
    %208 = vector.broadcast %207 : vector<16x1xf32> to vector<16x16xf32>
    %209 = arith.divf %205, %208 : vector<16x16xf32>
    %210 = arith.truncf %209 : vector<16x16xf32> to vector<16x16xbf16>
    %211 = vector.extract_strided_slice %178 {offsets = [0, 64], sizes = [16, 64], strides = [1, 1]} : vector<16x128xbf16> to vector<16x64xbf16>
    %cst_88 = arith.constant dense<0.000000e+00> : vector<16x64xf32>
    %212 = tpu.matmul %210, %211, %cst_88 {dimension_numbers = #tpu.dot_dimension_numbers<[1], [0], [0], [1], [0, 0, 1, 1], [], []>} : vector<16x16xbf16>, vector<16x64xbf16>, vector<16x64xf32> -> vector<16x64xf32>
    %213 = tpu.concatenate %195, %212 in 1 : vector<16x64xf32>, vector<16x64xf32> -> vector<16x128xf32>
    %214 = arith.truncf %213 : vector<16x128xf32> to vector<16x128xbf16>
    %c1_89 = arith.constant 1 : index
    %c0_90 = arith.constant 0 : index
    %c0_91 = arith.constant 0 : index
    %215 = vector.load %arg6[%c1_89, %c0_90, %c0_91] : memref<2x128x128xbf16, #tpu.memory_space<vmem>>, vector<1x128x128xbf16>
    %216 = vector.shape_cast %215 : vector<1x128x128xbf16> to vector<128x128xbf16>
    %cst_92 = arith.constant dense<0.000000e+00> : vector<16x128xf32>
    %217 = tpu.matmul %214, %216, %cst_92 {dimension_numbers = #tpu.dot_dimension_numbers<[1], [0], [0], [1], [0, 0, 1, 1], [], []>} : vector<16x128xbf16>, vector<128x128xbf16>, vector<16x128xf32> -> vector<16x128xf32>
    %c1_93 = arith.constant 1 : index
    %c0_94 = arith.constant 0 : index
    %c0_95 = arith.constant 0 : index
    %218 = vector.load %arg7[%c1_93, %c0_94, %c0_95] : memref<2x1x128xf32, #tpu.memory_space<vmem>>, vector<1x1x128xf32>
    %219 = vector.shape_cast %218 : vector<1x1x128xf32> to vector<1x128xf32>
    %220 = vector.broadcast %219 : vector<1x128xf32> to vector<16x128xf32>
    %221 = arith.addf %217, %220 : vector<16x128xf32>
    %222 = arith.addf %162, %221 : vector<16x128xf32>
    %c1_96 = arith.constant 1 : index
    %c0_97 = arith.constant 0 : index
    %c0_98 = arith.constant 0 : index
    %223 = vector.load %arg12[%c1_96, %c0_97, %c0_98] : memref<2x1x128xf32, #tpu.memory_space<vmem>>, vector<1x1x128xf32>
    %224 = vector.shape_cast %223 : vector<1x1x128xf32> to vector<1x128xf32>
    %c1_99 = arith.constant 1 : index
    %c0_100 = arith.constant 0 : index
    %c0_101 = arith.constant 0 : index
    %225 = vector.load %arg13[%c1_99, %c0_100, %c0_101] : memref<2x1x128xf32, #tpu.memory_space<vmem>>, vector<1x1x128xf32>
    %226 = vector.shape_cast %225 : vector<1x1x128xf32> to vector<1x128xf32>
    %cst_102 = arith.constant dense<0.000000e+00> : vector<16xf32>
    %227 = vector.multi_reduction <add>, %222, %cst_102 [1] : vector<16x128xf32> to vector<16xf32>
    %228 = vector.shape_cast %227 : vector<16xf32> to vector<16x1xf32>
    %cst_103 = arith.constant 1.280000e+02 : f32
    %229 = vector.broadcast %cst_103 : f32 to vector<16x1xf32>
    %230 = arith.divf %228, %229 : vector<16x1xf32>
    %231 = vector.broadcast %230 : vector<16x1xf32> to vector<16x128xf32>
    %232 = arith.subf %222, %231 : vector<16x128xf32>
    %233 = arith.mulf %232, %232 : vector<16x128xf32>
    %cst_104 = arith.constant dense<0.000000e+00> : vector<16xf32>
    %234 = vector.multi_reduction <add>, %233, %cst_104 [1] : vector<16x128xf32> to vector<16xf32>
    %235 = vector.shape_cast %234 : vector<16xf32> to vector<16x1xf32>
    %cst_105 = arith.constant 1.280000e+02 : f32
    %236 = vector.broadcast %cst_105 : f32 to vector<16x1xf32>
    %237 = arith.divf %235, %236 : vector<16x1xf32>
    %238 = vector.broadcast %230 : vector<16x1xf32> to vector<16x128xf32>
    %239 = arith.subf %222, %238 : vector<16x128xf32>
    %cst_106 = arith.constant 9.99999974E-6 : f32
    %240 = vector.broadcast %cst_106 : f32 to vector<16x1xf32>
    %241 = arith.addf %237, %240 : vector<16x1xf32>
    %242 = math.rsqrt %241 : vector<16x1xf32>
    %243 = vector.broadcast %242 : vector<16x1xf32> to vector<16x128xf32>
    %244 = arith.mulf %239, %243 : vector<16x128xf32>
    %245 = vector.broadcast %224 : vector<1x128xf32> to vector<16x128xf32>
    %246 = arith.mulf %244, %245 : vector<16x128xf32>
    %247 = vector.broadcast %226 : vector<1x128xf32> to vector<16x128xf32>
    %248 = arith.addf %246, %247 : vector<16x128xf32>
    %249 = arith.truncf %248 : vector<16x128xf32> to vector<16x128xbf16>
    %c1_107 = arith.constant 1 : index
    %c0_108 = arith.constant 0 : index
    %c0_109 = arith.constant 0 : index
    %250 = vector.load %arg8[%c1_107, %c0_108, %c0_109] : memref<2x128x2048xbf16, #tpu.memory_space<vmem>>, vector<1x128x2048xbf16>
    %251 = vector.shape_cast %250 : vector<1x128x2048xbf16> to vector<128x2048xbf16>
    %cst_110 = arith.constant dense<0.000000e+00> : vector<16x2048xf32>
    %252 = tpu.matmul %249, %251, %cst_110 {dimension_numbers = #tpu.dot_dimension_numbers<[1], [0], [0], [1], [0, 0, 1, 1], [], []>} : vector<16x128xbf16>, vector<128x2048xbf16>, vector<16x2048xf32> -> vector<16x2048xf32>
    %c1_111 = arith.constant 1 : index
    %c0_112 = arith.constant 0 : index
    %c0_113 = arith.constant 0 : index
    %253 = vector.load %arg9[%c1_111, %c0_112, %c0_113] : memref<2x1x2048xf32, #tpu.memory_space<vmem>>, vector<1x1x2048xf32>
    %254 = vector.shape_cast %253 : vector<1x1x2048xf32> to vector<1x2048xf32>
    %255 = vector.broadcast %254 : vector<1x2048xf32> to vector<16x2048xf32>
    %256 = arith.addf %252, %255 : vector<16x2048xf32>
    %cst_114 = arith.constant 0.000000e+00 : f32
    %257 = vector.broadcast %cst_114 : f32 to vector<16x2048xf32>
    %258 = arith.maximumf %256, %257 : vector<16x2048xf32>
    %259 = arith.truncf %258 : vector<16x2048xf32> to vector<16x2048xbf16>
    %c1_115 = arith.constant 1 : index
    %c0_116 = arith.constant 0 : index
    %c0_117 = arith.constant 0 : index
    %260 = vector.load %arg10[%c1_115, %c0_116, %c0_117] : memref<2x2048x128xbf16, #tpu.memory_space<vmem>>, vector<1x2048x128xbf16>
    %261 = vector.shape_cast %260 : vector<1x2048x128xbf16> to vector<2048x128xbf16>
    %cst_118 = arith.constant dense<0.000000e+00> : vector<16x128xf32>
    %262 = tpu.matmul %259, %261, %cst_118 {dimension_numbers = #tpu.dot_dimension_numbers<[1], [0], [0], [1], [0, 0, 1, 1], [], []>} : vector<16x2048xbf16>, vector<2048x128xbf16>, vector<16x128xf32> -> vector<16x128xf32>
    %c1_119 = arith.constant 1 : index
    %c0_120 = arith.constant 0 : index
    %c0_121 = arith.constant 0 : index
    %263 = vector.load %arg11[%c1_119, %c0_120, %c0_121] : memref<2x1x128xf32, #tpu.memory_space<vmem>>, vector<1x1x128xf32>
    %264 = vector.shape_cast %263 : vector<1x1x128xf32> to vector<1x128xf32>
    %265 = vector.broadcast %264 : vector<1x128xf32> to vector<16x128xf32>
    %266 = arith.addf %262, %265 : vector<16x128xf32>
    %267 = arith.addf %248, %266 : vector<16x128xf32>
    %c1_122 = arith.constant 1 : index
    %c0_123 = arith.constant 0 : index
    %c0_124 = arith.constant 0 : index
    %268 = vector.load %arg14[%c1_122, %c0_123, %c0_124] : memref<2x1x128xf32, #tpu.memory_space<vmem>>, vector<1x1x128xf32>
    %269 = vector.shape_cast %268 : vector<1x1x128xf32> to vector<1x128xf32>
    %c1_125 = arith.constant 1 : index
    %c0_126 = arith.constant 0 : index
    %c0_127 = arith.constant 0 : index
    %270 = vector.load %arg15[%c1_125, %c0_126, %c0_127] : memref<2x1x128xf32, #tpu.memory_space<vmem>>, vector<1x1x128xf32>
    %271 = vector.shape_cast %270 : vector<1x1x128xf32> to vector<1x128xf32>
    %cst_128 = arith.constant dense<0.000000e+00> : vector<16xf32>
    %272 = vector.multi_reduction <add>, %267, %cst_128 [1] : vector<16x128xf32> to vector<16xf32>
    %273 = vector.shape_cast %272 : vector<16xf32> to vector<16x1xf32>
    %cst_129 = arith.constant 1.280000e+02 : f32
    %274 = vector.broadcast %cst_129 : f32 to vector<16x1xf32>
    %275 = arith.divf %273, %274 : vector<16x1xf32>
    %276 = vector.broadcast %275 : vector<16x1xf32> to vector<16x128xf32>
    %277 = arith.subf %267, %276 : vector<16x128xf32>
    %278 = arith.mulf %277, %277 : vector<16x128xf32>
    %cst_130 = arith.constant dense<0.000000e+00> : vector<16xf32>
    %279 = vector.multi_reduction <add>, %278, %cst_130 [1] : vector<16x128xf32> to vector<16xf32>
    %280 = vector.shape_cast %279 : vector<16xf32> to vector<16x1xf32>
    %cst_131 = arith.constant 1.280000e+02 : f32
    %281 = vector.broadcast %cst_131 : f32 to vector<16x1xf32>
    %282 = arith.divf %280, %281 : vector<16x1xf32>
    %283 = vector.broadcast %275 : vector<16x1xf32> to vector<16x128xf32>
    %284 = arith.subf %267, %283 : vector<16x128xf32>
    %cst_132 = arith.constant 9.99999974E-6 : f32
    %285 = vector.broadcast %cst_132 : f32 to vector<16x1xf32>
    %286 = arith.addf %282, %285 : vector<16x1xf32>
    %287 = math.rsqrt %286 : vector<16x1xf32>
    %288 = vector.broadcast %287 : vector<16x1xf32> to vector<16x128xf32>
    %289 = arith.mulf %284, %288 : vector<16x128xf32>
    %290 = vector.broadcast %269 : vector<1x128xf32> to vector<16x128xf32>
    %291 = arith.mulf %289, %290 : vector<16x128xf32>
    %292 = vector.broadcast %271 : vector<1x128xf32> to vector<16x128xf32>
    %293 = arith.addf %291, %292 : vector<16x128xf32>
    %c0_133 = arith.constant 0 : index
    %c0_134 = arith.constant 0 : index
    %294 = vector.load %arg16[%c0_133, %c0_134] : memref<16x128xf32, #tpu.memory_space<vmem>>, vector<16x128xf32>
    tpu.vector_store %arg16[%c0_133, %c0_134], %293 {strides = array<i32>} : memref<16x128xf32, #tpu.memory_space<vmem>>, vector<16x128xf32>,
    return
  }
  func.func @transform_0(%arg0: i32) -> (i32, i32) {
    %c0_i32 = arith.constant 0 : i32
    %c0_i32_0 = arith.constant 0 : i32
    %c0_i32_1 = arith.constant 0 : i32
    return %c0_i32, %c0_i32_0 : i32, i32
  }
  func.func @transform_1(%arg0: i32) -> (i32, i32) {
    %c0_i32 = arith.constant 0 : i32
    %c0_i32_0 = arith.constant 0 : i32
    %c0_i32_1 = arith.constant 0 : i32
    return %c0_i32, %c0_i32_0 : i32, i32
  }
  func.func @transform_2(%arg0: i32) -> (i32, i32) {
    %c0_i32 = arith.constant 0 : i32
    %c0_i32_0 = arith.constant 0 : i32
    %c0_i32_1 = arith.constant 0 : i32
    return %c0_i32, %c0_i32_0 : i32, i32
  }
  func.func @transform_3(%arg0: i32) -> (i32, i32, i32) {
    %c0_i32 = arith.constant 0 : i32
    %c0_i32_0 = arith.constant 0 : i32
    %c0_i32_1 = arith.constant 0 : i32
    %c0_i32_2 = arith.constant 0 : i32
    return %c0_i32, %c0_i32_0, %c0_i32_1 : i32, i32, i32
  }
  func.func @transform_4(%arg0: i32) -> (i32, i32, i32) {
    %c0_i32 = arith.constant 0 : i32
    %c0_i32_0 = arith.constant 0 : i32
    %c0_i32_1 = arith.constant 0 : i32
    %c0_i32_2 = arith.constant 0 : i32
    return %c0_i32, %c0_i32_0, %c0_i32_1 : i32, i32, i32
  }
  func.func @transform_5(%arg0: i32) -> (i32, i32, i32) {
    %c0_i32 = arith.constant 0 : i32
    %c0_i32_0 = arith.constant 0 : i32
    %c0_i32_1 = arith.constant 0 : i32
    %c0_i32_2 = arith.constant 0 : i32
    return %c0_i32, %c0_i32_0, %c0_i32_1 : i32, i32, i32
  }
  func.func @transform_6(%arg0: i32) -> (i32, i32, i32) {
    %c0_i32 = arith.constant 0 : i32
    %c0_i32_0 = arith.constant 0 : i32
    %c0_i32_1 = arith.constant 0 : i32
    %c0_i32_2 = arith.constant 0 : i32
    return %c0_i32, %c0_i32_0, %c0_i32_1 : i32, i32, i32
  }
  func.func @transform_7(%arg0: i32) -> (i32, i32, i32) {
    %c0_i32 = arith.constant 0 : i32
    %c0_i32_0 = arith.constant 0 : i32
    %c0_i32_1 = arith.constant 0 : i32
    %c0_i32_2 = arith.constant 0 : i32
    return %c0_i32, %c0_i32_0, %c0_i32_1 : i32, i32, i32
  }
  func.func @transform_8(%arg0: i32) -> (i32, i32, i32) {
    %c0_i32 = arith.constant 0 : i32
    %c0_i32_0 = arith.constant 0 : i32
    %c0_i32_1 = arith.constant 0 : i32
    %c0_i32_2 = arith.constant 0 : i32
    return %c0_i32, %c0_i32_0, %c0_i32_1 : i32, i32, i32
  }
  func.func @transform_9(%arg0: i32) -> (i32, i32, i32) {
    %c0_i32 = arith.constant 0 : i32
    %c0_i32_0 = arith.constant 0 : i32
    %c0_i32_1 = arith.constant 0 : i32
    %c0_i32_2 = arith.constant 0 : i32
    return %c0_i32, %c0_i32_0, %c0_i32_1 : i32, i32, i32
  }
  func.func @transform_10(%arg0: i32) -> (i32, i32, i32) {
    %c0_i32 = arith.constant 0 : i32
    %c0_i32_0 = arith.constant 0 : i32
    %c0_i32_1 = arith.constant 0 : i32
    %c0_i32_2 = arith.constant 0 : i32
    return %c0_i32, %c0_i32_0, %c0_i32_1 : i32, i32, i32
  }
  func.func @transform_11(%arg0: i32) -> (i32, i32, i32) {
    %c0_i32 = arith.constant 0 : i32
    %c0_i32_0 = arith.constant 0 : i32
    %c0_i32_1 = arith.constant 0 : i32
    %c0_i32_2 = arith.constant 0 : i32
    return %c0_i32, %c0_i32_0, %c0_i32_1 : i32, i32, i32
  }
  func.func @transform_12(%arg0: i32) -> (i32, i32, i32) {
    %c0_i32 = arith.constant 0 : i32
    %c0_i32_0 = arith.constant 0 : i32
    %c0_i32_1 = arith.constant 0 : i32
    %c0_i32_2 = arith.constant 0 : i32
    return %c0_i32, %c0_i32_0, %c0_i32_1 : i32, i32, i32
  }
  func.func @transform_13(%arg0: i32) -> (i32, i32, i32) {
    %c0_i32 = arith.constant 0 : i32
    %c0_i32_0 = arith.constant 0 : i32
    %c0_i32_1 = arith.constant 0 : i32
    %c0_i32_2 = arith.constant 0 : i32
    return %c0_i32, %c0_i32_0, %c0_i32_1 : i32, i32, i32
  }
  func.func @transform_14(%arg0: i32) -> (i32, i32, i32) {
    %c0_i32 = arith.constant 0 : i32
    %c0_i32_0 = arith.constant 0 : i32
    %c0_i32_1 = arith.constant 0 : i32
    %c0_i32_2 = arith.constant 0 : i32
    return %c0_i32, %c0_i32_0, %c0_i32_1 : i32, i32, i32
  }
  func.func @transform_15(%arg0: i32) -> (i32, i32) {
    %c0_i32 = arith.constant 0 : i32
    %c0_i32_0 = arith.constant 0 : i32
    %c0_i32_1 = arith.constant 0 : i32
    return %c0_i32, %c0_i32_0 : i32, i32
  }
}

</mosaic_0001>

<bundles_post_ra>
// kernel: transformer_cell_forward.1
= control target key start
LH: loop header
LB: loop body
LE: loop exit
PB: predicated region body
PF: predicated region fallthrough
CT: control target
= control target key end

     0   :  { %20 = vsyncpa [#allocation3], 0  ;;  %s9178_s0 = inlined_call_operand.hbm [shape: f32[16,128], index: 0, kind: input, shape index: {}]   ;;  %s9179_s1 = inlined_call_operand.vmem [shape: f32[1,128], index: 1, kind: input, shape index: {}]   ;;  %s9180_s2 = inlined_call_operand.vmem [shape: f32[1,128], index: 2, kind: input, shape index: {}]   ;;  %s9181_s3 = inlined_call_operand.hbm [shape: bf16[2,128,384], index: 3, kind: input, shape index: {}]   ;;  %s9182_s4 = inlined_call_operand.vmem [shape: f32[2,1,384], index: 4, kind: input, shape index: {}]   ;;  %s9183_s5 = inlined_call_operand.hbm [shape: bf16[2,128,128], index: 5, kind: input, shape index: {}]   ;;  %s9184_s6 = inlined_call_operand.vmem [shape: f32[2,1,128], index: 6, kind: input, shape index: {}]   ;;  %s9185_s7 = inlined_call_operand.hbm [shape: bf16[2,128,2048], index: 7, kind: input, shape index: {}]   ;;  %s9186_s8 = inlined_call_operand.hbm [shape: f32[2,1,2048], index: 8, kind: input, shape index: {}]   ;;  %s9187_s9 = inlined_call_operand.hbm [shape: bf16[2,2048,128], index: 9, kind: input, shape index: {}]   ;;  %s9188_s10 = inlined_call_operand.vmem [shape: f32[2,1,128], index: 10, kind: input, shape index: {}]   ;;  %s9189_s11 = inlined_call_operand.vmem [shape: f32[2,1,128], index: 11, kind: input, shape index: {}]   ;;  %s9190_s12 = inlined_call_operand.hbm [shape: f32[2,1,128], index: 12, kind: input, shape index: {}]   ;;  %s9191_s13 = inlined_call_operand.vmem [shape: f32[2,1,128], index: 13, kind: input, shape index: {}]   ;;  %s9192_s14 = inlined_call_operand.hbm [shape: f32[2,1,128], index: 14, kind: input, shape index: {}]   ;;  %s9193_s15 = inlined_call_operand.hbm [shape: f32[16,128], index: 15, kind: output, shape index: {}]  }
   0x1   :  { %21 = vsyncpa [#allocation6], 0 }
   0x2   :  { %22 = vsyncpa [#allocation9], 0 }
   0x3   :  { %23 = vsyncpa [#allocation12], 0 }
   0x4   :  { %24 = vsyncpa [#allocation15], 0 }
   0x5   :  { %25 = vsyncpa [#allocation4], 0  ;;  %s8638_s18 = smov [#allocation5]  }
   0x6   :  { %s47_s19 = sshll.u32 %s8638_s18, 4  ;;  %s48_s19 = int_to_ptr.vmem [resolvable:$true] %s47_s19 }
   0x7   :  { %s8454_s20 = scalar_lea.vmem %s48_s19, 6144  ;;  %p8459_p1 = scmp.lt.s32.totalorder %s48_s19, %s48_s19 }
   0x8   :  { %p8455_p0 = scmp.ne.s32.totalorder %s48_s19, %s8454_s20  ;;  %p8460_p2 = scmp.lt.s32.totalorder %s8454_s20, %s8454_s20 }
   0xa   :  { %p8461_p3 = por %p8460_p2, %p8459_p1 }
   0xc   :  { %p8462_p4 = pnand %p8461_p3, %p8455_p0 }
   0xe   :  { %8465 = shalt.err (!%p8462_p4)
}
   0xf   :  { %s8639_s21 = smov 192   ;;  %s8640_s22 = smov 12  }
  0x10   :  { %53 = dma.hbm_to_vmem [thread:$0]  %s9181_s3, 6144, %s48_s19, [#allocation6], %s8639_s21, %s8639_s21, %s8640_s22  }
  0x11   :  { %s8641_s25 = smov [#allocation8]  }
  0x12   :  { %s75_s26 = sshll.u32 %s8641_s25, 4  ;;  %s76_s26 = int_to_ptr.vmem [resolvable:$true] %s75_s26 }
  0x13   :  { %s8474_s27 = scalar_lea.vmem %s76_s26, 32768  ;;  %p8479_p6 = scmp.lt.s32.totalorder %s76_s26, %s76_s26 }
  0x14   :  { %p8475_p5 = scmp.ne.s32.totalorder %s76_s26, %s8474_s27  ;;  %p8480_p7 = scmp.lt.s32.totalorder %s8474_s27, %s8474_s27 }
  0x16   :  { %p8481_p8 = por %p8480_p7, %p8479_p6 }
  0x18   :  { %p8482_p9 = pnand %p8481_p8, %p8475_p5 }
  0x1a   :  { %8485 = shalt.err (!%p8482_p9)
}
  0x1b   :  { %s8642_s28 = smov 1024   ;;  %s8643_s29 = smov 64  }
  0x1c   :  { %81 = dma.hbm_to_vmem [thread:$0]  %s9185_s7, 32768, %s76_s26, [#allocation9], %s8642_s28, %s8642_s28, %s8643_s29  }
  0x1d   :  { %s8644_s17 = smov [#allocation11]   ;;  %s8645_s3 = smov [#allocation2]  }
  0x1e   :  { %s99_s18 = sshll.u32 %s8644_s17, 4  ;;  %s31_s19 = sshll.u32 %s8645_s3, 4  ;;  %s100_s18 = int_to_ptr.vmem [resolvable:$true] %s99_s18  ;;  %s32_s19 = int_to_ptr.vmem [resolvable:$true] %s31_s19 }
  0x1f   :  { %s8494_s20 = scalar_lea.vmem %s100_s18, 32768  ;;  %p8499_p11 = scmp.lt.s32.totalorder %s100_s18, %s100_s18 }
  0x20   :  { %p8495_p10 = scmp.ne.s32.totalorder %s100_s18, %s8494_s20  ;;  %p8500_p12 = scmp.lt.s32.totalorder %s8494_s20, %s8494_s20 }
  0x22   :  { %p8501_p13 = por %p8500_p12, %p8499_p11 }
  0x24   :  { %p8502_p0 = pnand %p8501_p13, %p8495_p10 }
  0x26   :  { %8505 = shalt.err (!%p8502_p0)
}
  0x27   :  { %s8646_s21 = smov 4   ;;  %s8514_s7 = scalar_lea.vmem %s32_s19, 256 }
  0x28   :  { %105 = dma.hbm_to_vmem [thread:$0]  %s9187_s9, 32768, %s100_s18, [#allocation12], %s8643_s29, %s8643_s29, %s8646_s21  }
  0x29   :  { %p8515_p1 = scmp.ne.s32.totalorder %s32_s19, %s8514_s7  ;;  %p8519_p2 = scmp.lt.s32.totalorder %s32_s19, %s32_s19 }
  0x2a   :  { %p8520_p3 = scmp.lt.s32.totalorder %s8514_s7, %s8514_s7 }
  0x2c   :  { %p8521_p4 = por %p8520_p3, %p8519_p2 }
  0x2e   :  { %p8522_p5 = pnand %p8521_p4, %p8515_p1 }
  0x30   :  { %8525 = shalt.err (!%p8522_p5)
}
  0x31   :  { %s8647_s24 = smov 128   ;;  %s8648_s25 = smov 8  }
  0x32   :  { %37 = dma.hbm_to_vmem [thread:$0]  %s9178_s0, 256, %s32_s19, [#allocation3], %s8647_s24, %s8647_s24, %s8648_s25  }
  0x33   :  { %s8649_s28 = smov [#allocation7]   ;;  %s8650_s9 = smov [#allocation10]  }
  0x34   :  { %s61_s30 = sshll.u32 %s8649_s28, 4  ;;  %s87_s16 = sshll.u32 %s8650_s9, 4  ;;  %s62_s30 = int_to_ptr.vmem [resolvable:$true] %s61_s30  ;;  %s88_s16 = int_to_ptr.vmem [resolvable:$true] %s87_s16 }
  0x35   :  { %s8534_s17 = scalar_lea.vmem %s62_s30, 2048  ;;  %p8539_p7 = scmp.lt.s32.totalorder %s62_s30, %s62_s30 }
  0x36   :  { %p8535_p6 = scmp.ne.s32.totalorder %s62_s30, %s8534_s17  ;;  %p8540_p8 = scmp.lt.s32.totalorder %s8534_s17, %s8534_s17 }
  0x38   :  { %p8541_p9 = por %p8540_p8, %p8539_p7 }
  0x3a   :  { %p8542_p10 = pnand %p8541_p9, %p8535_p6 }
  0x3c   :  { %8545 = shalt.err (!%p8542_p10)
}
  0x3d   :  { %67 = dma.hbm_to_vmem [thread:$0]  %s9183_s5, 2048, %s62_s30, [#allocation6], %s8643_s29, %s8643_s29, %s8646_s21  }
  0x3e   :  { %s8554_s0 = scalar_lea.vmem %s88_s16, 512  ;;  %p8559_p12 = scmp.lt.s32.totalorder %s88_s16, %s88_s16 }
  0x3f   :  { %p8555_p11 = scmp.ne.s32.totalorder %s88_s16, %s8554_s0  ;;  %p8560_p13 = scmp.lt.s32.totalorder %s8554_s0, %s8554_s0 }
  0x41   :  { %p8561_p0 = por %p8560_p13, %p8559_p12 }
  0x43   :  { %p8562_p1 = pnand %p8561_p0, %p8555_p11 }
  0x45   :  { %8565 = shalt.err (!%p8562_p1)
}
  0x46   :  { %s8651_s19 = smov 256   ;;  %s8652_s20 = smov 16  }
  0x47   :  { %93 = dma.hbm_to_vmem [thread:$0]  %s9186_s8, 512, %s88_s16, [#allocation9], %s8651_s19, %s8651_s19, %s8652_s20  }
  0x48   :  { %s8653_s7 = smov [#allocation13]  }
  0x49   :  { %s115_s26 = sshll.u32 %s8653_s7, 4  ;;  %s116_s26 = int_to_ptr.vmem [resolvable:$true] %s115_s26 }
  0x4a   :  { %s8574_s27 = scalar_lea.vmem %s116_s26, 32  ;;  %p8579_p3 = scmp.lt.s32.totalorder %s116_s26, %s116_s26 }
  0x4b   :  { %p8575_p2 = scmp.ne.s32.totalorder %s116_s26, %s8574_s27  ;;  %p8580_p4 = scmp.lt.s32.totalorder %s8574_s27, %s8574_s27 }
  0x4d   :  { %p8581_p5 = por %p8580_p4, %p8579_p3 }
  0x4f   :  { %p8582_p6 = pnand %p8581_p5, %p8575_p2 }
  0x51   :  { %8585 = shalt.err (!%p8582_p6)
}
  0x52   :  { %s8654_s5 = smov 1   ;;  %s8655_s30 = smov [#allocation14]  }
  0x53   :  { %121 = dma.hbm_to_vmem [thread:$0]  %s9190_s12, 32, %s116_s26, [#allocation12], %s8652_s20, %s8652_s20, %s8654_s5  }
  0x54   :  { %s129_s9 = sshll.u32 %s8655_s30, 4  ;;  %s130_s9 = int_to_ptr.vmem [resolvable:$true] %s129_s9 }
  0x55   :  { %s8594_s17 = scalar_lea.vmem %s130_s9, 32  ;;  %p8599_p8 = scmp.lt.s32.totalorder %s130_s9, %s130_s9 }
  0x56   :  { %p8595_p7 = scmp.ne.s32.totalorder %s130_s9, %s8594_s17  ;;  %p8600_p9 = scmp.lt.s32.totalorder %s8594_s17, %s8594_s17 }
  0x58   :  { %p8601_p10 = por %p8600_p9, %p8599_p8 }
  0x5a   :  { %p8602_p11 = pnand %p8601_p10, %p8595_p7 }
  0x5c   :  { %8605 = shalt.err (!%p8602_p11)
}
  0x5d   :  { %135 = dma.hbm_to_vmem [thread:$0]  %s9192_s14, 32, %s130_s9, [#allocation15], %s8652_s20, %s8652_s20, %s8654_s5  }
  0x5e   :  { %8626 = dma.done.wait [#allocation3], 256  }
  0x5f   :  { %8627 = vsyncadd [#allocation3], 4294967040 }
  0x60   :  { %8628 = dma.done.wait [#allocation6], 8192  }
  0x61   :  { %8629 = vsyncadd [#allocation6], 4294959104 }
  0x62   :  { %8630 = dma.done.wait [#allocation9], 33280  }
  0x63   :  { %8631 = vsyncadd [#allocation9], 4294934016 }
  0x64   :  { %8632 = dma.done.wait [#allocation12], 32800  }
  0x65   :  { %8633 = vsyncadd [#allocation12], 4294934496 }
  0x66   :  { %8634 = dma.done.wait [#allocation15], 32  }
  0x67   :  { %8635 = vsyncadd [#allocation15], 4294967264  ;;  %v171_v0 = vld [vmem:[#allocation2] sm:$0xff]  ;;  %v172_v1 = vld [vmem:[#allocation2 + $0x8] sm:$0xff]  ;;  %v8656_v4 = vmov 0.0   ;;  %v8657_v30 = vmov 0   ;;  %v161_v53 = vlaneseq }
  0x68   :  { %175 = vadd.xlane.f32.xlu0 %v171_v0  ;;  %v8058_v2 = vld [vmem:[#allocation5 + $0xac] ss:$12 sps:$4 sm:$0xff]   ;;  %v8060_v3 = vld [vmem:[#allocation5 + $0xa8] ss:$12 sps:$4 sm:$0xff]   ;;  %7898 = vmatprep.subr.bf16.mxu1 %v8656_v4  ;;  %v8061_v5 = vld [vmem:[#allocation5 + $0xb0] ss:$12 sps:$4 sm:$0xff]  }
  0x69   :  { %392 = vmatprep.subr.bf16.mxu0 %v8058_v2  ;;  %7899 = vmatpush3.bf16.msra.mxu1 %v8061_v5  ;;  %v8062_v14 = vld [vmem:[#allocation5 + $0x94] ss:$12 sps:$4 sm:$0xff]   ;;  %v8064_v15 = vld [vmem:[#allocation5 + $0x90] ss:$12 sps:$4 sm:$0xff]   ;;  %v8065_v16 = vld [vmem:[#allocation5 + $0x98] ss:$12 sps:$4 sm:$0xff]  }
  0x6a   :  { %393 = vmatpush1.bf16.msra.mxu0 %v8060_v3  ;;  %7900 = vmatprep.subr.bf16.mxu1 %v8656_v4  ;;  %v8066_v17 = vld [vmem:[#allocation5 + $0x7c] ss:$12 sps:$4 sm:$0xff]   ;;  %v8068_v18 = vld [vmem:[#allocation5 + $0x78] ss:$12 sps:$4 sm:$0xff]   ;;  %v8069_v19 = vld [vmem:[#allocation5 + $0x80] ss:$12 sps:$4 sm:$0xff]  }
  0x6b   :  { %394 = vmatprep.subr.bf16.mxu0 %v8062_v14  ;;  %v8070_v20 = vld [vmem:[#allocation5 + $0x64] ss:$12 sps:$4 sm:$0xff]   ;;  %v8072_v21 = vld [vmem:[#allocation5 + $0x60] ss:$12 sps:$4 sm:$0xff]   ;;  %v8073_v22 = vld [vmem:[#allocation5 + $0x68] ss:$12 sps:$4 sm:$0xff]   ;;  %424 = vmatprep.mubr.bf16.mxu0 %v8657_v30 }
  0x6c   :  { %177 = vadd.xlane.f32.xlu0 %v172_v1  ;;  %v8074_v23 = vld [vmem:[#allocation5 + $0x4c] ss:$12 sps:$4 sm:$0xff]   ;;  %v8076_v24 = vld [vmem:[#allocation5 + $0x48] ss:$12 sps:$4 sm:$0xff]   ;;  %v8077_v25 = vld [vmem:[#allocation5 + $0x50] ss:$12 sps:$4 sm:$0xff]  }
  0x6d   :  { %7901 = vmatpush3.bf16.msra.mxu1 %v8065_v16  ;;  %v8078_v26 = vld [vmem:[#allocation5 + $0x34] ss:$12 sps:$4 sm:$0xff]   ;;  %v8080_v27 = vld [vmem:[#allocation5 + $0x30] ss:$12 sps:$4 sm:$0xff]   ;;  %v8081_v28 = vld [vmem:[#allocation5 + $0x38] ss:$12 sps:$4 sm:$0xff]  }
  0x6e   :  { %395 = vmatpush1.bf16.msra.mxu0 %v8064_v15  ;;  %7902 = vmatprep.subr.bf16.mxu1 %v8656_v4  ;;  %v8082_v29 = vld [vmem:[#allocation5 + $0x1c] ss:$12 sps:$4 sm:$0xff]   ;;  %vm8658_vm0 = vmmov 0   ;;  %v8084_v31 = vld [vmem:[#allocation5 + $0x18] ss:$12 sps:$4 sm:$0xff]   ;;  %v8811_v54 = vshrl.u32 %v161_v53, 7 }
  0x6f   :  { %396 = vmatprep.subr.bf16.mxu0 %v8066_v17  ;;  %7914 = vmatprep.mubr.msk.bf16.mxu1 %vm8658_vm0, %v8656_v4  ;;  %v8085_v32 = vld [vmem:[#allocation5 + $0x20] ss:$12 sps:$4 sm:$0xff]   ;;  %v8086_v33 = vld [vmem:[#allocation5 + $0x4] ss:$12 sps:$4 sm:$0xff]   ;;  %v8089_v35 = vld [vmem:[#allocation5 + $0x8] ss:$12 sps:$4 sm:$0xff]  }
  0x70   :  { %v8088_v34 = vld [vmem:[#allocation5] ss:$12 sps:$4 sm:$0xff]   ;;  %v6891_v44 = vld [vmem:[%s9179_s1] ss:$0 sm:$0xff]  ;;  %v8814_v55 = vsub.s32 1, %v8811_v54  ;;  %v8820_v61 = vsub.s32 0, %v8811_v54 }
  0x71   :  { %7903 = vmatpush3.bf16.msra.mxu1 %v8069_v19  ;;  %v6892_v48 = vld [vmem:[%s9180_s2] ss:$0 sm:$0xff]  ;;  %vm481_vm1 = vcmask 523264   ;;  %v165_v19 = vand.u32 127, %v161_v53  ;;  %vm531_vm3 = vcmask 130048   ;;  %s8659_s17 = smov [#allocation16]  }
  0x72   :  { %397 = vmatpush1.bf16.msra.mxu0 %v8068_v18  ;;  %7904 = vmatprep.subr.bf16.mxu1 %v8656_v4  ;;  %v247_v58 = vld [vmem:[%s9182_s4] sm:$0x7]  ;;  %s6875_s8 = sshll.u32 %s8659_s17, 4  ;;  %s6876_s8 = int_to_ptr.vmem [resolvable:$true] %s6875_s8 }
  0x73   :  { %398 = vmatprep.subr.bf16.mxu0 %v8070_v20  ;;  %v256_v62 = vrot.slane %v247_v58, %v8814_v55  ;;  %v252_v3 = vrot.slane %v247_v58, %v8820_v61  ;;  %v166_v20 = vand.u32 1, %v8811_v54  ;;  %s8606_s16 = scalar_lea.vmem %s6876_s8, 256  ;;  %p8611_p13 = scmp.lt.s32.totalorder %s6876_s8, %s6876_s8 }
  0x74   :  { %p8607_p12 = scmp.ne.s32.totalorder %s6876_s8, %s8606_s16  ;;  %p8612_p0 = scmp.lt.s32.totalorder %s8606_s16, %s8606_s16 }
  0x75   :  { %7905 = vmatpush3.bf16.msra.mxu1 %v8073_v22  ;;  %v163_v22 = vadd.s32 8, %v8811_v54 }
  0x76   :  { %399 = vmatpush1.bf16.msra.mxu0 %v8072_v21  ;;  %7906 = vmatprep.subr.bf16.mxu1 %v8656_v4  ;;  %v168_v21 = vand.u32 1, %v165_v19  ;;  %p8613_p1 = por %p8612_p0, %p8611_p13 }
  0x77   :  { %400 = vmatprep.subr.bf16.mxu0 %v8074_v23 }
  0x78   :  { %vm8839_vm2 = vcmp.eq.s32.totalorder %v166_v20, %v168_v21  ;;  %p8614_p2 = pnand %p8613_p1, %p8607_p12 }
  0x79   :  { %7907 = vmatpush3.bf16.msra.mxu1 %v8077_v25 }
  0x7a   :  { %401 = vmatpush1.bf16.msra.mxu0 %v8076_v24  ;;  %7908 = vmatprep.subr.bf16.mxu1 %v8656_v4  ;;  %v167_v24 = vand.u32 1, %v163_v22 }
  0x7b   :  { %402 = vmatprep.subr.bf16.mxu0 %v8078_v26 }
  0x7c   :  { %vm8846_vm4 = vcmp.eq.s32.totalorder %v167_v24, %v168_v21 }
  0x7d   :  { %7909 = vmatpush3.bf16.msra.mxu1 %v8081_v28 }
  0x7e   :  { %403 = vmatpush1.bf16.msra.mxu0 %v8080_v27  ;;  %7910 = vmatprep.subr.bf16.mxu1 %v8656_v4 }
  0x7f   :  { %404 = vmatprep.subr.bf16.mxu0 %v8082_v29 }
  0x81   :  { %7911 = vmatpush3.bf16.msra.mxu1 %v8085_v32 }
  0x82   :  { %405 = vmatpush1.bf16.msra.mxu0 %v8084_v31  ;;  %7912 = vmatprep.subr.bf16.mxu1 %v8656_v4 }
  0x83   :  { %406 = vmatprep.subr.bf16.mxu0 %v8086_v33 }
  0x85   :  { %7913 = vmatpush3.bf16.msra.mxu1 %v8089_v35 }
  0x86   :  { %407 = vmatpush1.bf16.msra.mxu0 %v8088_v34  ;;  %7918 = vmatprep.subr.bf16.mxu1 %v8656_v4 }
  0x87   :  { %7942 = vmatprep.subr.bf16.mxu0 %v8656_v4 }
  0xf1   :  { %v176_v6 = vpop.xlane.xlu0 %175 }
  0xf2   :  { %v180_v7 = vmul.f32 0.0078125, %v176_v6 }
  0xf4   :  { %v8774_v8 = vsub.f32 %v171_v0, %v180_v7  ;;  %v8825_v7 = vsub.s32 2, %v8811_v54 }
  0xf5   :  { %v178_v9 = vpop.xlane.xlu0 %177 }
  0xf6   :  { %v181_v10 = vmul.f32 0.0078125, %v178_v9  ;;  %v184_v11 = vmul.f32 %v8774_v8, %v8774_v8 }
  0xf8   :  { %v8778_v12 = vsub.f32 %v172_v1, %v181_v10  ;;  %186 = vadd.xlane.f32.xlu1 %v184_v11 }
  0xfa   :  { %v185_v13 = vmul.f32 %v8778_v12, %v8778_v12 }
  0xfc   :  { %188 = vadd.xlane.f32.xlu1 %v185_v13 }
 0x181   :  { %v187_v36 = vpop.xlane.xlu1 %186 }
 0x182   :  { %v190_v37 = vmul.f32 0.0078125, %v187_v36 }
 0x184   :  { %v192_v38 = vadd.f32 1e-05, %v190_v37 }
 0x185   :  { %v189_v39 = vpop.xlane.xlu1 %188 }
 0x186   :  { %8394 = vrsqrt.f32 %v192_v38  ;;  %v191_v40 = vmul.f32 0.0078125, %v189_v39 }
 0x188   :  { %v193_v41 = vadd.f32 1e-05, %v191_v40 }
 0x18a   :  { %8396 = vrsqrt.f32 %v193_v41 }
 0x193   :  { %v8395_v42 = vpop.eup %8394 }
 0x194   :  { %v196_v43 = vmul.f32 %v8395_v42, %v8774_v8 }
 0x196   :  { %v204_v47 = vmul.f32 %v6891_v44, %v196_v43 }
 0x197   :  { %v8397_v45 = vpop.eup %8396 }
 0x198   :  { %v197_v46 = vmul.f32 %v8397_v45, %v8778_v12  ;;  %v8801_v50 = vadd.f32 %v6892_v48, %v204_v47  ;;  %v260_v12 = vrot.slane %v247_v58, %v8825_v7 }
 0x19a   :  { %v205_v49 = vmul.f32 %v6891_v44, %v197_v46 }
 0x19c   :  { %v8803_v51 = vadd.f32 %v6892_v48, %v205_v49 }
 0x19e   :  { %v214_v52 = vpack.c.bf16 %v8803_v51, %v8801_v50 }
 0x1a0   :  { %425 = vmatmul.mubr.bf16.vlgmr.msra.gmra.mxu0 %v214_v52  ;;  %7915 = vmatmul.mubr.bf16.vlgmr.msra.gmra.mxu1 %v214_v52 }
 0x1a1   :  { %7920 = vmatprep.mubr.msk.bf16.mxu1 %vm8658_vm0, %v8656_v4  ;;  %7958 = vmatprep.mubr.msk.bf16.mxu0 %vm8658_vm0, %v8656_v4 }
 0x260   :  { %v426_v56 = vpop.f32.mrf.mxu0  ;;  %v469_v57 = vpop.f32.mrf.mxu1 }
 0x261   :  { %v427_v10 = vadd.f32 %v426_v56, %v252_v3  ;;  %v470_v16 = vadd.f32 %v469_v57, %v260_v12 }
 0x262   :  { %v428_v59 = vpop.f32.mrf.mxu0  ;;  %v7916_v60 = vpop.f32.mrf.mxu1 }
 0x263   :  { %v429_v5 = vadd.f32 %v428_v59, %v256_v62  ;;  %v476_v15 = vmul.f32 0.125, %v427_v10 }
 0x264   :  { %v430_v63 = vpop.f32.mrf.mxu0  ;;  %v472_v0 = vpop.f32.mrf.mxu1 }
 0x265   :  { %v431_v8 = vadd.f32 %v430_v63, %v252_v3  ;;  %v473_v14 = vadd.f32 %v472_v0, %v260_v12 }
 0x266   :  { %v432_v1 = vpop.f32.mrf.mxu0  ;;  %v7917_v2 = vpop.f32.mrf.mxu1 }
 0x267   :  { %v433_v6 = vadd.f32 %v432_v1, %v256_v62  ;;  %v477_v13 = vmul.f32 0.125, %v431_v8  ;;  %v8830_v18 = vpack.c.bf16 %v473_v14, %v470_v16 }
 0x269   :  { %v479_v9 = vpack.c.bf16 %v433_v6, %v429_v5  ;;  %v478_v17 = vpack.c.bf16 %v477_v13, %v476_v15 }
 0x26b   :  { %v486_v11 = vsel %vm481_vm1, %v479_v9, 0 }
 0x26c   :  { %7919 = vmatpush3.bf16.xpose.msra.mxu1 %v486_v11 }
 0x26d   :  { %7924 = vmatprep.subr.bf16.mxu1 %v8656_v4 }
 0x273   :  { %7921 = vmatmul.mubr.msk.bf16.vlgmr.msra.gmra.mxu1 %vm481_vm1, %v478_v17 }
 0x274   :  { %7925 = vmatpush3.bf16.msra.mxu1 %v8830_v18  ;;  %7926 = vmatprep.mubr.msk.bf16.mxu1 %vm8658_vm0, %v8656_v4 }
 0x275   :  { %7930 = vmatprep.subr.bf16.mxu1 %v8656_v4 }
 0x333   :  { %v522_v25 = vpop.f32.mrf.mxu1 }
 0x334   :  { %v529_v26 = vsel %vm8839_vm2, %v522_v25, -1e+30 }
 0x335   :  { %v7922_v27 = vpop.f32.mrf.mxu1  ;;  %v532_v28 = vsel %vm531_vm3, %v529_v26, -inf }
 0x336   :  { %533 = vmax.xlane.f32.xlu0 %v532_v28 }
 0x337   :  { %v525_v31 = vpop.f32.mrf.mxu1 }
 0x338   :  { %v530_v32 = vsel %vm8846_vm4, %v525_v31, -1e+30 }
 0x339   :  { %v7923_v33 = vpop.f32.mrf.mxu1  ;;  %v535_v34 = vsel %vm531_vm3, %v530_v32, -inf }
 0x33a   :  { %536 = vmax.xlane.f32.xlu1 %v535_v34  ;;  %v8091_v33 = vld [vmem:[#allocation7 + $0x30] sm:$0xff]   ;;  %v8093_v34 = vld [vmem:[#allocation7 + $0x20] sm:$0xff]  }
 0x3bf   :  { %v534_v35 = vpop.xlane.xlu0 %533 }
 0x3c0   :  { %v538_v36 = vsub.f32 %v529_v26, %v534_v35  ;;  %v8094_v35 = vld [vmem:[#allocation7 + $0x18] sm:$0xff]  }
 0x3c2   :  { %v540_v37 = vmul.f32 1.442695, %v538_v36  ;;  %v8095_v36 = vld [vmem:[#allocation7 + $0x10] sm:$0xff]  }
 0x3c3   :  { %v537_v38 = vpop.xlane.xlu1 %536 }
 0x3c4   :  { %8398 = vpow2.f32 %v540_v37  ;;  %v539_v39 = vsub.f32 %v530_v32, %v537_v38  ;;  %v8090_v32 = vld [vmem:[#allocation7 + $0x38] sm:$0xff]   ;;  %v8096_v37 = vld [vmem:[#allocation7 + $0x8] sm:$0xff]   ;;  %v8097_v38 = vld [vmem:[#allocation7] sm:$0xff]  }
 0x3c5   :  { %7943 = vmatpush3.bf16.msra.mxu0 %v8090_v32  ;;  %v980_v32 = vld [vmem:[#allocation8 + $0x2c8] sm:$0xff] }
 0x3c6   :  { %v542_v40 = vmul.f32 1.442695, %v539_v39  ;;  %7944 = vmatprep.subr.bf16.mxu0 %v8656_v4 }
 0x3c8   :  { %8400 = vpow2.f32 %v542_v40 }
 0x3c9   :  { %7945 = vmatpush3.bf16.msra.mxu0 %v8091_v33 }
 0x3ca   :  { %7946 = vmatprep.subr.bf16.mxu0 %v8656_v4 }
 0x3d1   :  { %v8399_v41 = vpop.eup %8398 }
 0x3d2   :  { %v544_v42 = vsel %vm531_vm3, %v8399_v41, 0.0 }
 0x3d3   :  { %545 = vadd.xlane.f32.xlu0 %v544_v42 }
 0x3d5   :  { %v8401_v43 = vpop.eup %8400 }
 0x3d6   :  { %v547_v44 = vsel %vm531_vm3, %v8401_v43, 0.0 }
 0x3d7   :  { %548 = vadd.xlane.f32.xlu1 %v547_v44 }
 0x3e8   :  { %600 = vrot.lane.b32.xlu1 %v478_v17, %s8643_s29 }
 0x3e9   :  { %603 = vrot.lane.b32.xlu0 %v479_v9, %s8643_s29 }
 0x45c   :  { %v546_v45 = vpop.xlane.xlu0 %545 }
 0x45d   :  { %8402 = vrcp.f32 %v546_v45 }
 0x460   :  { %v549_v46 = vpop.xlane.xlu1 %548  ;;  %v604_v53 = vpop.permute.xlu0 %603 }
 0x461   :  { %8404 = vrcp.f32 %v549_v46  ;;  %v609_v57 = vsel %vm481_vm1, %v604_v53, 0 }
 0x464   :  { %v601_v58 = vpop.permute.xlu1 %600 }
 0x46a   :  { %v8403_v47 = vpop.eup %8402 }
 0x46b   :  { %v551_v49 = vmul.f32 %v8403_v47, %v8399_v41 }
 0x46e   :  { %v8405_v48 = vpop.eup %8404 }
 0x46f   :  { %v553_v52 = vmul.f32 %v8405_v48, %v8401_v43 }
 0x471   :  { %v554_v56 = vpack.c.bf16 %v553_v52, %v551_v49  ;;  %v6921_v52 = vld [vmem:[%s9184_s6] ss:$0 sm:$0xff] }
 0x473   :  { %7927 = vmatmul.mubr.msk.bf16.vlgmr.msra.gmra.mxu1 %vm531_vm3, %v554_v56 }
 0x474   :  { %7931 = vmatpush3.bf16.xpose.msra.mxu1 %v609_v57  ;;  %7932 = vmatprep.mubr.msk.bf16.mxu1 %vm8658_vm0, %v8656_v4 }
 0x475   :  { %7936 = vmatprep.subr.bf16.mxu1 %v8656_v4 }
 0x47b   :  { %7933 = vmatmul.mubr.msk.bf16.vlgmr.msra.gmra.mxu1 %vm481_vm1, %v601_v58 }
 0x47c   :  { %7938 = vmatprep.mubr.msk.bf16.mxu1 %vm8658_vm0, %v8656_v4 }
 0x533   :  { %v8865_v59 = vpop.f32.mrf.mxu1 }
 0x535   :  { %v7928_v60 = vpop.f32.mrf.mxu1 }
 0x537   :  { %v8867_v62 = vpop.f32.mrf.mxu1 }
 0x539   :  { %v7929_v63 = vpop.f32.mrf.mxu1 }
 0x53b   :  { %v645_v0 = vpop.f32.mrf.mxu1 }
 0x53c   :  { %v652_v1 = vsel %vm8839_vm2, %v645_v0, -1e+30 }
 0x53d   :  { %v7934_v2 = vpop.f32.mrf.mxu1  ;;  %v654_v3 = vsel %vm531_vm3, %v652_v1, -inf }
 0x53e   :  { %655 = vmax.xlane.f32.xlu1 %v654_v3  ;;  %v1004_v2 = vld [vmem:[#allocation8 + $0x388] sm:$0xff] }
 0x53f   :  { %v648_v5 = vpop.f32.mrf.mxu1 }
 0x540   :  { %v653_v6 = vsel %vm8846_vm4, %v648_v5, -1e+30 }
 0x541   :  { %v7935_v8 = vpop.f32.mrf.mxu1  ;;  %v657_v9 = vsel %vm531_vm3, %v653_v6, -inf }
 0x542   :  { %658 = vmax.xlane.f32.xlu0 %v657_v9 }
 0x5c7   :  { %v656_v10 = vpop.xlane.xlu1 %655 }
 0x5c8   :  { %v660_v11 = vsub.f32 %v652_v1, %v656_v10  ;;  %v1011_v1 = vld [vmem:[#allocation8 + $0x3c0] sm:$0xff] }
 0x5ca   :  { %v662_v12 = vmul.f32 1.442695, %v660_v11 }
 0x5cb   :  { %v659_v13 = vpop.xlane.xlu0 %658 }
 0x5cc   :  { %8406 = vpow2.f32 %v662_v12  ;;  %v661_v14 = vsub.f32 %v653_v6, %v659_v13  ;;  %v1012_v6 = vld [vmem:[#allocation8 + $0x3c8] sm:$0xff] }
 0x5cd   :  { %v7046_v8 = vcombine.low %v1004_v2, %v1012_v6  ;;  %v7047_v9 = vcombine.high %v1004_v2, %v1012_v6  ;;  %v908_v2 = vld [vmem:[#allocation8 + $0x88] sm:$0xff] }
 0x5ce   :  { %v664_v15 = vmul.f32 1.442695, %v661_v14 }
 0x5d0   :  { %8408 = vpow2.f32 %v664_v15 }
 0x5d9   :  { %v8407_v16 = vpop.eup %8406 }
 0x5da   :  { %v666_v17 = vsel %vm531_vm3, %v8407_v16, 0.0 }
 0x5db   :  { %667 = vadd.xlane.f32.xlu0 %v666_v17  ;;  %v995_v17 = vld [vmem:[#allocation8 + $0x340] sm:$0xff] }
 0x5dd   :  { %v8409_v19 = vpop.eup %8408 }
 0x5de   :  { %v669_v20 = vsel %vm531_vm3, %v8409_v19, 0.0 }
 0x5df   :  { %670 = vadd.xlane.f32.xlu1 %v669_v20 }
 0x5f1   :  { %678 = vrot.lane.b32.xlu0 %v8830_v18, %s8643_s29  ;;  %v8092_v18 = vld [vmem:[#allocation7 + $0x28] sm:$0xff]  }
 0x5f2   :  { %7947 = vmatpush3.bf16.msra.mxu0 %v8092_v18 }
 0x5f3   :  { %7948 = vmatprep.subr.bf16.mxu0 %v8656_v4 }
 0x5f6   :  { %7949 = vmatpush3.bf16.msra.mxu0 %v8093_v34 }
 0x5f7   :  { %7950 = vmatprep.subr.bf16.mxu0 %v8656_v4 }
 0x5fa   :  { %7951 = vmatpush3.bf16.msra.mxu0 %v8094_v35  ;;  %v955_v35 = vld [vmem:[#allocation8 + $0x200] sm:$0xff] }
 0x5fb   :  { %7952 = vmatprep.subr.bf16.mxu0 %v8656_v4 }
 0x5fe   :  { %7953 = vmatpush3.bf16.msra.mxu0 %v8095_v36  ;;  %v963_v36 = vld [vmem:[#allocation8 + $0x240] sm:$0xff] }
 0x5ff   :  { %7954 = vmatprep.subr.bf16.mxu0 %v8656_v4 }
 0x602   :  { %7955 = vmatpush3.bf16.msra.mxu0 %v8096_v37  ;;  %v956_v37 = vld [vmem:[#allocation8 + $0x208] sm:$0xff] }
 0x603   :  { %7956 = vmatprep.subr.bf16.mxu0 %v8656_v4 }
 0x606   :  { %7957 = vmatpush3.bf16.msra.mxu0 %v8097_v38  ;;  %v6997_v38 = vcombine.high %v955_v35, %v963_v36 }
 0x607   :  { %1786 = vmatprep.subr.bf16.mxu0 %v7047_v9 }
 0x664   :  { %v668_v21 = vpop.xlane.xlu0 %667 }
 0x665   :  { %8410 = vrcp.f32 %v668_v21  ;;  %v996_v21 = vld [vmem:[#allocation8 + $0x348] sm:$0xff] }
 0x668   :  { %v671_v22 = vpop.xlane.xlu1 %670  ;;  %v679_v24 = vpop.permute.xlu0 %678 }
 0x669   :  { %8412 = vrcp.f32 %v671_v22  ;;  %7937 = vmatpush3.bf16.msra.mxu1 %v679_v24 }
 0x672   :  { %v8411_v25 = vpop.eup %8410 }
 0x673   :  { %v673_v27 = vmul.f32 %v8411_v25, %v8407_v16  ;;  %v987_v16 = vld [vmem:[#allocation8 + $0x300] sm:$0xff] }
 0x674   :  { %v7029_v20 = vcombine.high %v987_v16, %v995_v17  ;;  %v7028_v22 = vcombine.low %v987_v16, %v995_v17 }
 0x676   :  { %v8413_v26 = vpop.eup %8412 }
 0x677   :  { %v675_v28 = vmul.f32 %v8413_v26, %v8409_v19  ;;  %v988_v19 = vld [vmem:[#allocation8 + $0x308] sm:$0xff]  ;;  %v971_v26 = vld [vmem:[#allocation8 + $0x280] sm:$0xff] }
 0x678   :  { %v7030_v24 = vcombine.low %v988_v19, %v996_v21  ;;  %v7031_v25 = vcombine.high %v988_v19, %v996_v21  ;;  %v1005_v19 = vld [vmem:[#allocation8 + $0x390] sm:$0xff]  ;;  %v1006_v21 = vld [vmem:[#allocation8 + $0x398] sm:$0xff] }
 0x679   :  { %v676_v31 = vpack.c.bf16 %v675_v28, %v673_v27  ;;  %v979_v27 = vld [vmem:[#allocation8 + $0x2c0] sm:$0xff]  ;;  %v972_v28 = vld [vmem:[#allocation8 + $0x288] sm:$0xff] }
 0x67a   :  { %v7012_v33 = vcombine.low %v971_v26, %v979_v27  ;;  %v7014_v18 = vcombine.low %v972_v28, %v980_v32  ;;  %v7015_v34 = vcombine.high %v972_v28, %v980_v32 }
 0x67b   :  { %7939 = vmatmul.mubr.msk.bf16.vlgmr.msra.gmra.mxu1 %vm531_vm3, %v676_v31  ;;  %v7013_v31 = vcombine.high %v971_v26, %v979_v27 }
 0x67c   :  { %1775 = vmatprep.mubr.bf16.mxu1 %v8657_v30 }
 0x73b   :  { %v718_v39 = vpop.f32.mrf.mxu1 }
 0x73d   :  { %v7940_v40 = vpop.f32.mrf.mxu1 }
 0x73e   :  { %v6996_v40 = vcombine.low %v955_v35, %v963_v36 }
 0x73f   :  { %v721_v41 = vpop.f32.mrf.mxu1 }
 0x740   :  { %v8048_v42 = vpack.i.bf16 %v721_v41, %v718_v39  ;;  %v964_v39 = vld [vmem:[#allocation8 + $0x248] sm:$0xff] }
 0x741   :  { %v7941_v43 = vpop.f32.mrf.mxu1  ;;  %v6998_v41 = vcombine.low %v956_v37, %v964_v39 }
 0x742   :  { %8049 = vrot.lane.b32.xlu1 %v8048_v42, %s8643_s29  ;;  %v6999_v42 = vcombine.high %v956_v37, %v964_v39  ;;  %v939_v43 = vld [vmem:[#allocation8 + $0x180] sm:$0xff]  ;;  %v6930_v37 = vld [vmem:[%s9189_s11] ss:$0 sm:$0xff] }
 0x7b4   :  { %v8050_v44 = vpop.permute.xlu1 %8049 }
 0x7b5   :  { %v8052_v45 = vunpack.i.h.bf16 %v8050_v44  ;;  %v8051_v46 = vunpack.i.l.bf16 %v8050_v44  ;;  %v947_v44 = vld [vmem:[#allocation8 + $0x1c0] sm:$0xff] }
 0x7b7   :  { %v734_v47 = vsel %vm481_vm1, %v8867_v62, %v8052_v45  ;;  %v733_v48 = vsel %vm481_vm1, %v8865_v59, %v8051_v46  ;;  %v1003_v59 = vld [vmem:[#allocation8 + $0x380] sm:$0xff]  ;;  %v940_v45 = vld [vmem:[#allocation8 + $0x188] sm:$0xff]  ;;  %v6981_v46 = vcombine.high %v939_v43, %v947_v44 }
 0x7b8   :  { %v735_v49 = vpack.c.bf16 %v734_v47, %v733_v48  ;;  %v7044_v3 = vcombine.low %v1003_v59, %v1011_v1  ;;  %v7045_v5 = vcombine.high %v1003_v59, %v1011_v1  ;;  %v948_v47 = vld [vmem:[#allocation8 + $0x1c8] sm:$0xff]  ;;  %v6980_v48 = vcombine.low %v939_v43, %v947_v44  ;;  %v907_v59 = vld [vmem:[#allocation8 + $0x80] sm:$0xff]  ;;  %v989_v43 = vld [vmem:[#allocation8 + $0x310] sm:$0xff] }
 0x7b9   :  { %v915_v1 = vld [vmem:[#allocation8 + $0xc0] sm:$0xff]  ;;  %v997_v44 = vld [vmem:[#allocation8 + $0x350] sm:$0xff] }
 0x7ba   :  { %7959 = vmatmul.mubr.bf16.vlgmr.msra.gmra.mxu0 %v735_v49  ;;  %1743 = vmatprep.subr.bf16.mxu1 %v7045_v5  ;;  %v6982_v49 = vcombine.low %v940_v45, %v948_v47  ;;  %v916_v5 = vld [vmem:[#allocation8 + $0xc8] sm:$0xff]  ;;  %v6948_v6 = vcombine.low %v907_v59, %v915_v1 }
 0x7bb   :  { %1818 = vmatprep.mubr.bf16.mxu0 %v8657_v30  ;;  %1744 = vmatpush1.bf16.msra.mxu1 %v7044_v3  ;;  %v6949_v3 = vcombine.high %v907_v59, %v915_v1  ;;  %v6951_v9 = vcombine.high %v908_v2, %v916_v5  ;;  %v965_v59 = vld [vmem:[#allocation8 + $0x250] sm:$0xff]  ;;  %v958_v1 = vld [vmem:[#allocation8 + $0x218] sm:$0xff] }
 0x7bc   :  { %1787 = vmatpush1.bf16.msra.mxu0 %v7046_v8  ;;  %1745 = vmatprep.subr.bf16.mxu1 %v7029_v20  ;;  %v6950_v8 = vcombine.low %v908_v2, %v916_v5  ;;  %v1013_v20 = vld [vmem:[#allocation8 + $0x3d0] sm:$0xff]  ;;  %v966_v2 = vld [vmem:[#allocation8 + $0x258] sm:$0xff] }
 0x7bd   :  { %1788 = vmatprep.subr.bf16.mxu0 %v7031_v25  ;;  %v1014_v25 = vld [vmem:[#allocation8 + $0x3d8] sm:$0xff] }
 0x7be   :  { %v7050_v26 = vcombine.low %v1006_v21, %v1014_v25  ;;  %v7051_v27 = vcombine.high %v1006_v21, %v1014_v25  ;;  %v934_v21 = vld [vmem:[#allocation8 + $0x158] sm:$0xff] }
 0x7bf   :  { %1746 = vmatpush1.bf16.msra.mxu1 %v7028_v22  ;;  %v7048_v22 = vcombine.low %v1005_v19, %v1013_v20 }
 0x7c0   :  { %1789 = vmatpush1.bf16.msra.mxu0 %v7030_v24  ;;  %1747 = vmatprep.subr.bf16.mxu1 %v7013_v31  ;;  %v7049_v24 = vcombine.high %v1005_v19, %v1013_v20  ;;  %v933_v19 = vld [vmem:[#allocation8 + $0x150] sm:$0xff]  ;;  %v926_v20 = vld [vmem:[#allocation8 + $0x118] sm:$0xff] }
 0x7c1   :  { %1790 = vmatprep.subr.bf16.mxu0 %v7015_v34 }
 0x7c3   :  { %1748 = vmatpush1.bf16.msra.mxu1 %v7012_v33 }
 0x7c4   :  { %1791 = vmatpush1.bf16.msra.mxu0 %v7014_v18  ;;  %1749 = vmatprep.subr.bf16.mxu1 %v6997_v38 }
 0x7c5   :  { %1792 = vmatprep.subr.bf16.mxu0 %v6999_v42 }
 0x7c7   :  { %1750 = vmatpush1.bf16.msra.mxu1 %v6996_v40 }
 0x7c8   :  { %1793 = vmatpush1.bf16.msra.mxu0 %v6998_v41  ;;  %1751 = vmatprep.subr.bf16.mxu1 %v6981_v46  ;;  %v6931_v41 = vld [vmem:[#allocation13] ss:$0 sm:$0xff]  ;;  %v998_v46 = vld [vmem:[#allocation8 + $0x358] sm:$0xff] }
 0x7cb   :  { %1752 = vmatpush1.bf16.msra.mxu1 %v6980_v48 }
 0x87a   :  { %v841_v53 = vpop.f32.mrf.mxu0 }
 0x87b   :  { %v842_v56 = vadd.f32 %v6921_v52, %v841_v53  ;;  %v923_v53 = vld [vmem:[#allocation8 + $0x100] sm:$0xff] }
 0x87c   :  { %v7960_v57 = vpop.f32.mrf.mxu0 }
 0x87d   :  { %v848_v58 = vadd.f32 %v842_v56, %v8801_v50  ;;  %v931_v56 = vld [vmem:[#allocation8 + $0x140] sm:$0xff]  ;;  %v924_v57 = vld [vmem:[#allocation8 + $0x108] sm:$0xff] }
 0x87e   :  { %v844_v60 = vpop.f32.mrf.mxu0 }
 0x87f   :  { %v845_v63 = vadd.f32 %v6921_v52, %v844_v60  ;;  %852 = vadd.xlane.f32.xlu1 %v848_v58  ;;  %v6983_v52 = vcombine.high %v940_v45, %v948_v47  ;;  %v932_v60 = vld [vmem:[#allocation8 + $0x148] sm:$0xff]  ;;  %v990_v45 = vld [vmem:[#allocation8 + $0x318] sm:$0xff] }
 0x880   :  { %v7961_v62 = vpop.f32.mrf.mxu0 }
 0x881   :  { %v849_v0 = vadd.f32 %v845_v63, %v8803_v51  ;;  %1794 = vmatprep.subr.bf16.mxu0 %v6983_v52  ;;  %v6964_v63 = vcombine.low %v923_v53, %v931_v56  ;;  %v6966_v62 = vcombine.low %v924_v57, %v932_v60  ;;  %v7035_v52 = vcombine.high %v990_v45, %v998_v46 }
 0x882   :  { %1795 = vmatpush1.bf16.msra.mxu0 %v6982_v49  ;;  %v7033_v49 = vcombine.high %v989_v43, %v997_v44 }
 0x883   :  { %854 = vadd.xlane.f32.xlu0 %v849_v0 }
 0x908   :  { %v853_v50 = vpop.xlane.xlu1 %852 }
 0x909   :  { %v856_v10 = vmul.f32 0.0078125, %v853_v50  ;;  %v891_v50 = vld [vmem:[#allocation8] sm:$0xff] }
 0x90b   :  { %v8899_v11 = vsub.f32 %v848_v58, %v856_v10  ;;  %v6965_v58 = vcombine.high %v923_v53, %v931_v56  ;;  %v899_v10 = vld [vmem:[#allocation8 + $0x40] sm:$0xff]  ;;  %v973_v53 = vld [vmem:[#allocation8 + $0x290] sm:$0xff] }
 0x90c   :  { %v855_v12 = vpop.xlane.xlu0 %854  ;;  %v981_v56 = vld [vmem:[#allocation8 + $0x2d0] sm:$0xff] }
 0x90d   :  { %v857_v13 = vmul.f32 0.0078125, %v855_v12  ;;  %v860_v51 = vmul.f32 %v8899_v11, %v8899_v11  ;;  %1753 = vmatprep.subr.bf16.mxu1 %v6965_v58  ;;  %v892_v12 = vld [vmem:[#allocation8 + $0x8] sm:$0xff]  ;;  %v7032_v58 = vcombine.low %v989_v43, %v997_v44  ;;  %v1007_v44 = vld [vmem:[#allocation8 + $0x3a0] sm:$0xff] }
 0x90e   :  { %1754 = vmatpush1.bf16.msra.mxu1 %v6964_v63  ;;  %v7017_v63 = vcombine.high %v973_v53, %v981_v56 }
 0x90f   :  { %v8903_v14 = vsub.f32 %v849_v0, %v857_v13  ;;  %862 = vadd.xlane.f32.xlu0 %v860_v51  ;;  %v6967_v0 = vcombine.high %v924_v57, %v932_v60  ;;  %1755 = vmatprep.subr.bf16.mxu1 %v6949_v3  ;;  %v6933_v13 = vcombine.high %v891_v50, %v899_v10  ;;  %v900_v51 = vld [vmem:[#allocation8 + $0x48] sm:$0xff]  ;;  %v974_v57 = vld [vmem:[#allocation8 + $0x298] sm:$0xff] }
 0x910   :  { %v6934_v16 = vcombine.low %v892_v12, %v900_v51  ;;  %v6935_v17 = vcombine.high %v892_v12, %v900_v51  ;;  %v7034_v60 = vcombine.low %v990_v45, %v998_v46  ;;  %v7016_v3 = vcombine.low %v973_v53, %v981_v56  ;;  %v950_v12 = vld [vmem:[#allocation8 + $0x1d8] sm:$0xff]  ;;  %v1015_v45 = vld [vmem:[#allocation8 + $0x3e0] sm:$0xff]  ;;  %v1008_v46 = vld [vmem:[#allocation8 + $0x3a8] sm:$0xff] }
 0x911   :  { %v861_v15 = vmul.f32 %v8903_v14, %v8903_v14  ;;  %1796 = vmatprep.subr.bf16.mxu0 %v6967_v0  ;;  %v957_v0 = vld [vmem:[#allocation8 + $0x210] sm:$0xff]  ;;  %v7002_v51 = vcombine.low %v958_v1, %v966_v2  ;;  %v7053_v56 = vcombine.high %v1007_v44, %v1015_v45 }
 0x912   :  { %1797 = vmatpush1.bf16.msra.mxu0 %v6966_v62  ;;  %1756 = vmatpush1.bf16.msra.mxu1 %v6948_v6  ;;  %v7001_v6 = vcombine.high %v957_v0, %v965_v59 }
 0x913   :  { %864 = vadd.xlane.f32.xlu1 %v861_v15  ;;  %1798 = vmatprep.subr.bf16.mxu0 %v6951_v9  ;;  %v6932_v15 = vcombine.low %v891_v50, %v899_v10  ;;  %v941_v9 = vld [vmem:[#allocation8 + $0x190] sm:$0xff]  ;;  %v942_v10 = vld [vmem:[#allocation8 + $0x198] sm:$0xff] }
 0x914   :  { %1757 = vmatprep.subr.bf16.mxu1 %v6933_v13  ;;  %v949_v50 = vld [vmem:[#allocation8 + $0x1d0] sm:$0xff]  ;;  %v7000_v13 = vcombine.low %v957_v0, %v965_v59 }
 0x916   :  { %1799 = vmatpush1.bf16.msra.mxu0 %v6950_v8  ;;  %1758 = vmatpush1.bf16.msra.mxu1 %v6932_v15  ;;  %v7003_v8 = vcombine.high %v958_v1, %v966_v2  ;;  %v6985_v15 = vcombine.high %v941_v9, %v949_v50  ;;  %v975_v2 = vld [vmem:[#allocation8 + $0x2a0] sm:$0xff] }
 0x917   :  { %1800 = vmatprep.subr.bf16.mxu0 %v6935_v17  ;;  %1829 = vmatprep.subr.bf16.mxu1 %v7049_v24  ;;  %v925_v17 = vld [vmem:[#allocation8 + $0x110] sm:$0xff]  ;;  %v6986_v24 = vcombine.low %v942_v10, %v950_v12 }
 0x918   :  { %v6969_v25 = vcombine.high %v925_v17, %v933_v19 }
 0x91a   :  { %1801 = vmatpush1.bf16.msra.mxu0 %v6934_v16  ;;  %v6987_v16 = vcombine.high %v942_v10, %v950_v12  ;;  %v959_v12 = vld [vmem:[#allocation8 + $0x220] sm:$0xff] }
 0x91b   :  { %1872 = vmatprep.subr.bf16.mxu0 %v7051_v27  ;;  %v909_v27 = vld [vmem:[#allocation8 + $0x90] sm:$0xff] }
 0x998   :  { %v863_v28 = vpop.xlane.xlu0 %862 }
 0x999   :  { %v866_v31 = vmul.f32 0.0078125, %v863_v28  ;;  %v917_v28 = vld [vmem:[#allocation8 + $0xd0] sm:$0xff] }
 0x99b   :  { %v868_v32 = vadd.f32 1e-05, %v866_v31  ;;  %v910_v31 = vld [vmem:[#allocation8 + $0x98] sm:$0xff] }
 0x99c   :  { %v865_v33 = vpop.xlane.xlu1 %864 }
 0x99d   :  { %8414 = vrsqrt.f32 %v868_v32  ;;  %v867_v18 = vmul.f32 0.0078125, %v865_v33  ;;  %v918_v32 = vld [vmem:[#allocation8 + $0xd8] sm:$0xff]  ;;  %v6968_v33 = vcombine.low %v925_v17, %v933_v19 }
 0x99f   :  { %v869_v34 = vadd.f32 1e-05, %v867_v18  ;;  %v6970_v18 = vcombine.low %v926_v20, %v934_v21 }
 0x9a1   :  { %8416 = vrsqrt.f32 %v869_v34  ;;  %v6953_v34 = vcombine.high %v909_v27, %v917_v28 }
 0x9aa   :  { %v8415_v35 = vpop.eup %8414 }
 0x9ab   :  { %v872_v36 = vmul.f32 %v8415_v35, %v8899_v11  ;;  %v6955_v35 = vcombine.high %v910_v31, %v918_v32 }
 0x9ad   :  { %v880_v39 = vmul.f32 %v6930_v37, %v872_v36  ;;  %v893_v36 = vld [vmem:[#allocation8 + $0x10] sm:$0xff] }
 0x9ae   :  { %v8417_v38 = vpop.eup %8416 }
 0x9af   :  { %v873_v40 = vmul.f32 %v8417_v38, %v8903_v14  ;;  %v8912_v47 = vadd.f32 %v6931_v41, %v880_v39  ;;  %v982_v14 = vld [vmem:[#allocation8 + $0x2d8] sm:$0xff] }
 0x9b0   :  { %v7019_v62 = vcombine.high %v974_v57, %v982_v14  ;;  %v7018_v5 = vcombine.low %v974_v57, %v982_v14  ;;  %v894_v38 = vld [vmem:[#allocation8 + $0x18] sm:$0xff]  ;;  %v991_v14 = vld [vmem:[#allocation8 + $0x320] sm:$0xff] }
 0x9b1   :  { %v881_v42 = vmul.f32 %v6930_v37, %v873_v40  ;;  %v901_v37 = vld [vmem:[#allocation8 + $0x50] sm:$0xff]  ;;  %v902_v39 = vld [vmem:[#allocation8 + $0x58] sm:$0xff]  ;;  %v6952_v40 = vcombine.low %v909_v27, %v917_v28 }
 0x9b2   :  { %v6939_v43 = vcombine.high %v894_v38, %v902_v39  ;;  %v6938_v53 = vcombine.low %v894_v38, %v902_v39  ;;  %v911_v39 = vld [vmem:[#allocation8 + $0xa0] sm:$0xff] }
 0x9b3   :  { %v8914_v48 = vadd.f32 %v6931_v41, %v881_v42  ;;  %v6954_v41 = vcombine.low %v910_v31, %v918_v32  ;;  %v6937_v42 = vcombine.high %v893_v36, %v901_v37  ;;  %v927_v32 = vld [vmem:[#allocation8 + $0x120] sm:$0xff] }
 0x9b5   :  { %v8918_v11 = vpack.c.bf16 %v8914_v48, %v8912_v47 }
 0x9b7   :  { %1776 = vmatmul.mubr.bf16.vlgmr.msra.gmra.mxu1 %v8918_v11  ;;  %1819 = vmatmul.mubr.bf16.vlgmr.msra.gmra.mxu0 %v8918_v11 }
 0x9b8   :  { %1830 = vmatpush1.bf16.msra.mxu1 %v7048_v22  ;;  %1873 = vmatpush1.bf16.msra.mxu0 %v7050_v26  ;;  %v6984_v22 = vcombine.low %v941_v9, %v949_v50  ;;  %v6971_v26 = vcombine.high %v926_v20, %v934_v21  ;;  %v943_v21 = vld [vmem:[#allocation8 + $0x1a0] sm:$0xff] }
 0x9b9   :  { %1831 = vmatprep.subr.bf16.mxu1 %v7033_v49  ;;  %1874 = vmatprep.subr.bf16.mxu0 %v7035_v52  ;;  %v1016_v49 = vld [vmem:[#allocation8 + $0x3e8] sm:$0xff]  ;;  %v6936_v52 = vcombine.low %v893_v36, %v901_v37 }
 0x9ba   :  { %1861 = vmatprep.mubr.bf16.mxu1 %v8657_v30  ;;  %1904 = vmatprep.mubr.bf16.mxu0 %v8657_v30  ;;  %v7055_v57 = vcombine.high %v1008_v46, %v1016_v49  ;;  %v7054_v0 = vcombine.low %v1008_v46, %v1016_v49  ;;  %v895_v49 = vld [vmem:[#allocation8 + $0x20] sm:$0xff] }
 0x9bc   :  { %1832 = vmatpush1.bf16.msra.mxu1 %v7032_v58  ;;  %1875 = vmatpush1.bf16.msra.mxu0 %v7034_v60  ;;  %v999_v58 = vld [vmem:[#allocation8 + $0x360] sm:$0xff]  ;;  %v992_v60 = vld [vmem:[#allocation8 + $0x328] sm:$0xff] }
 0x9bd   :  { %1833 = vmatprep.subr.bf16.mxu1 %v7017_v63  ;;  %1876 = vmatprep.subr.bf16.mxu0 %v7019_v62  ;;  %v1000_v63 = vld [vmem:[#allocation8 + $0x368] sm:$0xff]  ;;  %v7052_v62 = vcombine.low %v1007_v44, %v1015_v45  ;;  %v7037_v59 = vcombine.high %v991_v14, %v999_v58 }
 0x9be   :  { %v7039_v1 = vcombine.high %v992_v60, %v1000_v63  ;;  %v7038_v9 = vcombine.low %v992_v60, %v1000_v63  ;;  %v1009_v63 = vld [vmem:[#allocation8 + $0x3b0] sm:$0xff] }
 0x9c0   :  { %1834 = vmatpush1.bf16.msra.mxu1 %v7016_v3  ;;  %1877 = vmatpush1.bf16.msra.mxu0 %v7018_v5  ;;  %v983_v3 = vld [vmem:[#allocation8 + $0x2e0] sm:$0xff]  ;;  %v976_v5 = vld [vmem:[#allocation8 + $0x2a8] sm:$0xff] }
 0x9c1   :  { %1835 = vmatprep.subr.bf16.mxu1 %v7001_v6  ;;  %1878 = vmatprep.subr.bf16.mxu0 %v7003_v8  ;;  %v984_v6 = vld [vmem:[#allocation8 + $0x2e8] sm:$0xff]  ;;  %v7036_v8 = vcombine.low %v991_v14, %v999_v58  ;;  %v7021_v50 = vcombine.high %v975_v2, %v983_v3 }
 0x9c2   :  { %v7023_v10 = vcombine.high %v976_v5, %v984_v6  ;;  %v7022_v17 = vcombine.low %v976_v5, %v984_v6  ;;  %v993_v6 = vld [vmem:[#allocation8 + $0x330] sm:$0xff] }
 0x9c4   :  { %1836 = vmatpush1.bf16.msra.mxu1 %v7000_v13  ;;  %1879 = vmatpush1.bf16.msra.mxu0 %v7002_v51  ;;  %v967_v13 = vld [vmem:[#allocation8 + $0x260] sm:$0xff]  ;;  %v960_v51 = vld [vmem:[#allocation8 + $0x228] sm:$0xff] }
 0x9c5   :  { %1837 = vmatprep.subr.bf16.mxu1 %v6985_v15  ;;  %1880 = vmatprep.subr.bf16.mxu0 %v6987_v16  ;;  %v968_v15 = vld [vmem:[#allocation8 + $0x268] sm:$0xff]  ;;  %v7020_v16 = vcombine.low %v975_v2, %v983_v3  ;;  %v7005_v19 = vcombine.high %v959_v12, %v967_v13 }
 0x9c6   :  { %v7007_v20 = vcombine.high %v960_v51, %v968_v15  ;;  %v7006_v27 = vcombine.low %v960_v51, %v968_v15  ;;  %v977_v15 = vld [vmem:[#allocation8 + $0x2b0] sm:$0xff] }
 0x9c8   :  { %1838 = vmatpush1.bf16.msra.mxu1 %v6984_v22  ;;  %1881 = vmatpush1.bf16.msra.mxu0 %v6986_v24  ;;  %v951_v22 = vld [vmem:[#allocation8 + $0x1e0] sm:$0xff]  ;;  %v944_v24 = vld [vmem:[#allocation8 + $0x1a8] sm:$0xff] }
 0x9c9   :  { %1839 = vmatprep.subr.bf16.mxu1 %v6969_v25  ;;  %1882 = vmatprep.subr.bf16.mxu0 %v6971_v26  ;;  %v952_v25 = vld [vmem:[#allocation8 + $0x1e8] sm:$0xff]  ;;  %v7004_v26 = vcombine.low %v959_v12, %v967_v13  ;;  %v6989_v28 = vcombine.high %v943_v21, %v951_v22 }
 0x9ca   :  { %v6991_v31 = vcombine.high %v944_v24, %v952_v25  ;;  %v6990_v36 = vcombine.low %v944_v24, %v952_v25  ;;  %v961_v25 = vld [vmem:[#allocation8 + $0x230] sm:$0xff] }
 0x9cc   :  { %1840 = vmatpush1.bf16.msra.mxu1 %v6968_v33  ;;  %1883 = vmatpush1.bf16.msra.mxu0 %v6970_v18  ;;  %v935_v33 = vld [vmem:[#allocation8 + $0x160] sm:$0xff]  ;;  %v928_v18 = vld [vmem:[#allocation8 + $0x128] sm:$0xff] }
 0x9cd   :  { %1841 = vmatprep.subr.bf16.mxu1 %v6953_v34  ;;  %1884 = vmatprep.subr.bf16.mxu0 %v6955_v35  ;;  %v936_v34 = vld [vmem:[#allocation8 + $0x168] sm:$0xff]  ;;  %v6988_v35 = vcombine.low %v943_v21, %v951_v22  ;;  %v6973_v37 = vcombine.high %v927_v32, %v935_v33 }
 0x9ce   :  { %v6975_v38 = vcombine.high %v928_v18, %v936_v34  ;;  %v6974_v44 = vcombine.low %v928_v18, %v936_v34  ;;  %v945_v34 = vld [vmem:[#allocation8 + $0x1b0] sm:$0xff] }
 0x9d0   :  { %1842 = vmatpush1.bf16.msra.mxu1 %v6952_v40  ;;  %1885 = vmatpush1.bf16.msra.mxu0 %v6954_v41  ;;  %v919_v40 = vld [vmem:[#allocation8 + $0xe0] sm:$0xff]  ;;  %v912_v41 = vld [vmem:[#allocation8 + $0xa8] sm:$0xff] }
 0x9d1   :  { %1843 = vmatprep.subr.bf16.mxu1 %v6937_v42  ;;  %1886 = vmatprep.subr.bf16.mxu0 %v6939_v43  ;;  %v920_v42 = vld [vmem:[#allocation8 + $0xe8] sm:$0xff]  ;;  %v6972_v43 = vcombine.low %v927_v32, %v935_v33  ;;  %v6957_v45 = vcombine.high %v911_v39, %v919_v40 }
 0x9d2   :  { %v6959_v46 = vcombine.high %v912_v41, %v920_v42  ;;  %v6958_v14 = vcombine.low %v912_v41, %v920_v42  ;;  %v929_v42 = vld [vmem:[#allocation8 + $0x130] sm:$0xff] }
 0x9d4   :  { %1844 = vmatpush1.bf16.msra.mxu1 %v6936_v52  ;;  %1887 = vmatpush1.bf16.msra.mxu0 %v6938_v53  ;;  %v903_v52 = vld [vmem:[#allocation8 + $0x60] sm:$0xff]  ;;  %v896_v53 = vld [vmem:[#allocation8 + $0x28] sm:$0xff] }
 0x9d5   :  { %1915 = vmatprep.subr.bf16.mxu1 %v7053_v56  ;;  %1958 = vmatprep.subr.bf16.mxu0 %v7055_v57  ;;  %v904_v56 = vld [vmem:[#allocation8 + $0x68] sm:$0xff]  ;;  %v6956_v57 = vcombine.low %v911_v39, %v919_v40  ;;  %v6941_v58 = vcombine.high %v895_v49, %v903_v52 }
 0x9d6   :  { %v6943_v60 = vcombine.high %v896_v53, %v904_v56  ;;  %v6942_v2 = vcombine.low %v896_v53, %v904_v56  ;;  %v913_v56 = vld [vmem:[#allocation8 + $0xb0] sm:$0xff] }
 0x9d7   :  { %1862 = vmatmul.mubr.bf16.vlgmr.msra.gmra.mxu1 %v8918_v11  ;;  %1905 = vmatmul.mubr.bf16.vlgmr.msra.gmra.mxu0 %v8918_v11 }
 0x9d8   :  { %1916 = vmatpush1.bf16.msra.mxu1 %v7052_v62  ;;  %1959 = vmatpush1.bf16.msra.mxu0 %v7054_v0  ;;  %v1017_v62 = vld [vmem:[#allocation8 + $0x3f0] sm:$0xff]  ;;  %v1010_v0 = vld [vmem:[#allocation8 + $0x3b8] sm:$0xff] }
 0x9d9   :  { %1917 = vmatprep.subr.bf16.mxu1 %v7037_v59  ;;  %1960 = vmatprep.subr.bf16.mxu0 %v7039_v1  ;;  %v1018_v59 = vld [vmem:[#allocation8 + $0x3f8] sm:$0xff]  ;;  %v6940_v1 = vcombine.low %v895_v49, %v903_v52  ;;  %v7057_v3 = vcombine.high %v1009_v63, %v1017_v62 }
 0x9da   :  { %1947 = vmatprep.mubr.bf16.mxu1 %v8657_v30  ;;  %1990 = vmatprep.mubr.bf16.mxu0 %v8657_v30  ;;  %v7059_v5 = vcombine.high %v1010_v0, %v1018_v59  ;;  %v7058_v12 = vcombine.low %v1010_v0, %v1018_v59  ;;  %v897_v59 = vld [vmem:[#allocation8 + $0x30] sm:$0xff] }
 0x9dc   :  { %1918 = vmatpush1.bf16.msra.mxu1 %v7036_v8  ;;  %1961 = vmatpush1.bf16.msra.mxu0 %v7038_v9  ;;  %v1001_v8 = vld [vmem:[#allocation8 + $0x370] sm:$0xff]  ;;  %v994_v9 = vld [vmem:[#allocation8 + $0x338] sm:$0xff] }
 0x9dd   :  { %1919 = vmatprep.subr.bf16.mxu1 %v7021_v50  ;;  %1962 = vmatprep.subr.bf16.mxu0 %v7023_v10  ;;  %v1002_v50 = vld [vmem:[#allocation8 + $0x378] sm:$0xff]  ;;  %v7056_v10 = vcombine.low %v1009_v63, %v1017_v62  ;;  %v7041_v13 = vcombine.high %v993_v6, %v1001_v8 }
 0x9de   :  { %v7043_v51 = vcombine.high %v994_v9, %v1002_v50  ;;  %v7042_v21 = vcombine.low %v994_v9, %v1002_v50 }
 0x9e0   :  { %1920 = vmatpush1.bf16.msra.mxu1 %v7020_v16  ;;  %1963 = vmatpush1.bf16.msra.mxu0 %v7022_v17  ;;  %v985_v16 = vld [vmem:[#allocation8 + $0x2f0] sm:$0xff]  ;;  %v978_v17 = vld [vmem:[#allocation8 + $0x2b8] sm:$0xff] }
 0x9e1   :  { %1921 = vmatprep.subr.bf16.mxu1 %v7005_v19  ;;  %1964 = vmatprep.subr.bf16.mxu0 %v7007_v20  ;;  %v986_v19 = vld [vmem:[#allocation8 + $0x2f8] sm:$0xff]  ;;  %v7040_v20 = vcombine.low %v993_v6, %v1001_v8  ;;  %v7025_v22 = vcombine.high %v977_v15, %v985_v16 }
 0x9e2   :  { %v7027_v24 = vcombine.high %v978_v17, %v986_v19  ;;  %v7026_v32 = vcombine.low %v978_v17, %v986_v19  ;;  %v8103_v17 = vld [vmem:[#allocation11 + $0xf0] sm:$0xff]  }
 0x9e3   :  { %v8104_v19 = vld [vmem:[#allocation11 + $0x30] sm:$0xff]  }
 0x9e4   :  { %1922 = vmatpush1.bf16.msra.mxu1 %v7004_v26  ;;  %1965 = vmatpush1.bf16.msra.mxu0 %v7006_v27  ;;  %v969_v26 = vld [vmem:[#allocation8 + $0x270] sm:$0xff]  ;;  %v962_v27 = vld [vmem:[#allocation8 + $0x238] sm:$0xff] }
 0x9e5   :  { %1923 = vmatprep.subr.bf16.mxu1 %v6989_v28  ;;  %1966 = vmatprep.subr.bf16.mxu0 %v6991_v31  ;;  %v970_v28 = vld [vmem:[#allocation8 + $0x278] sm:$0xff]  ;;  %v7024_v31 = vcombine.low %v977_v15, %v985_v16  ;;  %v7009_v33 = vcombine.high %v961_v25, %v969_v26  ;;  %v8102_v16 = vld [vmem:[#allocation11 + $0x70] sm:$0xff]  }
 0x9e6   :  { %v7011_v18 = vcombine.high %v962_v27, %v970_v28  ;;  %v7010_v39 = vcombine.low %v962_v27, %v970_v28  ;;  %v8101_v15 = vld [vmem:[#allocation11 + $0xb8] sm:$0xff]   ;;  %v8111_v27 = vld [vmem:[#allocation11 + $0xe0] sm:$0xff]  }
 0x9e7   :  { %v8112_v28 = vld [vmem:[#allocation11 + $0x20] sm:$0xff]  }
 0x9e8   :  { %1924 = vmatpush1.bf16.msra.mxu1 %v6988_v35  ;;  %1967 = vmatpush1.bf16.msra.mxu0 %v6990_v36  ;;  %v953_v35 = vld [vmem:[#allocation8 + $0x1f0] sm:$0xff]  ;;  %v946_v36 = vld [vmem:[#allocation8 + $0x1b8] sm:$0xff] }
 0x9e9   :  { %1925 = vmatprep.subr.bf16.mxu1 %v6973_v37  ;;  %1968 = vmatprep.subr.bf16.mxu0 %v6975_v38  ;;  %v954_v37 = vld [vmem:[#allocation8 + $0x1f8] sm:$0xff]  ;;  %v7008_v38 = vcombine.low %v961_v25, %v969_v26  ;;  %v6993_v40 = vcombine.high %v945_v34, %v953_v35  ;;  %v8109_v25 = vld [vmem:[#allocation11 + $0xa8] sm:$0xff]   ;;  %v8110_v26 = vld [vmem:[#allocation11 + $0x60] sm:$0xff]  }
 0x9ea   :  { %v6995_v41 = vcombine.high %v946_v36, %v954_v37  ;;  %v6994_v49 = vcombine.low %v946_v36, %v954_v37  ;;  %v8120_v36 = vld [vmem:[#allocation11 + $0x10] sm:$0xff]  }
 0x9eb   :  { %v8121_v37 = vld [vmem:[#allocation11 + $0x90] sm:$0xff]  }
 0x9ec   :  { %1926 = vmatpush1.bf16.msra.mxu1 %v6972_v43  ;;  %1969 = vmatpush1.bf16.msra.mxu0 %v6974_v44  ;;  %v937_v43 = vld [vmem:[#allocation8 + $0x170] sm:$0xff]  ;;  %v930_v44 = vld [vmem:[#allocation8 + $0x138] sm:$0xff] }
 0x9ed   :  { %1927 = vmatprep.subr.bf16.mxu1 %v6957_v45  ;;  %1970 = vmatprep.subr.bf16.mxu0 %v6959_v46  ;;  %v938_v45 = vld [vmem:[#allocation8 + $0x178] sm:$0xff]  ;;  %v6992_v46 = vcombine.low %v945_v34, %v953_v35  ;;  %v6977_v52 = vcombine.high %v929_v42, %v937_v43  ;;  %v8118_v34 = vld [vmem:[#allocation11 + $0x50] sm:$0xff]  }
 0x9ee   :  { %v6979_v53 = vcombine.high %v930_v44, %v938_v45  ;;  %v6978_v63 = vcombine.low %v930_v44, %v938_v45  ;;  %v8119_v35 = vld [vmem:[#allocation11 + $0xd0] sm:$0xff]   ;;  %v8128_v44 = vld [vmem:[#allocation11] sm:$0xff]  }
 0x9ef   :  { %v8129_v45 = vld [vmem:[#allocation11 + $0x80] sm:$0xff]  }
 0x9f0   :  { %1928 = vmatpush1.bf16.msra.mxu1 %v6956_v57  ;;  %1971 = vmatpush1.bf16.msra.mxu0 %v6958_v14  ;;  %v921_v57 = vld [vmem:[#allocation8 + $0xf0] sm:$0xff]  ;;  %v914_v14 = vld [vmem:[#allocation8 + $0xb8] sm:$0xff] }
 0x9f1   :  { %1929 = vmatprep.subr.bf16.mxu1 %v6941_v58  ;;  %1972 = vmatprep.subr.bf16.mxu0 %v6943_v60  ;;  %v922_v58 = vld [vmem:[#allocation8 + $0xf8] sm:$0xff]  ;;  %v6976_v60 = vcombine.low %v929_v42, %v937_v43  ;;  %v6961_v62 = vcombine.high %v913_v56, %v921_v57  ;;  %v8126_v42 = vld [vmem:[#allocation11 + $0x40] sm:$0xff]  }
 0x9f2   :  { %v6963_v0 = vcombine.high %v914_v14, %v922_v58  ;;  %v6962_v6 = vcombine.low %v914_v14, %v922_v58  ;;  %v8127_v43 = vld [vmem:[#allocation11 + $0xc0] sm:$0xff]  }
 0x9f4   :  { %1930 = vmatpush1.bf16.msra.mxu1 %v6940_v1  ;;  %1973 = vmatpush1.bf16.msra.mxu0 %v6942_v2  ;;  %v905_v1 = vld [vmem:[#allocation8 + $0x70] sm:$0xff]  ;;  %v898_v2 = vld [vmem:[#allocation8 + $0x38] sm:$0xff] }
 0x9f5   :  { %2001 = vmatprep.subr.bf16.mxu1 %v7057_v3  ;;  %2044 = vmatprep.subr.bf16.mxu0 %v7059_v5  ;;  %v906_v3 = vld [vmem:[#allocation8 + $0x78] sm:$0xff]  ;;  %v6960_v5 = vcombine.low %v913_v56, %v921_v57  ;;  %v6945_v8 = vcombine.high %v897_v59, %v905_v1  ;;  %v6944_v50 = vcombine.low %v897_v59, %v905_v1 }
 0x9f6   :  { %v6947_v9 = vcombine.high %v898_v2, %v906_v3 }
 0x9f7   :  { %1948 = vmatmul.mubr.bf16.vlgmr.msra.gmra.mxu1 %v8918_v11  ;;  %1991 = vmatmul.mubr.bf16.vlgmr.msra.gmra.mxu0 %v8918_v11 }
 0x9f8   :  { %2002 = vmatpush1.bf16.msra.mxu1 %v7056_v10  ;;  %2045 = vmatpush1.bf16.msra.mxu0 %v7058_v12  ;;  %v6946_v10 = vcombine.low %v898_v2, %v906_v3  ;;  %v8098_v12 = vld [vmem:[#allocation11 + $0x78] sm:$0xff]  }
 0x9f9   :  { %2003 = vmatprep.subr.bf16.mxu1 %v7041_v13  ;;  %2046 = vmatprep.subr.bf16.mxu0 %v7043_v51  ;;  %v8099_v13 = vld [vmem:[#allocation11 + $0xf8] sm:$0xff]  }
 0x9fa   :  { %2033 = vmatprep.mubr.bf16.mxu1 %v8657_v30  ;;  %2076 = vmatprep.mubr.bf16.mxu0 %v8657_v30  ;;  %v8100_v51 = vld [vmem:[#allocation11 + $0x38] sm:$0xff]  }
 0x9fc   :  { %2004 = vmatpush1.bf16.msra.mxu1 %v7040_v20  ;;  %2047 = vmatpush1.bf16.msra.mxu0 %v7042_v21  ;;  %v8105_v20 = vld [vmem:[#allocation11 + $0xb0] sm:$0xff]   ;;  %v8106_v21 = vld [vmem:[#allocation11 + $0x68] sm:$0xff]  }
 0x9fd   :  { %2005 = vmatprep.subr.bf16.mxu1 %v7025_v22  ;;  %2048 = vmatprep.subr.bf16.mxu0 %v7027_v24  ;;  %v8107_v22 = vld [vmem:[#allocation11 + $0xe8] sm:$0xff]  }
 0x9fe   :  { %v8108_v24 = vld [vmem:[#allocation11 + $0x28] sm:$0xff]  }
 0xa00   :  { %2006 = vmatpush1.bf16.msra.mxu1 %v7024_v31  ;;  %2049 = vmatpush1.bf16.msra.mxu0 %v7026_v32  ;;  %v8114_v31 = vld [vmem:[#allocation11 + $0x58] sm:$0xff]  }
 0xa01   :  { %2007 = vmatprep.subr.bf16.mxu1 %v7009_v33  ;;  %2050 = vmatprep.subr.bf16.mxu0 %v7011_v18  ;;  %v8115_v32 = vld [vmem:[#allocation11 + $0xd8] sm:$0xff]  }
 0xa02   :  { %v8116_v33 = vld [vmem:[#allocation11 + $0x18] sm:$0xff]  }
 0xa03   :  { %v8117_v18 = vld [vmem:[#allocation11 + $0x98] sm:$0xff]  }
 0xa04   :  { %2008 = vmatpush1.bf16.msra.mxu1 %v7008_v38  ;;  %2051 = vmatpush1.bf16.msra.mxu0 %v7010_v39  ;;  %v8122_v38 = vld [vmem:[#allocation11 + $0x48] sm:$0xff]  }
 0xa05   :  { %2009 = vmatprep.subr.bf16.mxu1 %v6993_v40  ;;  %2052 = vmatprep.subr.bf16.mxu0 %v6995_v41  ;;  %v8123_v39 = vld [vmem:[#allocation11 + $0xc8] sm:$0xff]  }
 0xa06   :  { %v8124_v40 = vld [vmem:[#allocation11 + $0x8] sm:$0xff]  }
 0xa07   :  { %v8125_v41 = vld [vmem:[#allocation11 + $0x88] sm:$0xff]  }
 0xa08   :  { %2010 = vmatpush1.bf16.msra.mxu1 %v6992_v46  ;;  %2053 = vmatpush1.bf16.msra.mxu0 %v6994_v49  ;;  %v8130_v46 = vld [vmem:[#allocation11 + $0x178] sm:$0xff]  }
 0xa09   :  { %2011 = vmatprep.subr.bf16.mxu1 %v6977_v52  ;;  %2054 = vmatprep.subr.bf16.mxu0 %v6979_v53  ;;  %v8131_v49 = vld [vmem:[#allocation11 + $0x1f8] sm:$0xff]   ;;  %v8935_v52 = vsub.s32 3, %v8811_v54  ;;  %v8937_v53 = vld [vmem:[#allocation10] sm:$0xff] }
 0xa0a   :  { %v1030_v14 = vrot.slane %v8937_v53, %v8814_v55 }
 0xa0b   :  { %v1038_v58 = vrot.slane %v8937_v53, %v8935_v52 }
 0xa0c   :  { %2012 = vmatpush1.bf16.msra.mxu1 %v6976_v60  ;;  %2055 = vmatpush1.bf16.msra.mxu0 %v6978_v63  ;;  %v1026_v60 = vrot.slane %v8937_v53, %v8820_v61  ;;  %v1034_v63 = vrot.slane %v8937_v53, %v8825_v7 }
 0xa0d   :  { %2013 = vmatprep.subr.bf16.mxu1 %v6961_v62  ;;  %2056 = vmatprep.subr.bf16.mxu0 %v6963_v0 }
 0xa10   :  { %2014 = vmatpush1.bf16.msra.mxu1 %v6960_v5  ;;  %2057 = vmatpush1.bf16.msra.mxu0 %v6962_v6 }
 0xa11   :  { %2015 = vmatprep.subr.bf16.mxu1 %v6945_v8  ;;  %2058 = vmatprep.subr.bf16.mxu0 %v6947_v9 }
 0xa14   :  { %2016 = vmatpush1.bf16.msra.mxu1 %v6944_v50  ;;  %2059 = vmatpush1.bf16.msra.mxu0 %v6946_v10 }
 0xa15   :  { %7520 = vmatprep.subr.bf16.mxu1 %v8098_v12  ;;  %7542 = vmatprep.subr.bf16.mxu0 %v8099_v13 }
 0xa17   :  { %2034 = vmatmul.mubr.bf16.vlgmr.msra.gmra.mxu1 %v8918_v11  ;;  %2077 = vmatmul.mubr.bf16.vlgmr.msra.gmra.mxu0 %v8918_v11  ;;  %v8113_v11 = vld [vmem:[#allocation11 + $0xa0] sm:$0xff]  }
 0xa18   :  { %7521 = vmatpush3.bf16.msra.mxu1 %v8100_v51  ;;  %7543 = vmatpush3.bf16.msra.mxu0 %v8101_v15 }
 0xa19   :  { %7522 = vmatprep.subr.bf16.mxu1 %v8102_v16  ;;  %7544 = vmatprep.subr.bf16.mxu0 %v8103_v17 }
 0xa1c   :  { %7523 = vmatpush3.bf16.msra.mxu1 %v8104_v19  ;;  %7545 = vmatpush3.bf16.msra.mxu0 %v8105_v20 }
 0xa1d   :  { %7524 = vmatprep.subr.bf16.mxu1 %v8106_v21  ;;  %7546 = vmatprep.subr.bf16.mxu0 %v8107_v22 }
 0xa20   :  { %7525 = vmatpush3.bf16.msra.mxu1 %v8108_v24  ;;  %7547 = vmatpush3.bf16.msra.mxu0 %v8109_v25 }
 0xa21   :  { %7526 = vmatprep.subr.bf16.mxu1 %v8110_v26  ;;  %7548 = vmatprep.subr.bf16.mxu0 %v8111_v27  ;;  %v8132_v26 = vld [vmem:[#allocation11 + $0x138] sm:$0xff]  }
 0xa22   :  { %v8133_v27 = vld [vmem:[#allocation11 + $0x1b8] sm:$0xff]  }
 0xa24   :  { %7527 = vmatpush3.bf16.msra.mxu1 %v8112_v28  ;;  %7549 = vmatpush3.bf16.msra.mxu0 %v8113_v11 }
 0xa25   :  { %7528 = vmatprep.subr.bf16.mxu1 %v8114_v31  ;;  %7550 = vmatprep.subr.bf16.mxu0 %v8115_v32  ;;  %v8134_v31 = vld [vmem:[#allocation11 + $0x170] sm:$0xff]  }
 0xa26   :  { %v8135_v32 = vld [vmem:[#allocation11 + $0x1f0] sm:$0xff]  }
 0xa28   :  { %7529 = vmatpush3.bf16.msra.mxu1 %v8116_v33  ;;  %7551 = vmatpush3.bf16.msra.mxu0 %v8117_v18  ;;  %v8136_v33 = vld [vmem:[#allocation11 + $0x130] sm:$0xff]  }
 0xa29   :  { %7530 = vmatprep.subr.bf16.mxu1 %v8118_v34  ;;  %7552 = vmatprep.subr.bf16.mxu0 %v8119_v35  ;;  %v8137_v18 = vld [vmem:[#allocation11 + $0x1b0] sm:$0xff]   ;;  %v8138_v34 = vld [vmem:[#allocation11 + $0x168] sm:$0xff]  }
 0xa2a   :  { %v8139_v35 = vld [vmem:[#allocation11 + $0x1e8] sm:$0xff]  }
 0xa2c   :  { %7531 = vmatpush3.bf16.msra.mxu1 %v8120_v36  ;;  %7553 = vmatpush3.bf16.msra.mxu0 %v8121_v37  ;;  %v8140_v36 = vld [vmem:[#allocation11 + $0x128] sm:$0xff]  }
 0xa2d   :  { %7532 = vmatprep.subr.bf16.mxu1 %v8122_v38  ;;  %7554 = vmatprep.subr.bf16.mxu0 %v8123_v39  ;;  %v8141_v37 = vld [vmem:[#allocation11 + $0x1a8] sm:$0xff]   ;;  %v8142_v38 = vld [vmem:[#allocation11 + $0x160] sm:$0xff]  }
 0xa2e   :  { %v8143_v39 = vld [vmem:[#allocation11 + $0x1e0] sm:$0xff]  }
 0xa30   :  { %7533 = vmatpush3.bf16.msra.mxu1 %v8124_v40  ;;  %7555 = vmatpush3.bf16.msra.mxu0 %v8125_v41  ;;  %v8144_v40 = vld [vmem:[#allocation11 + $0x120] sm:$0xff]  }
 0xa31   :  { %7534 = vmatprep.subr.bf16.mxu1 %v8126_v42  ;;  %7556 = vmatprep.subr.bf16.mxu0 %v8127_v43  ;;  %v8145_v41 = vld [vmem:[#allocation11 + $0x1a0] sm:$0xff]   ;;  %v8146_v42 = vld [vmem:[#allocation11 + $0x158] sm:$0xff]  }
 0xa32   :  { %v8147_v43 = vld [vmem:[#allocation11 + $0x1d8] sm:$0xff]  }
 0xa34   :  { %7535 = vmatpush3.bf16.msra.mxu1 %v8128_v44  ;;  %7557 = vmatpush3.bf16.msra.mxu0 %v8129_v45  ;;  %v8148_v44 = vld [vmem:[#allocation11 + $0x118] sm:$0xff]  }
 0xa35   :  { %7564 = vmatprep.subr.bf16.mxu1 %v8130_v46  ;;  %7586 = vmatprep.subr.bf16.mxu0 %v8131_v49  ;;  %v8149_v45 = vld [vmem:[#allocation11 + $0x198] sm:$0xff]   ;;  %v8150_v46 = vld [vmem:[#allocation11 + $0x150] sm:$0xff]  }
 0xa36   :  { %v8151_v49 = vld [vmem:[#allocation11 + $0x1d0] sm:$0xff]  }
 0xa77   :  { %v1777_v56 = vpop.f32.mrf.mxu1  ;;  %v1820_v57 = vpop.f32.mrf.mxu0 }
 0xa78   :  { %v1778_v8 = vadd.f32 %v1777_v56, %v1026_v60  ;;  %v1821_v9 = vadd.f32 %v1820_v57, %v1034_v63  ;;  %v8948_v56 = vsub.s32 5, %v8811_v54  ;;  %v8951_v57 = vsub.s32 7, %v8811_v54 }
 0xa79   :  { %v1779_v62 = vpop.f32.mrf.mxu1  ;;  %v1822_v0 = vpop.f32.mrf.mxu0 }
 0xa7a   :  { %v1780_v2 = vadd.f32 %v1779_v62, %v1030_v14  ;;  %v1823_v3 = vadd.f32 %v1822_v0, %v1038_v58  ;;  %v2087_v21 = vmax.f32 %v1778_v8, 0.0  ;;  %v2089_v22 = vmax.f32 %v1821_v9, 0.0  ;;  %v8156_v9 = vld [vmem:[#allocation11 + $0x108] sm:$0xff]  }
 0xa7b   :  { %v1781_v59 = vpop.f32.mrf.mxu1  ;;  %v1824_v1 = vpop.f32.mrf.mxu0 }
 0xa7c   :  { %v1782_v5 = vadd.f32 %v1781_v59, %v1026_v60  ;;  %v1825_v6 = vadd.f32 %v1824_v1, %v1034_v63  ;;  %v2088_v16 = vmax.f32 %v1780_v2, 0.0  ;;  %v2090_v17 = vmax.f32 %v1823_v3, 0.0  ;;  %v8152_v60 = vld [vmem:[#allocation11 + $0x110] sm:$0xff]   ;;  %v8154_v59 = vld [vmem:[#allocation11 + $0x148] sm:$0xff]  }
 0xa7d   :  { %v1783_v50 = vpop.f32.mrf.mxu1  ;;  %v1826_v10 = vpop.f32.mrf.mxu0  ;;  %v8153_v63 = vld [vmem:[#allocation11 + $0x190] sm:$0xff]   ;;  %v8155_v1 = vld [vmem:[#allocation11 + $0x1c8] sm:$0xff]   ;;  %v1046_v2 = vrot.slane %v8937_v53, %v8948_v56  ;;  %v1054_v3 = vrot.slane %v8937_v53, %v8951_v57 }
 0xa7e   :  { %v1784_v12 = vadd.f32 %v1783_v50, %v1030_v14  ;;  %v1827_v13 = vadd.f32 %v1826_v10, %v1038_v58  ;;  %v2103_v51 = vmax.f32 %v1782_v5, 0.0  ;;  %v2105_v15 = vmax.f32 %v1825_v6, 0.0  ;;  %v8157_v50 = vld [vmem:[#allocation11 + $0x188] sm:$0xff]  }
 0xa7f   :  { %v8954_v14 = vsub.s32 4, %v8811_v54  ;;  %v8957_v58 = vsub.s32 6, %v8811_v54 }
 0xa80   :  { %v2104_v19 = vmax.f32 %v1784_v12, 0.0  ;;  %v2106_v20 = vmax.f32 %v1827_v13, 0.0  ;;  %v2119_v28 = vpack.c.bf16 %v2103_v51, %v2087_v21  ;;  %v2121_v11 = vpack.c.bf16 %v2105_v15, %v2089_v22  ;;  %v8158_v13 = vld [vmem:[#allocation11 + $0x140] sm:$0xff]  }
 0xa81   :  { %v1042_v54 = vrot.slane %v8937_v53, %v8954_v14  ;;  %v1050_v5 = vrot.slane %v8937_v53, %v8957_v58  ;;  %v8159_v51 = vld [vmem:[#allocation11 + $0x1c0] sm:$0xff]  }
 0xa82   :  { %v2120_v24 = vpack.c.bf16 %v2104_v19, %v2088_v16  ;;  %v2122_v25 = vpack.c.bf16 %v2106_v20, %v2090_v17 }
 0xa84   :  { %3198 = vmatprep.mubr.bf16.mxu1 %v2120_v24  ;;  %3239 = vmatprep.mubr.bf16.mxu0 %v2122_v25 }
 0xa85   :  { %3199 = vmatmul.mubr.bf16.vlgmr.msra.gmra.mxu1 %v2119_v28  ;;  %3240 = vmatmul.mubr.bf16.vlgmr.msra.gmra.mxu0 %v2121_v11 }
 0xa86   :  { %7565 = vmatpush3.bf16.msra.mxu1 %v8132_v26  ;;  %7587 = vmatpush3.bf16.msra.mxu0 %v8133_v27  ;;  %v8160_v26 = vld [vmem:[#allocation11 + $0x100] sm:$0xff]  }
 0xa87   :  { %7566 = vmatprep.subr.bf16.mxu1 %v8134_v31  ;;  %7588 = vmatprep.subr.bf16.mxu0 %v8135_v32  ;;  %v8161_v27 = vld [vmem:[#allocation11 + $0x180] sm:$0xff]   ;;  %v8162_v31 = vld [vmem:[#allocation11 + $0x278] sm:$0xff]  }
 0xa88   :  { %v8163_v32 = vld [vmem:[#allocation11 + $0x2f8] sm:$0xff]  }
 0xa8a   :  { %7567 = vmatpush3.bf16.msra.mxu1 %v8136_v33  ;;  %7589 = vmatpush3.bf16.msra.mxu0 %v8137_v18 }
 0xa8b   :  { %7568 = vmatprep.subr.bf16.mxu1 %v8138_v34  ;;  %7590 = vmatprep.subr.bf16.mxu0 %v8139_v35 }
 0xa8e   :  { %7569 = vmatpush3.bf16.msra.mxu1 %v8140_v36  ;;  %7591 = vmatpush3.bf16.msra.mxu0 %v8141_v37 }
 0xa8f   :  { %7570 = vmatprep.subr.bf16.mxu1 %v8142_v38  ;;  %7592 = vmatprep.subr.bf16.mxu0 %v8143_v39 }
 0xa92   :  { %7571 = vmatpush3.bf16.msra.mxu1 %v8144_v40  ;;  %7593 = vmatpush3.bf16.msra.mxu0 %v8145_v41  ;;  %v8164_v40 = vld [vmem:[#allocation11 + $0x238] sm:$0xff]  }
 0xa93   :  { %7572 = vmatprep.subr.bf16.mxu1 %v8146_v42  ;;  %7594 = vmatprep.subr.bf16.mxu0 %v8147_v43  ;;  %v8165_v41 = vld [vmem:[#allocation11 + $0x2b8] sm:$0xff]  }
 0xa96   :  { %7573 = vmatpush3.bf16.msra.mxu1 %v8148_v44  ;;  %7595 = vmatpush3.bf16.msra.mxu0 %v8149_v45  ;;  %v8166_v44 = vld [vmem:[#allocation11 + $0x270] sm:$0xff]  }
 0xa97   :  { %v1863_v62 = vpop.f32.mrf.mxu1  ;;  %v1906_v0 = vpop.f32.mrf.mxu0  ;;  %7574 = vmatprep.subr.bf16.mxu1 %v8150_v46  ;;  %7596 = vmatprep.subr.bf16.mxu0 %v8151_v49  ;;  %v8167_v45 = vld [vmem:[#allocation11 + $0x2f0] sm:$0xff]  }
 0xa98   :  { %v1864_v20 = vadd.f32 %v1863_v62, %v1042_v54  ;;  %v1907_v21 = vadd.f32 %v1906_v0, %v1050_v5  ;;  %v8168_v46 = vld [vmem:[#allocation11 + $0x230] sm:$0xff]   ;;  %v8172_v62 = vld [vmem:[#allocation11 + $0x228] sm:$0xff]  }
 0xa99   :  { %v1865_v6 = vpop.f32.mrf.mxu1  ;;  %v1908_v8 = vpop.f32.mrf.mxu0  ;;  %v8169_v49 = vld [vmem:[#allocation11 + $0x2b0] sm:$0xff]   ;;  %v8173_v0 = vld [vmem:[#allocation11 + $0x2a8] sm:$0xff]  }
 0xa9a   :  { %7575 = vmatpush3.bf16.msra.mxu1 %v8152_v60  ;;  %7597 = vmatpush3.bf16.msra.mxu0 %v8153_v63  ;;  %v1866_v15 = vadd.f32 %v1865_v6, %v1046_v2  ;;  %v1909_v16 = vadd.f32 %v1908_v8, %v1054_v3  ;;  %v2091_v36 = vmax.f32 %v1864_v20, 0.0  ;;  %v2093_v37 = vmax.f32 %v1907_v21, 0.0  ;;  %v8170_v60 = vld [vmem:[#allocation11 + $0x268] sm:$0xff]   ;;  %v8180_v6 = vld [vmem:[#allocation11 + $0x218] sm:$0xff]  }
 0xa9b   :  { %v1867_v10 = vpop.f32.mrf.mxu1  ;;  %v1910_v12 = vpop.f32.mrf.mxu0  ;;  %7576 = vmatprep.subr.bf16.mxu1 %v8154_v59  ;;  %7598 = vmatprep.subr.bf16.mxu0 %v8155_v1  ;;  %v8171_v63 = vld [vmem:[#allocation11 + $0x2e8] sm:$0xff]   ;;  %v8174_v59 = vld [vmem:[#allocation11 + $0x260] sm:$0xff]   ;;  %v8181_v8 = vld [vmem:[#allocation11 + $0x298] sm:$0xff]  }
 0xa9c   :  { %v1868_v17 = vadd.f32 %v1867_v10, %v1042_v54  ;;  %v1911_v19 = vadd.f32 %v1910_v12, %v1050_v5  ;;  %v2092_v33 = vmax.f32 %v1866_v15, 0.0  ;;  %v2094_v18 = vmax.f32 %v1909_v16, 0.0  ;;  %v8175_v1 = vld [vmem:[#allocation11 + $0x2e0] sm:$0xff]   ;;  %v8178_v54 = vld [vmem:[#allocation11 + $0x258] sm:$0xff]   ;;  %v8967_v10 = vld [vmem:[#allocation10 + $0x8] sm:$0xff] }
 0xa9d   :  { %v1869_v22 = vpop.f32.mrf.mxu1  ;;  %v1912_v53 = vpop.f32.mrf.mxu0  ;;  %v8179_v5 = vld [vmem:[#allocation11 + $0x2d8] sm:$0xff]   ;;  %v8184_v12 = vld [vmem:[#allocation11 + $0x210] sm:$0xff]   ;;  %v8186_v16 = vld [vmem:[#allocation11 + $0x248] sm:$0xff]   ;;  %v1070_v20 = vrot.slane %v8967_v10, %v8935_v52  ;;  %v1058_v21 = vrot.slane %v8967_v10, %v8820_v61 }
 0xa9e   :  { %v1870_v24 = vadd.f32 %v1869_v22, %v1046_v2  ;;  %v1913_v25 = vadd.f32 %v1912_v53, %v1054_v3  ;;  %7577 = vmatpush3.bf16.msra.mxu1 %v8156_v9  ;;  %7599 = vmatpush3.bf16.msra.mxu0 %v8157_v50  ;;  %v2107_v28 = vmax.f32 %v1868_v17, 0.0  ;;  %v2109_v11 = vmax.f32 %v1911_v19, 0.0  ;;  %v8176_v2 = vld [vmem:[#allocation11 + $0x220] sm:$0xff]   ;;  %v8182_v9 = vld [vmem:[#allocation11 + $0x250] sm:$0xff]   ;;  %v8187_v17 = vld [vmem:[#allocation11 + $0x2c8] sm:$0xff]  }
 0xa9f   :  { %7578 = vmatprep.subr.bf16.mxu1 %v8158_v13  ;;  %7600 = vmatprep.subr.bf16.mxu0 %v8159_v51  ;;  %v8177_v3 = vld [vmem:[#allocation11 + $0x2a0] sm:$0xff]   ;;  %v8183_v50 = vld [vmem:[#allocation11 + $0x2d0] sm:$0xff]   ;;  %v1062_v19 = vrot.slane %v8967_v10, %v8814_v55  ;;  %v1066_v22 = vrot.slane %v8967_v10, %v8825_v7 }
 0xaa0   :  { %v2108_v34 = vmax.f32 %v1870_v24, 0.0  ;;  %v2110_v35 = vmax.f32 %v1913_v25, 0.0  ;;  %v2123_v42 = vpack.c.bf16 %v2107_v28, %v2091_v36  ;;  %v2125_v43 = vpack.c.bf16 %v2109_v11, %v2093_v37  ;;  %v8185_v13 = vld [vmem:[#allocation11 + $0x290] sm:$0xff]   ;;  %v8188_v25 = vld [vmem:[#allocation11 + $0x208] sm:$0xff]   ;;  %v8190_v11 = vld [vmem:[#allocation11 + $0x240] sm:$0xff]  }
 0xaa2   :  { %v2124_v38 = vpack.c.bf16 %v2108_v34, %v2092_v33  ;;  %v2126_v39 = vpack.c.bf16 %v2110_v35, %v2094_v18  ;;  %7579 = vmatpush3.bf16.msra.mxu1 %v8160_v26  ;;  %7601 = vmatpush3.bf16.msra.mxu0 %v8161_v27  ;;  %v8189_v26 = vld [vmem:[#allocation11 + $0x288] sm:$0xff]  }
 0xaa3   :  { %7608 = vmatprep.subr.bf16.mxu1 %v8162_v31  ;;  %7630 = vmatprep.subr.bf16.mxu0 %v8163_v32  ;;  %v8191_v31 = vld [vmem:[#allocation11 + $0x2c0] sm:$0xff]  }
 0xaa4   :  { %3280 = vmatprep.mubr.bf16.mxu1 %v2124_v38  ;;  %3321 = vmatprep.mubr.bf16.mxu0 %v2126_v39 }
 0xaa5   :  { %3281 = vmatmul.mubr.bf16.vlgmr.msra.gmra.mxu1 %v2123_v42  ;;  %3322 = vmatmul.mubr.bf16.vlgmr.msra.gmra.mxu0 %v2125_v43  ;;  %v8193_v42 = vld [vmem:[#allocation11 + $0x280] sm:$0xff]  }
 0xaa6   :  { %7609 = vmatpush3.bf16.msra.mxu1 %v8164_v40  ;;  %7631 = vmatpush3.bf16.msra.mxu0 %v8165_v41  ;;  %v8192_v41 = vld [vmem:[#allocation11 + $0x200] sm:$0xff]  }
 0xaa7   :  { %7610 = vmatprep.subr.bf16.mxu1 %v8166_v44  ;;  %7632 = vmatprep.subr.bf16.mxu0 %v8167_v45  ;;  %v8194_v45 = vld [vmem:[#allocation11 + $0x378] sm:$0xff]  }
 0xaaa   :  { %7611 = vmatpush3.bf16.msra.mxu1 %v8168_v46  ;;  %7633 = vmatpush3.bf16.msra.mxu0 %v8169_v49  ;;  %v8195_v46 = vld [vmem:[#allocation11 + $0x3f8] sm:$0xff]  }
 0xaab   :  { %7612 = vmatprep.subr.bf16.mxu1 %v8170_v60  ;;  %7634 = vmatprep.subr.bf16.mxu0 %v8171_v63 }
 0xaae   :  { %7613 = vmatpush3.bf16.msra.mxu1 %v8172_v62  ;;  %7635 = vmatpush3.bf16.msra.mxu0 %v8173_v0 }
 0xaaf   :  { %7614 = vmatprep.subr.bf16.mxu1 %v8174_v59  ;;  %7636 = vmatprep.subr.bf16.mxu0 %v8175_v1 }
 0xab2   :  { %7615 = vmatpush3.bf16.msra.mxu1 %v8176_v2  ;;  %7637 = vmatpush3.bf16.msra.mxu0 %v8177_v3  ;;  %v8196_v3 = vld [vmem:[#allocation11 + $0x338] sm:$0xff]  }
 0xab3   :  { %7616 = vmatprep.subr.bf16.mxu1 %v8178_v54  ;;  %7638 = vmatprep.subr.bf16.mxu0 %v8179_v5  ;;  %v8197_v54 = vld [vmem:[#allocation11 + $0x3b8] sm:$0xff]  }
 0xab6   :  { %7617 = vmatpush3.bf16.msra.mxu1 %v8180_v6  ;;  %7639 = vmatpush3.bf16.msra.mxu0 %v8181_v8  ;;  %v8198_v8 = vld [vmem:[#allocation11 + $0x370] sm:$0xff]  }
 0xab7   :  { %v1949_v51 = vpop.f32.mrf.mxu1  ;;  %v1992_v15 = vpop.f32.mrf.mxu0  ;;  %7618 = vmatprep.subr.bf16.mxu1 %v8182_v9  ;;  %7640 = vmatprep.subr.bf16.mxu0 %v8183_v50  ;;  %v8199_v9 = vld [vmem:[#allocation11 + $0x3f0] sm:$0xff]  }
 0xab8   :  { %v1950_v35 = vadd.f32 %v1949_v51, %v1058_v21  ;;  %v1993_v36 = vadd.f32 %v1992_v15, %v1066_v22  ;;  %v8200_v50 = vld [vmem:[#allocation11 + $0x330] sm:$0xff]   ;;  %v8203_v51 = vld [vmem:[#allocation11 + $0x3e8] sm:$0xff]  }
 0xab9   :  { %v1951_v53 = vpop.f32.mrf.mxu1  ;;  %v1994_v24 = vpop.f32.mrf.mxu0  ;;  %v8204_v15 = vld [vmem:[#allocation11 + $0x328] sm:$0xff]  }
 0xaba   :  { %7619 = vmatpush3.bf16.msra.mxu1 %v8184_v12  ;;  %7641 = vmatpush3.bf16.msra.mxu0 %v8185_v13  ;;  %v1952_v32 = vadd.f32 %v1951_v53, %v1062_v19  ;;  %v1995_v33 = vadd.f32 %v1994_v24, %v1070_v20  ;;  %v2095_v0 = vmax.f32 %v1950_v35, 0.0  ;;  %v2097_v59 = vmax.f32 %v1993_v36, 0.0  ;;  %v8201_v12 = vld [vmem:[#allocation11 + $0x3b0] sm:$0xff]   ;;  %v8202_v13 = vld [vmem:[#allocation11 + $0x368] sm:$0xff]   ;;  %v8211_v53 = vld [vmem:[#allocation11 + $0x3d8] sm:$0xff]  }
 0xabb   :  { %v1953_v27 = vpop.f32.mrf.mxu1  ;;  %v1996_v28 = vpop.f32.mrf.mxu0  ;;  %7620 = vmatprep.subr.bf16.mxu1 %v8186_v16  ;;  %7642 = vmatprep.subr.bf16.mxu0 %v8187_v17  ;;  %v8205_v16 = vld [vmem:[#allocation11 + $0x3a8] sm:$0xff]   ;;  %v8206_v17 = vld [vmem:[#allocation11 + $0x360] sm:$0xff]   ;;  %v8212_v24 = vld [vmem:[#allocation11 + $0x318] sm:$0xff]   ;;  %v1086_v35 = vrot.slane %v8967_v10, %v8951_v57  ;;  %v1074_v36 = vrot.slane %v8967_v10, %v8954_v14 }
 0xabc   :  { %v1954_v18 = vadd.f32 %v1953_v27, %v1058_v21  ;;  %v1997_v34 = vadd.f32 %v1996_v28, %v1066_v22  ;;  %v2096_v49 = vmax.f32 %v1952_v32, 0.0  ;;  %v2098_v60 = vmax.f32 %v1995_v33, 0.0  ;;  %v8209_v21 = vld [vmem:[#allocation11 + $0x3a0] sm:$0xff]   ;;  %v8210_v22 = vld [vmem:[#allocation11 + $0x358] sm:$0xff]   ;;  %v8215_v27 = vld [vmem:[#allocation11 + $0x3d0] sm:$0xff]  }
 0xabd   :  { %v1955_v37 = vpop.f32.mrf.mxu1  ;;  %v1998_v38 = vpop.f32.mrf.mxu0  ;;  %v8216_v28 = vld [vmem:[#allocation11 + $0x310] sm:$0xff]   ;;  %v8218_v33 = vld [vmem:[#allocation11 + $0x348] sm:$0xff]  }
 0xabe   :  { %v1956_v39 = vadd.f32 %v1955_v37, %v1062_v19  ;;  %v1999_v40 = vadd.f32 %v1998_v38, %v1070_v20  ;;  %7621 = vmatpush3.bf16.msra.mxu1 %v8188_v25  ;;  %7643 = vmatpush3.bf16.msra.mxu0 %v8189_v26  ;;  %v2111_v43 = vmax.f32 %v1954_v18, 0.0  ;;  %v2113_v44 = vmax.f32 %v1997_v34, 0.0  ;;  %v8207_v19 = vld [vmem:[#allocation11 + $0x3e0] sm:$0xff]   ;;  %v8213_v25 = vld [vmem:[#allocation11 + $0x398] sm:$0xff]   ;;  %v8214_v26 = vld [vmem:[#allocation11 + $0x350] sm:$0xff]  }
 0xabf   :  { %7622 = vmatprep.subr.bf16.mxu1 %v8190_v11  ;;  %7644 = vmatprep.subr.bf16.mxu0 %v8191_v31  ;;  %v8208_v20 = vld [vmem:[#allocation11 + $0x320] sm:$0xff]   ;;  %v8217_v11 = vld [vmem:[#allocation11 + $0x390] sm:$0xff]   ;;  %v8219_v18 = vld [vmem:[#allocation11 + $0x3c8] sm:$0xff]   ;;  %v1078_v34 = vrot.slane %v8967_v10, %v8948_v56  ;;  %v1082_v37 = vrot.slane %v8967_v10, %v8957_v58 }
 0xac0   :  { %v2112_v63 = vmax.f32 %v1956_v39, 0.0  ;;  %v2114_v62 = vmax.f32 %v1999_v40, 0.0  ;;  %v2127_v5 = vpack.c.bf16 %v2111_v43, %v2095_v0  ;;  %v2129_v6 = vpack.c.bf16 %v2113_v44, %v2097_v59  ;;  %v8220_v40 = vld [vmem:[#allocation11 + $0x308] sm:$0xff]   ;;  %v8222_v44 = vld [vmem:[#allocation11 + $0x340] sm:$0xff]  }
 0xac2   :  { %v2128_v1 = vpack.c.bf16 %v2112_v63, %v2096_v49  ;;  %v2130_v2 = vpack.c.bf16 %v2114_v62, %v2098_v60  ;;  %7623 = vmatpush3.bf16.msra.mxu1 %v8192_v41  ;;  %7645 = vmatpush3.bf16.msra.mxu0 %v8193_v42  ;;  %v8221_v41 = vld [vmem:[#allocation11 + $0x388] sm:$0xff]  }
 0xac3   :  { %7652 = vmatprep.subr.bf16.mxu1 %v8194_v45  ;;  %7674 = vmatprep.subr.bf16.mxu0 %v8195_v46  ;;  %v8223_v45 = vld [vmem:[#allocation11 + $0x3c0] sm:$0xff]  }
 0xac4   :  { %3362 = vmatprep.mubr.bf16.mxu1 %v2128_v1  ;;  %3403 = vmatprep.mubr.bf16.mxu0 %v2130_v2 }
 0xac5   :  { %3363 = vmatmul.mubr.bf16.vlgmr.msra.gmra.mxu1 %v2127_v5  ;;  %3404 = vmatmul.mubr.bf16.vlgmr.msra.gmra.mxu0 %v2129_v6 }
 0xac6   :  { %7653 = vmatpush3.bf16.msra.mxu1 %v8196_v3  ;;  %7675 = vmatpush3.bf16.msra.mxu0 %v8197_v54  ;;  %v8224_v3 = vld [vmem:[#allocation11 + $0x300] sm:$0xff]  }
 0xac7   :  { %7654 = vmatprep.subr.bf16.mxu1 %v8198_v8  ;;  %7676 = vmatprep.subr.bf16.mxu0 %v8199_v9  ;;  %v8225_v54 = vld [vmem:[#allocation11 + $0x380] sm:$0xff]  }
 0xaca   :  { %7655 = vmatpush3.bf16.msra.mxu1 %v8200_v50  ;;  %7677 = vmatpush3.bf16.msra.mxu0 %v8201_v12 }
 0xacb   :  { %7656 = vmatprep.subr.bf16.mxu1 %v8202_v13  ;;  %7678 = vmatprep.subr.bf16.mxu0 %v8203_v51 }
 0xace   :  { %7657 = vmatpush3.bf16.msra.mxu1 %v8204_v15  ;;  %7679 = vmatpush3.bf16.msra.mxu0 %v8205_v16 }
 0xacf   :  { %7658 = vmatprep.subr.bf16.mxu1 %v8206_v17  ;;  %7680 = vmatprep.subr.bf16.mxu0 %v8207_v19 }
 0xad2   :  { %7659 = vmatpush3.bf16.msra.mxu1 %v8208_v20  ;;  %7681 = vmatpush3.bf16.msra.mxu0 %v8209_v21 }
 0xad3   :  { %7660 = vmatprep.subr.bf16.mxu1 %v8210_v22  ;;  %7682 = vmatprep.subr.bf16.mxu0 %v8211_v53 }
 0xad6   :  { %7661 = vmatpush3.bf16.msra.mxu1 %v8212_v24  ;;  %7683 = vmatpush3.bf16.msra.mxu0 %v8213_v25 }
 0xad7   :  { %v2035_v31 = vpop.f32.mrf.mxu1  ;;  %v2078_v32 = vpop.f32.mrf.mxu0  ;;  %7662 = vmatprep.subr.bf16.mxu1 %v8214_v26  ;;  %7684 = vmatprep.subr.bf16.mxu0 %v8215_v27 }
 0xad8   :  { %v2036_v62 = vadd.f32 %v2035_v31, %v1074_v36  ;;  %v2079_v0 = vadd.f32 %v2078_v32, %v1082_v37 }
 0xad9   :  { %v2037_v38 = vpop.f32.mrf.mxu1  ;;  %v2080_v39 = vpop.f32.mrf.mxu0 }
 0xada   :  { %7663 = vmatpush3.bf16.msra.mxu1 %v8216_v28  ;;  %7685 = vmatpush3.bf16.msra.mxu0 %v8217_v11  ;;  %v2038_v46 = vadd.f32 %v2037_v38, %v1078_v34  ;;  %v2081_v49 = vadd.f32 %v2080_v39, %v1086_v35  ;;  %v2099_v13 = vmax.f32 %v2036_v62, 0.0  ;;  %v2101_v51 = vmax.f32 %v2079_v0, 0.0 }
 0xadb   :  { %v2039_v42 = vpop.f32.mrf.mxu1  ;;  %v2082_v43 = vpop.f32.mrf.mxu0  ;;  %7664 = vmatprep.subr.bf16.mxu1 %v8218_v33  ;;  %7686 = vmatprep.subr.bf16.mxu0 %v8219_v18 }
 0xadc   :  { %v2040_v60 = vadd.f32 %v2039_v42, %v1074_v36  ;;  %v2083_v63 = vadd.f32 %v2082_v43, %v1082_v37  ;;  %v2100_v8 = vmax.f32 %v2038_v46, 0.0  ;;  %v2102_v9 = vmax.f32 %v2081_v49, 0.0  ;;  %v7060_v36 = vld [vmem:[%s9188_s10] ss:$0 sm:$0xff] }
 0xadd   :  { %v2041_v59 = vpop.f32.mrf.mxu1  ;;  %v2084_v10 = vpop.f32.mrf.mxu0 }
 0xade   :  { %v2042_v1 = vadd.f32 %v2041_v59, %v1078_v34  ;;  %v2085_v2 = vadd.f32 %v2084_v10, %v1086_v35  ;;  %7665 = vmatpush3.bf16.msra.mxu1 %v8220_v40  ;;  %7687 = vmatpush3.bf16.msra.mxu0 %v8221_v41  ;;  %v2115_v5 = vmax.f32 %v2040_v60, 0.0  ;;  %v2117_v6 = vmax.f32 %v2083_v63, 0.0 }
 0xadf   :  { %7666 = vmatprep.subr.bf16.mxu1 %v8222_v44  ;;  %7688 = vmatprep.subr.bf16.mxu0 %v8223_v45 }
 0xae0   :  { %v2116_v50 = vmax.f32 %v2042_v1, 0.0  ;;  %v2118_v12 = vmax.f32 %v2085_v2, 0.0  ;;  %v2131_v17 = vpack.c.bf16 %v2115_v5, %v2099_v13  ;;  %v2133_v19 = vpack.c.bf16 %v2117_v6, %v2101_v51 }
 0xae2   :  { %v2132_v15 = vpack.c.bf16 %v2116_v50, %v2100_v8  ;;  %v2134_v16 = vpack.c.bf16 %v2118_v12, %v2102_v9  ;;  %7667 = vmatpush3.bf16.msra.mxu1 %v8224_v3  ;;  %7689 = vmatpush3.bf16.msra.mxu0 %v8225_v54 }
 0xae3   :  { %7962 = vmatprep.subr.bf16.mxu0 %v8656_v4 }
 0xae4   :  { %3444 = vmatprep.mubr.bf16.mxu1 %v2132_v15  ;;  %3485 = vmatprep.mubr.bf16.mxu0 %v2134_v16 }
 0xae5   :  { %3445 = vmatmul.mubr.bf16.vlgmr.msra.gmra.mxu1 %v2131_v17  ;;  %3486 = vmatmul.mubr.bf16.vlgmr.msra.gmra.mxu0 %v2133_v19 }
 0xae6   :  { %3748 = vmatprep.mubr.bf16.mxu1 %v8657_v30  ;;  %7978 = vmatprep.mubr.msk.bf16.mxu0 %vm8658_vm0, %v8656_v4 }
 0xb45   :  { %v7536_v20 = vpop.f32.mrf.mxu1  ;;  %v7558_v21 = vpop.f32.mrf.mxu0 }
 0xb47   :  { %v7537_v22 = vpop.f32.mrf.mxu1  ;;  %v7559_v53 = vpop.f32.mrf.mxu0 }
 0xb48   :  { %v7538_v35 = vadd.f32 %v7537_v22, %v7536_v20  ;;  %v7560_v43 = vadd.f32 %v7559_v53, %v7558_v21 }
 0xb49   :  { %v7539_v24 = vpop.f32.mrf.mxu1  ;;  %v7561_v25 = vpop.f32.mrf.mxu0 }
 0xb4a   :  { %v3201_v40 = vadd.f32 %v7538_v35, %v7060_v36 }
 0xb4b   :  { %v7540_v26 = vpop.f32.mrf.mxu1  ;;  %v7562_v27 = vpop.f32.mrf.mxu0 }
 0xb4c   :  { %v7541_v41 = vadd.f32 %v7540_v26, %v7539_v24  ;;  %v3242_v46 = vadd.f32 %v7560_v43, %v3201_v40  ;;  %v7563_v63 = vadd.f32 %v7562_v27, %v7561_v25 }
 0xb4e   :  { %v3204_v49 = vadd.f32 %v7541_v41, %v7060_v36 }
 0xb50   :  { %v3245_v10 = vadd.f32 %v7563_v63, %v3204_v49  ;;  %v8230_v49 = vld [vmem:[#allocation5 + $0x150] ss:$12 sps:$4 sm:$0xff]  }
 0xb51   :  { %v8236_v63 = vld [vmem:[#allocation5 + $0x13c] ss:$12 sps:$4 sm:$0xff]  }
 0xb65   :  { %v7580_v28 = vpop.f32.mrf.mxu1  ;;  %v7602_v11 = vpop.f32.mrf.mxu0 }
 0xb67   :  { %v7581_v31 = vpop.f32.mrf.mxu1  ;;  %v7603_v32 = vpop.f32.mrf.mxu0 }
 0xb68   :  { %v7582_v44 = vadd.f32 %v7581_v31, %v7580_v28  ;;  %v7604_v1 = vadd.f32 %v7603_v32, %v7602_v11 }
 0xb69   :  { %v7583_v33 = vpop.f32.mrf.mxu1  ;;  %v7605_v18 = vpop.f32.mrf.mxu0 }
 0xb6a   :  { %v3283_v62 = vadd.f32 %v7582_v44, %v3242_v46  ;;  %v8232_v46 = vld [vmem:[#allocation5 + $0x154] ss:$12 sps:$4 sm:$0xff]  }
 0xb6b   :  { %v7584_v34 = vpop.f32.mrf.mxu1  ;;  %v7606_v37 = vpop.f32.mrf.mxu0 }
 0xb6c   :  { %v7585_v0 = vadd.f32 %v7584_v34, %v7583_v33  ;;  %v3324_v54 = vadd.f32 %v7604_v1, %v3283_v62  ;;  %v7607_v8 = vadd.f32 %v7606_v37, %v7605_v18  ;;  %v8226_v37 = vld [vmem:[#allocation5 + $0x168] ss:$12 sps:$4 sm:$0xff]   ;;  %v8234_v62 = vld [vmem:[#allocation5 + $0x138] ss:$12 sps:$4 sm:$0xff]  }
 0xb6d   :  { %v8241_v1 = vld [vmem:[#allocation5 + $0x128] ss:$12 sps:$4 sm:$0xff]  }
 0xb6e   :  { %v3286_v5 = vadd.f32 %v7585_v0, %v3245_v10  ;;  %v8237_v0 = vld [vmem:[#allocation5 + $0x140] ss:$12 sps:$4 sm:$0xff]   ;;  %v8240_v10 = vld [vmem:[#allocation5 + $0x124] ss:$12 sps:$4 sm:$0xff]  }
 0xb70   :  { %v3327_v51 = vadd.f32 %v7607_v8, %v3286_v5  ;;  %v8248_v5 = vld [vmem:[#allocation5 + $0xf4] ss:$12 sps:$4 sm:$0xff]   ;;  %v8249_v8 = vld [vmem:[#allocation5 + $0xf8] ss:$12 sps:$4 sm:$0xff]  }
 0xb85   :  { %v7624_v38 = vpop.f32.mrf.mxu1  ;;  %v7646_v39 = vpop.f32.mrf.mxu0 }
 0xb87   :  { %v7625_v42 = vpop.f32.mrf.mxu1  ;;  %v7647_v45 = vpop.f32.mrf.mxu0 }
 0xb88   :  { %v7626_v2 = vadd.f32 %v7625_v42, %v7624_v38  ;;  %v7648_v15 = vadd.f32 %v7647_v45, %v7646_v39  ;;  %v8228_v38 = vld [vmem:[#allocation5 + $0x16c] ss:$12 sps:$4 sm:$0xff]   ;;  %v8229_v39 = vld [vmem:[#allocation5 + $0x170] ss:$12 sps:$4 sm:$0xff]  }
 0xb89   :  { %v7627_v60 = vpop.f32.mrf.mxu1  ;;  %v7649_v59 = vpop.f32.mrf.mxu0  ;;  %3716 = vmatprep.subr.bf16.mxu1 %v8228_v38  ;;  %7963 = vmatpush3.bf16.msra.mxu0 %v8229_v39 }
 0xb8a   :  { %v3365_v9 = vadd.f32 %v7626_v2, %v3324_v54  ;;  %3717 = vmatpush1.bf16.msra.mxu1 %v8226_v37  ;;  %7964 = vmatprep.subr.bf16.mxu0 %v8656_v4  ;;  %v8244_v2 = vld [vmem:[#allocation5 + $0x10c] ss:$12 sps:$4 sm:$0xff]   ;;  %v8245_v54 = vld [vmem:[#allocation5 + $0x110] ss:$12 sps:$4 sm:$0xff]  }
 0xb8b   :  { %v7628_v3 = vpop.f32.mrf.mxu1  ;;  %v7650_v6 = vpop.f32.mrf.mxu0  ;;  %3718 = vmatprep.subr.bf16.mxu1 %v8232_v46 }
 0xb8c   :  { %v7629_v50 = vadd.f32 %v7628_v3, %v7627_v60  ;;  %v3406_v19 = vadd.f32 %v7648_v15, %v3365_v9  ;;  %v7651_v24 = vadd.f32 %v7650_v6, %v7649_v59  ;;  %v8233_v60 = vld [vmem:[#allocation5 + $0x158] ss:$12 sps:$4 sm:$0xff]   ;;  %v8238_v59 = vld [vmem:[#allocation5 + $0x120] ss:$12 sps:$4 sm:$0xff]   ;;  %v8242_v3 = vld [vmem:[#allocation5 + $0x108] ss:$12 sps:$4 sm:$0xff]  }
 0xb8d   :  { %7965 = vmatpush3.bf16.msra.mxu0 %v8233_v60  ;;  %v8246_v6 = vld [vmem:[#allocation5 + $0xf0] ss:$12 sps:$4 sm:$0xff]   ;;  %v8257_v15 = vld [vmem:[#allocation5 + $0xc8] ss:$12 sps:$4 sm:$0xff]  }
 0xb8e   :  { %v3368_v20 = vadd.f32 %v7629_v50, %v3327_v51  ;;  %3719 = vmatpush1.bf16.msra.mxu1 %v8230_v49  ;;  %7966 = vmatprep.subr.bf16.mxu0 %v8656_v4  ;;  %v8252_v9 = vld [vmem:[#allocation5 + $0xdc] ss:$12 sps:$4 sm:$0xff]   ;;  %v8250_v50 = vld [vmem:[#allocation5 + $0xd8] ss:$12 sps:$4 sm:$0xff]   ;;  %v8254_v51 = vld [vmem:[#allocation5 + $0xc0] ss:$12 sps:$4 sm:$0xff]  }
 0xb8f   :  { %3720 = vmatprep.subr.bf16.mxu1 %v8236_v63 }
 0xb90   :  { %v3409_v11 = vadd.f32 %v7651_v24, %v3368_v20 }
 0xb91   :  { %7967 = vmatpush3.bf16.msra.mxu0 %v8237_v0 }
 0xb92   :  { %3721 = vmatpush1.bf16.msra.mxu1 %v8234_v62  ;;  %7968 = vmatprep.subr.bf16.mxu0 %v8656_v4 }
 0xb93   :  { %3722 = vmatprep.subr.bf16.mxu1 %v8240_v10 }
 0xb95   :  { %7969 = vmatpush3.bf16.msra.mxu0 %v8241_v1 }
 0xb96   :  { %3723 = vmatpush1.bf16.msra.mxu1 %v8238_v59  ;;  %7970 = vmatprep.subr.bf16.mxu0 %v8656_v4 }
 0xb97   :  { %3724 = vmatprep.subr.bf16.mxu1 %v8244_v2 }
 0xb99   :  { %7971 = vmatpush3.bf16.msra.mxu0 %v8245_v54 }
 0xb9a   :  { %3725 = vmatpush1.bf16.msra.mxu1 %v8242_v3  ;;  %7972 = vmatprep.subr.bf16.mxu0 %v8656_v4 }
 0xb9b   :  { %3726 = vmatprep.subr.bf16.mxu1 %v8248_v5 }
 0xb9d   :  { %7973 = vmatpush3.bf16.msra.mxu0 %v8249_v8 }
 0xb9e   :  { %3727 = vmatpush1.bf16.msra.mxu1 %v8246_v6  ;;  %7974 = vmatprep.subr.bf16.mxu0 %v8656_v4 }
 0xb9f   :  { %3728 = vmatprep.subr.bf16.mxu1 %v8252_v9 }
 0xba2   :  { %3729 = vmatpush1.bf16.msra.mxu1 %v8250_v50 }
 0xba5   :  { %v7668_v12 = vpop.f32.mrf.mxu1  ;;  %v7690_v13 = vpop.f32.mrf.mxu0 }
 0xba7   :  { %v7669_v16 = vpop.f32.mrf.mxu1  ;;  %v7691_v17 = vpop.f32.mrf.mxu0 }
 0xba8   :  { %v7670_v21 = vadd.f32 %v7669_v16, %v7668_v12  ;;  %v7692_v26 = vadd.f32 %v7691_v17, %v7690_v13  ;;  %v8253_v12 = vld [vmem:[#allocation5 + $0xe0] ss:$12 sps:$4 sm:$0xff]   ;;  %v8256_v13 = vld [vmem:[#allocation5 + $0xc4] ss:$12 sps:$4 sm:$0xff]  }
 0xba9   :  { %v7671_v22 = vpop.f32.mrf.mxu1  ;;  %v7693_v53 = vpop.f32.mrf.mxu0  ;;  %7975 = vmatpush3.bf16.msra.mxu0 %v8253_v12  ;;  %3730 = vmatprep.subr.bf16.mxu1 %v8256_v13 }
 0xbaa   :  { %v3447_v25 = vadd.f32 %v7670_v21, %v3406_v19  ;;  %7976 = vmatprep.subr.bf16.mxu0 %v8656_v4  ;;  %3731 = vmatpush1.bf16.msra.mxu1 %v8254_v51 }
 0xbab   :  { %v7672_v27 = vpop.f32.mrf.mxu1  ;;  %v7694_v28 = vpop.f32.mrf.mxu0  ;;  %7982 = vmatprep.subr.bf16.mxu1 %v8656_v4 }
 0xbac   :  { %v3488_v31 = vadd.f32 %v7692_v26, %v3447_v25  ;;  %v7673_v32 = vadd.f32 %v7672_v27, %v7671_v22  ;;  %v7695_v18 = vadd.f32 %v7694_v28, %v7693_v53  ;;  %v7189_v25 = vld [vmem:[%s9191_s13] ss:$0 sm:$0xff] }
 0xbad   :  { %7977 = vmatpush3.bf16.msra.mxu0 %v8257_v15 }
 0xbae   :  { %v3450_v33 = vadd.f32 %v7673_v32, %v3409_v11  ;;  %v3494_v34 = vadd.f32 %v3488_v31, %v8912_v47  ;;  %8006 = vmatprep.subr.bf16.mxu0 %v8656_v4  ;;  %v7190_v11 = vld [vmem:[#allocation14] ss:$0 sm:$0xff] }
 0xbb0   :  { %v3491_v35 = vadd.f32 %v7695_v18, %v3450_v33  ;;  %3498 = vadd.xlane.f32.xlu0 %v3494_v34 }
 0xbb2   :  { %v3495_v36 = vadd.f32 %v3491_v35, %v8914_v48 }
 0xbb4   :  { %3500 = vadd.xlane.f32.xlu1 %v3495_v36 }
 0xc39   :  { %v3499_v40 = vpop.xlane.xlu0 %3498 }
 0xc3a   :  { %v3502_v41 = vmul.f32 0.0078125, %v3499_v40 }
 0xc3c   :  { %v8995_v42 = vsub.f32 %v3494_v34, %v3502_v41 }
 0xc3d   :  { %v3501_v43 = vpop.xlane.xlu1 %3500 }
 0xc3e   :  { %v3503_v44 = vmul.f32 0.0078125, %v3501_v43  ;;  %v3506_v47 = vmul.f32 %v8995_v42, %v8995_v42 }
 0xc40   :  { %v8999_v45 = vsub.f32 %v3495_v36, %v3503_v44  ;;  %3508 = vadd.xlane.f32.xlu0 %v3506_v47  ;;  %v7191_v36 = vld [vmem:[%s9182_s4 + $0x3] sm:$0x7] }
 0xc41   :  { %v3580_v39 = vrot.slane %v7191_v36, %v8814_v55  ;;  %v3576_v44 = vrot.slane %v7191_v36, %v8820_v61  ;;  %v3584_v63 = vrot.slane %v7191_v36, %v8825_v7 }
 0xc42   :  { %v3507_v48 = vmul.f32 %v8999_v45, %v8999_v45 }
 0xc44   :  { %3510 = vadd.xlane.f32.xlu1 %v3507_v48 }
 0xcc9   :  { %v3509_v16 = vpop.xlane.xlu0 %3508 }
 0xcca   :  { %v3512_v17 = vmul.f32 0.0078125, %v3509_v16 }
 0xccc   :  { %v3514_v19 = vadd.f32 1e-05, %v3512_v17 }
 0xccd   :  { %v3511_v20 = vpop.xlane.xlu1 %3510 }
 0xcce   :  { %8418 = vrsqrt.f32 %v3514_v19  ;;  %v3513_v21 = vmul.f32 0.0078125, %v3511_v20 }
 0xcd0   :  { %v3515_v22 = vadd.f32 1e-05, %v3513_v21 }
 0xcd2   :  { %8420 = vrsqrt.f32 %v3515_v22 }
 0xcdb   :  { %v8419_v53 = vpop.eup %8418 }
 0xcdc   :  { %v3518_v24 = vmul.f32 %v8419_v53, %v8995_v42 }
 0xcde   :  { %v3526_v28 = vmul.f32 %v7189_v25, %v3518_v24 }
 0xcdf   :  { %v8421_v26 = vpop.eup %8420 }
 0xce0   :  { %v3519_v27 = vmul.f32 %v8421_v26, %v8999_v45  ;;  %v9016_v32 = vadd.f32 %v7190_v11, %v3526_v28 }
 0xce2   :  { %v3527_v31 = vmul.f32 %v7189_v25, %v3519_v27 }
 0xce4   :  { %v9018_v33 = vadd.f32 %v7190_v11, %v3527_v31 }
 0xce6   :  { %v3536_v18 = vpack.c.bf16 %v9018_v33, %v9016_v32 }
 0xce8   :  { %3749 = vmatmul.mubr.bf16.vlgmr.msra.gmra.mxu1 %v3536_v18  ;;  %7979 = vmatmul.mubr.bf16.vlgmr.msra.gmra.mxu0 %v3536_v18 }
 0xce9   :  { %7984 = vmatprep.mubr.msk.bf16.mxu1 %vm8658_vm0, %v8656_v4  ;;  %8022 = vmatprep.mubr.msk.bf16.mxu0 %vm8658_vm0, %v8656_v4 }
 0xda8   :  { %v3750_v34 = vpop.f32.mrf.mxu1  ;;  %v3793_v35 = vpop.f32.mrf.mxu0 }
 0xda9   :  { %v3751_v49 = vadd.f32 %v3750_v34, %v3576_v44  ;;  %v3794_v10 = vadd.f32 %v3793_v35, %v3584_v63 }
 0xdaa   :  { %v3752_v37 = vpop.f32.mrf.mxu1  ;;  %v7980_v38 = vpop.f32.mrf.mxu0 }
 0xdab   :  { %v3753_v47 = vadd.f32 %v3752_v37, %v3580_v39  ;;  %v3800_v59 = vmul.f32 0.125, %v3751_v49 }
 0xdac   :  { %v3754_v40 = vpop.f32.mrf.mxu1  ;;  %v3796_v41 = vpop.f32.mrf.mxu0 }
 0xdad   :  { %v3755_v48 = vadd.f32 %v3754_v40, %v3576_v44  ;;  %v3797_v0 = vadd.f32 %v3796_v41, %v3584_v63 }
 0xdae   :  { %v3756_v42 = vpop.f32.mrf.mxu1  ;;  %v7981_v43 = vpop.f32.mrf.mxu0 }
 0xdaf   :  { %v3757_v45 = vadd.f32 %v3756_v42, %v3580_v39  ;;  %v3801_v62 = vmul.f32 0.125, %v3755_v48  ;;  %v9034_v2 = vpack.c.bf16 %v3797_v0, %v3794_v10 }
 0xdb1   :  { %v3803_v46 = vpack.c.bf16 %v3757_v45, %v3753_v47  ;;  %v3802_v1 = vpack.c.bf16 %v3801_v62, %v3800_v59 }
 0xdb3   :  { %v3809_v60 = vsel %vm481_vm1, %v3803_v46, 0 }
 0xdb4   :  { %7983 = vmatpush3.bf16.xpose.msra.mxu1 %v3809_v60 }
 0xdb5   :  { %7988 = vmatprep.subr.bf16.mxu1 %v8656_v4 }
 0xdbb   :  { %7985 = vmatmul.mubr.msk.bf16.vlgmr.msra.gmra.mxu1 %vm481_vm1, %v3802_v1 }
 0xdbc   :  { %7989 = vmatpush3.bf16.msra.mxu1 %v9034_v2  ;;  %7990 = vmatprep.mubr.msk.bf16.mxu1 %vm8658_vm0, %v8656_v4 }
 0xdbd   :  { %7994 = vmatprep.subr.bf16.mxu1 %v8656_v4 }
 0xe7b   :  { %v3845_v3 = vpop.f32.mrf.mxu1 }
 0xe7c   :  { %v3852_v54 = vsel %vm8839_vm2, %v3845_v3, -1e+30 }
 0xe7d   :  { %v7986_v5 = vpop.f32.mrf.mxu1  ;;  %v3854_v6 = vsel %vm531_vm3, %v3852_v54, -inf }
 0xe7e   :  { %3855 = vmax.xlane.f32.xlu0 %v3854_v6 }
 0xe7f   :  { %v3848_v8 = vpop.f32.mrf.mxu1 }
 0xe80   :  { %v3853_v9 = vsel %vm8846_vm4, %v3848_v8, -1e+30 }
 0xe81   :  { %v7987_v50 = vpop.f32.mrf.mxu1  ;;  %v3857_v12 = vsel %vm531_vm3, %v3853_v9, -inf }
 0xe82   :  { %3858 = vmax.xlane.f32.xlu1 %v3857_v12  ;;  %v8258_v12 = vld [vmem:[#allocation7 + $0x78] sm:$0xff]  }
 0xe83   :  { %8007 = vmatpush3.bf16.msra.mxu0 %v8258_v12 }
 0xe84   :  { %8008 = vmatprep.subr.bf16.mxu0 %v8656_v4 }
 0xf07   :  { %v3856_v13 = vpop.xlane.xlu0 %3855 }
 0xf08   :  { %v3860_v51 = vsub.f32 %v3852_v54, %v3856_v13  ;;  %v8259_v13 = vld [vmem:[#allocation7 + $0x70] sm:$0xff]  }
 0xf09   :  { %8009 = vmatpush3.bf16.msra.mxu0 %v8259_v13  ;;  %v4307_v13 = vld [vmem:[#allocation8 + $0x6c8] sm:$0xff] }
 0xf0a   :  { %v3862_v15 = vmul.f32 1.442695, %v3860_v51  ;;  %8010 = vmatprep.subr.bf16.mxu0 %v8656_v4  ;;  %v8261_v51 = vld [vmem:[#allocation7 + $0x60] sm:$0xff]  }
 0xf0b   :  { %v3859_v16 = vpop.xlane.xlu1 %3858 }
 0xf0c   :  { %8422 = vpow2.f32 %v3862_v15  ;;  %v3861_v17 = vsub.f32 %v3853_v9, %v3859_v16  ;;  %v8262_v15 = vld [vmem:[#allocation7 + $0x58] sm:$0xff]   ;;  %v8263_v16 = vld [vmem:[#allocation7 + $0x50] sm:$0xff]  }
 0xf0e   :  { %v3864_v19 = vmul.f32 1.442695, %v3861_v17  ;;  %v8264_v17 = vld [vmem:[#allocation7 + $0x48] sm:$0xff]  }
 0xf10   :  { %8424 = vpow2.f32 %v3864_v19  ;;  %v8265_v19 = vld [vmem:[#allocation7 + $0x40] sm:$0xff]  }
 0xf19   :  { %v8423_v20 = vpop.eup %8422 }
 0xf1a   :  { %v3866_v21 = vsel %vm531_vm3, %v8423_v20, 0.0 }
 0xf1b   :  { %3867 = vadd.xlane.f32.xlu0 %v3866_v21 }
 0xf1d   :  { %v8425_v22 = vpop.eup %8424 }
 0xf1e   :  { %v3869_v53 = vsel %vm531_vm3, %v8425_v22, 0.0 }
 0xf1f   :  { %3870 = vadd.xlane.f32.xlu1 %v3869_v53 }
 0xf30   :  { %3922 = vrot.lane.b32.xlu1 %v3802_v1, %s8643_s29 }
 0xf31   :  { %3925 = vrot.lane.b32.xlu0 %v3803_v46, %s8643_s29 }
 0xfa4   :  { %v3868_v24 = vpop.xlane.xlu0 %3867 }
 0xfa5   :  { %8426 = vrcp.f32 %v3868_v24 }
 0xfa8   :  { %v3871_v25 = vpop.xlane.xlu1 %3870  ;;  %v3926_v31 = vpop.permute.xlu0 %3925 }
 0xfa9   :  { %8428 = vrcp.f32 %v3871_v25  ;;  %v3931_v34 = vsel %vm481_vm1, %v3926_v31, 0 }
 0xfac   :  { %v3923_v35 = vpop.permute.xlu1 %3922 }
 0xfb2   :  { %v8427_v26 = vpop.eup %8426 }
 0xfb3   :  { %v3873_v28 = vmul.f32 %v8427_v26, %v8423_v20 }
 0xfb6   :  { %v8429_v27 = vpop.eup %8428 }
 0xfb7   :  { %v3875_v11 = vmul.f32 %v8429_v27, %v8425_v22 }
 0xfb9   :  { %v3876_v18 = vpack.c.bf16 %v3875_v11, %v3873_v28 }
 0xfbb   :  { %7991 = vmatmul.mubr.msk.bf16.vlgmr.msra.gmra.mxu1 %vm531_vm3, %v3876_v18 }
 0xfbc   :  { %7995 = vmatpush3.bf16.xpose.msra.mxu1 %v3931_v34  ;;  %7996 = vmatprep.mubr.msk.bf16.mxu1 %vm8658_vm0, %v8656_v4 }
 0xfbd   :  { %8000 = vmatprep.subr.bf16.mxu1 %v8656_v4 }
 0xfc3   :  { %7997 = vmatmul.mubr.msk.bf16.vlgmr.msra.gmra.mxu1 %vm481_vm1, %v3923_v35 }
 0xfc4   :  { %8002 = vmatprep.mubr.msk.bf16.mxu1 %vm8658_vm0, %v8656_v4 }
0x107b   :  { %v9059_v36 = vpop.f32.mrf.mxu1 }
0x107d   :  { %v7992_v37 = vpop.f32.mrf.mxu1 }
0x107f   :  { %v9061_v38 = vpop.f32.mrf.mxu1 }
0x1081   :  { %v7993_v39 = vpop.f32.mrf.mxu1 }
0x1083   :  { %v3967_v40 = vpop.f32.mrf.mxu1 }
0x1084   :  { %v3974_v41 = vsel %vm8839_vm2, %v3967_v40, -1e+30 }
0x1085   :  { %v7998_v42 = vpop.f32.mrf.mxu1  ;;  %v3976_v43 = vsel %vm531_vm3, %v3974_v41, -inf }
0x1086   :  { %3977 = vmax.xlane.f32.xlu1 %v3976_v43  ;;  %v4338_v42 = vld [vmem:[#allocation8 + $0x7c0] sm:$0xff]  ;;  %v4331_v43 = vld [vmem:[#allocation8 + $0x788] sm:$0xff] }
0x1087   :  { %v3970_v44 = vpop.f32.mrf.mxu1 }
0x1088   :  { %v3975_v47 = vsel %vm8846_vm4, %v3970_v44, -1e+30 }
0x1089   :  { %v7999_v45 = vpop.f32.mrf.mxu1  ;;  %v3979_v48 = vsel %vm531_vm3, %v3975_v47, -inf }
0x108a   :  { %3980 = vmax.xlane.f32.xlu0 %v3979_v48  ;;  %v4339_v45 = vld [vmem:[#allocation8 + $0x7c8] sm:$0xff] }
0x108b   :  { %v7347_v48 = vcombine.low %v4331_v43, %v4339_v45 }
0x110f   :  { %v3978_v46 = vpop.xlane.xlu1 %3977 }
0x1110   :  { %v3982_v49 = vsub.f32 %v3974_v41, %v3978_v46  ;;  %v7348_v46 = vcombine.high %v4331_v43, %v4339_v45  ;;  %v4242_v43 = vld [vmem:[#allocation8 + $0x4c0] sm:$0xff]  ;;  %v4243_v45 = vld [vmem:[#allocation8 + $0x4c8] sm:$0xff] }
0x1112   :  { %v3984_v60 = vmul.f32 1.442695, %v3982_v49 }
0x1113   :  { %v3981_v63 = vpop.xlane.xlu0 %3980 }
0x1114   :  { %8430 = vpow2.f32 %v3984_v60  ;;  %v3983_v62 = vsub.f32 %v3975_v47, %v3981_v63 }
0x1116   :  { %v3986_v23 = vmul.f32 1.442695, %v3983_v62 }
0x1118   :  { %8432 = vpow2.f32 %v3986_v23 }
0x1121   :  { %v8431_v0 = vpop.eup %8430 }
0x1122   :  { %v3988_v59 = vsel %vm531_vm3, %v8431_v0, 0.0 }
0x1123   :  { %3989 = vadd.xlane.f32.xlu0 %v3988_v59  ;;  %v4314_v59 = vld [vmem:[#allocation8 + $0x700] sm:$0xff] }
0x1125   :  { %v8433_v10 = vpop.eup %8432 }
0x1126   :  { %v3991_v29 = vsel %vm531_vm3, %v8433_v10, 0.0 }
0x1127   :  { %3992 = vadd.xlane.f32.xlu1 %v3991_v29  ;;  %v4315_v29 = vld [vmem:[#allocation8 + $0x708] sm:$0xff] }
0x1139   :  { %4000 = vrot.lane.b32.xlu0 %v9034_v2, %s8643_s29  ;;  %v8260_v2 = vld [vmem:[#allocation7 + $0x68] sm:$0xff]  }
0x113a   :  { %8011 = vmatpush3.bf16.msra.mxu0 %v8260_v2 }
0x113b   :  { %8012 = vmatprep.subr.bf16.mxu0 %v8656_v4 }
0x113e   :  { %8013 = vmatpush3.bf16.msra.mxu0 %v8261_v51 }
0x113f   :  { %8014 = vmatprep.subr.bf16.mxu0 %v8656_v4 }
0x1142   :  { %8015 = vmatpush3.bf16.msra.mxu0 %v8262_v15 }
0x1143   :  { %8016 = vmatprep.subr.bf16.mxu0 %v8656_v4 }
0x1146   :  { %8017 = vmatpush3.bf16.msra.mxu0 %v8263_v16  ;;  %v4282_v16 = vld [vmem:[#allocation8 + $0x600] sm:$0xff] }
0x1147   :  { %8018 = vmatprep.subr.bf16.mxu0 %v8656_v4 }
0x114a   :  { %8019 = vmatpush3.bf16.msra.mxu0 %v8264_v17  ;;  %v4290_v17 = vld [vmem:[#allocation8 + $0x640] sm:$0xff] }
0x114b   :  { %8020 = vmatprep.subr.bf16.mxu0 %v8656_v4  ;;  %v7221_v4 = vld [vmem:[%s9184_s6 + $0x1] ss:$0 sm:$0xff] }
0x114e   :  { %8021 = vmatpush3.bf16.msra.mxu0 %v8265_v19  ;;  %v4283_v19 = vld [vmem:[#allocation8 + $0x608] sm:$0xff] }
0x114f   :  { %5114 = vmatprep.subr.bf16.mxu0 %v7348_v46 }
0x11ac   :  { %v3990_v1 = vpop.xlane.xlu0 %3989 }
0x11ad   :  { %8434 = vrcp.f32 %v3990_v1 }
0x11b0   :  { %v3993_v3 = vpop.xlane.xlu1 %3992  ;;  %v4001_v54 = vpop.permute.xlu0 %4000 }
0x11b1   :  { %8436 = vrcp.f32 %v3993_v3  ;;  %8001 = vmatpush3.bf16.msra.mxu1 %v4001_v54  ;;  %v4323_v3 = vld [vmem:[#allocation8 + $0x748] sm:$0xff] }
0x11ba   :  { %v8435_v5 = vpop.eup %8434 }
0x11bb   :  { %v3995_v8 = vmul.f32 %v8435_v5, %v8431_v0  ;;  %v7331_v5 = vcombine.low %v4315_v29, %v4323_v3 }
0x11be   :  { %v8437_v6 = vpop.eup %8436 }
0x11bf   :  { %v3997_v9 = vmul.f32 %v8437_v6, %v8433_v10  ;;  %v4322_v10 = vld [vmem:[#allocation8 + $0x740] sm:$0xff]  ;;  %v7332_v6 = vcombine.high %v4315_v29, %v4323_v3  ;;  %v4340_v3 = vld [vmem:[#allocation8 + $0x7d0] sm:$0xff] }
0x11c0   :  { %v7330_v1 = vcombine.high %v4314_v59, %v4322_v10  ;;  %v7329_v54 = vcombine.low %v4314_v59, %v4322_v10 }
0x11c1   :  { %v3998_v50 = vpack.c.bf16 %v3997_v9, %v3995_v8  ;;  %v4298_v8 = vld [vmem:[#allocation8 + $0x680] sm:$0xff] }
0x11c2   :  { %v4306_v9 = vld [vmem:[#allocation8 + $0x6c0] sm:$0xff] }
0x11c3   :  { %8003 = vmatmul.mubr.msk.bf16.vlgmr.msra.gmra.mxu1 %vm531_vm3, %v3998_v50  ;;  %v4299_v50 = vld [vmem:[#allocation8 + $0x688] sm:$0xff]  ;;  %v7314_v12 = vcombine.high %v4298_v8, %v4306_v9  ;;  %v7313_v2 = vcombine.low %v4298_v8, %v4306_v9  ;;  %v4341_v8 = vld [vmem:[#allocation8 + $0x7d8] sm:$0xff] }
0x11c4   :  { %5103 = vmatprep.mubr.bf16.mxu1 %v8657_v30  ;;  %v7315_v51 = vcombine.low %v4299_v50, %v4307_v13  ;;  %v7316_v15 = vcombine.high %v4299_v50, %v4307_v13 }
0x1283   :  { %v4040_v20 = vpop.f32.mrf.mxu1 }
0x1285   :  { %v8004_v21 = vpop.f32.mrf.mxu1 }
0x1286   :  { %v4291_v21 = vld [vmem:[#allocation8 + $0x648] sm:$0xff] }
0x1287   :  { %v4043_v22 = vpop.f32.mrf.mxu1 }
0x1288   :  { %v8053_v53 = vpack.i.bf16 %v4043_v22, %v4040_v20  ;;  %v7298_v20 = vcombine.high %v4282_v16, %v4290_v17  ;;  %v7297_v22 = vcombine.low %v4282_v16, %v4290_v17 }
0x1289   :  { %v8005_v24 = vpop.f32.mrf.mxu1 }
0x128a   :  { %8054 = vrot.lane.b32.xlu1 %v8053_v53, %s8643_s29  ;;  %v7299_v53 = vcombine.low %v4283_v19, %v4291_v21  ;;  %v7300_v24 = vcombine.high %v4283_v19, %v4291_v21 }
0x12fc   :  { %v8055_v25 = vpop.permute.xlu1 %8054 }
0x12fd   :  { %v8057_v26 = vunpack.i.h.bf16 %v8055_v25  ;;  %v8056_v27 = vunpack.i.l.bf16 %v8055_v25  ;;  %v4266_v25 = vld [vmem:[#allocation8 + $0x580] sm:$0xff] }
0x12ff   :  { %v4056_v28 = vsel %vm481_vm1, %v9061_v38, %v8057_v26  ;;  %v4055_v11 = vsel %vm481_vm1, %v9059_v36, %v8056_v27  ;;  %v4330_v36 = vld [vmem:[#allocation8 + $0x780] sm:$0xff]  ;;  %v4267_v27 = vld [vmem:[#allocation8 + $0x588] sm:$0xff] }
0x1300   :  { %v4057_v31 = vpack.c.bf16 %v4056_v28, %v4055_v11  ;;  %v7345_v44 = vcombine.low %v4330_v36, %v4338_v42  ;;  %v7346_v47 = vcombine.high %v4330_v36, %v4338_v42  ;;  %v4274_v26 = vld [vmem:[#allocation8 + $0x5c0] sm:$0xff]  ;;  %v4275_v11 = vld [vmem:[#allocation8 + $0x5c8] sm:$0xff] }
0x1301   :  { %v7282_v28 = vcombine.high %v4266_v25, %v4274_v26  ;;  %v4234_v42 = vld [vmem:[#allocation8 + $0x480] sm:$0xff] }
0x1302   :  { %8023 = vmatmul.mubr.bf16.vlgmr.msra.gmra.mxu0 %v4057_v31  ;;  %5071 = vmatprep.subr.bf16.mxu1 %v7346_v47  ;;  %v7281_v31 = vcombine.low %v4266_v25, %v4274_v26  ;;  %v7250_v47 = vcombine.high %v4234_v42, %v4242_v43  ;;  %v4316_v26 = vld [vmem:[#allocation8 + $0x710] sm:$0xff] }
0x1303   :  { %5146 = vmatprep.mubr.bf16.mxu0 %v8657_v30  ;;  %5072 = vmatpush1.bf16.msra.mxu1 %v7345_v44  ;;  %v4235_v44 = vld [vmem:[#allocation8 + $0x488] sm:$0xff] }
0x1304   :  { %5115 = vmatpush1.bf16.msra.mxu0 %v7347_v48  ;;  %5073 = vmatprep.subr.bf16.mxu1 %v7330_v1  ;;  %v7249_v48 = vcombine.low %v4234_v42, %v4242_v43  ;;  %v7251_v46 = vcombine.low %v4235_v44, %v4243_v45  ;;  %v4332_v1 = vld [vmem:[#allocation8 + $0x790] sm:$0xff] }
0x1305   :  { %5116 = vmatprep.subr.bf16.mxu0 %v7332_v6  ;;  %v7350_v6 = vcombine.high %v4332_v1, %v4340_v3  ;;  %v4284_v42 = vld [vmem:[#allocation8 + $0x610] sm:$0xff] }
0x1306   :  { %v4292_v43 = vld [vmem:[#allocation8 + $0x650] sm:$0xff] }
0x1307   :  { %5074 = vmatpush1.bf16.msra.mxu1 %v7329_v54  ;;  %v4333_v54 = vld [vmem:[#allocation8 + $0x798] sm:$0xff] }
0x1308   :  { %5117 = vmatpush1.bf16.msra.mxu0 %v7331_v5  ;;  %5075 = vmatprep.subr.bf16.mxu1 %v7314_v12  ;;  %v7349_v5 = vcombine.low %v4332_v1, %v4340_v3  ;;  %v7351_v9 = vcombine.low %v4333_v54, %v4341_v8  ;;  %v7352_v50 = vcombine.high %v4333_v54, %v4341_v8  ;;  %v4252_v1 = vld [vmem:[#allocation8 + $0x510] sm:$0xff]  ;;  %v4253_v54 = vld [vmem:[#allocation8 + $0x518] sm:$0xff] }
0x1309   :  { %5118 = vmatprep.subr.bf16.mxu0 %v7316_v15  ;;  %v4260_v3 = vld [vmem:[#allocation8 + $0x550] sm:$0xff] }
0x130b   :  { %5076 = vmatpush1.bf16.msra.mxu1 %v7313_v2 }
0x130c   :  { %5119 = vmatpush1.bf16.msra.mxu0 %v7315_v51  ;;  %5077 = vmatprep.subr.bf16.mxu1 %v7298_v20  ;;  %v7231_v20 = vld [vmem:[%s9189_s11 + $0x1] ss:$0 sm:$0xff] }
0x130d   :  { %5120 = vmatprep.subr.bf16.mxu0 %v7300_v24  ;;  %v7232_v24 = vld [vmem:[#allocation13 + $0x1] ss:$0 sm:$0xff] }
0x130f   :  { %5078 = vmatpush1.bf16.msra.mxu1 %v7297_v22 }
0x1310   :  { %5121 = vmatpush1.bf16.msra.mxu0 %v7299_v53  ;;  %5079 = vmatprep.subr.bf16.mxu1 %v7282_v28  ;;  %v4317_v28 = vld [vmem:[#allocation8 + $0x718] sm:$0xff] }
0x1313   :  { %5080 = vmatpush1.bf16.msra.mxu1 %v7281_v31 }
0x13c2   :  { %v4165_v18 = vpop.f32.mrf.mxu0 }
0x13c3   :  { %v4166_v34 = vadd.f32 %v7221_v4, %v4165_v18  ;;  %v7284_v18 = vcombine.high %v4267_v27, %v4275_v11 }
0x13c4   :  { %v8024_v35 = vpop.f32.mrf.mxu0 }
0x13c5   :  { %v4172_v37 = vadd.f32 %v4166_v34, %v9016_v32  ;;  %5122 = vmatprep.subr.bf16.mxu0 %v7284_v18  ;;  %v4250_v34 = vld [vmem:[#allocation8 + $0x500] sm:$0xff] }
0x13c6   :  { %v4168_v39 = vpop.f32.mrf.mxu0  ;;  %v4258_v35 = vld [vmem:[#allocation8 + $0x540] sm:$0xff] }
0x13c7   :  { %v4169_v40 = vadd.f32 %v7221_v4, %v4168_v39  ;;  %4178 = vadd.xlane.f32.xlu1 %v4172_v37  ;;  %v7283_v4 = vcombine.low %v4267_v27, %v4275_v11  ;;  %v7266_v39 = vcombine.high %v4250_v34, %v4258_v35  ;;  %v4324_v27 = vld [vmem:[#allocation8 + $0x750] sm:$0xff]  ;;  %v4325_v11 = vld [vmem:[#allocation8 + $0x758] sm:$0xff] }
0x13c8   :  { %v8025_v38 = vpop.f32.mrf.mxu0  ;;  %v7334_v18 = vcombine.high %v4316_v26, %v4324_v27 }
0x13c9   :  { %v4173_v41 = vadd.f32 %v4169_v40, %v9018_v33  ;;  %5123 = vmatpush1.bf16.msra.mxu0 %v7283_v4  ;;  %v4259_v40 = vld [vmem:[#allocation8 + $0x548] sm:$0xff]  ;;  %v7265_v38 = vcombine.low %v4250_v34, %v4258_v35  ;;  %5081 = vmatprep.subr.bf16.mxu1 %v7266_v39  ;;  %v7336_v34 = vcombine.high %v4317_v28, %v4325_v11  ;;  %v4300_v35 = vld [vmem:[#allocation8 + $0x690] sm:$0xff]  ;;  %v4301_v39 = vld [vmem:[#allocation8 + $0x698] sm:$0xff] }
0x13cb   :  { %4180 = vadd.xlane.f32.xlu0 %v4173_v41  ;;  %5082 = vmatpush1.bf16.msra.mxu1 %v7265_v38  ;;  %v7335_v38 = vcombine.low %v4317_v28, %v4325_v11  ;;  %v4334_v28 = vld [vmem:[#allocation8 + $0x7a0] sm:$0xff] }
0x13cc   :  { %5083 = vmatprep.subr.bf16.mxu1 %v7250_v47  ;;  %v4293_v47 = vld [vmem:[#allocation8 + $0x658] sm:$0xff]  ;;  %v4342_v11 = vld [vmem:[#allocation8 + $0x7e0] sm:$0xff] }
0x13cf   :  { %5084 = vmatpush1.bf16.msra.mxu1 %v7249_v48 }
0x1450   :  { %v4179_v32 = vpop.xlane.xlu1 %4178 }
0x1451   :  { %v4182_v49 = vmul.f32 0.0078125, %v4179_v32  ;;  %v7252_v32 = vcombine.high %v4235_v44, %v4243_v45  ;;  %v4285_v44 = vld [vmem:[#allocation8 + $0x618] sm:$0xff] }
0x1453   :  { %v9093_v60 = vsub.f32 %v4172_v37, %v4182_v49  ;;  %v4251_v37 = vld [vmem:[#allocation8 + $0x508] sm:$0xff]  ;;  %v4218_v49 = vld [vmem:[#allocation8 + $0x400] sm:$0xff] }
0x1454   :  { %v4181_v63 = vpop.xlane.xlu0 %4180  ;;  %v7268_v36 = vcombine.high %v4251_v37, %v4259_v40 }
0x1455   :  { %v4183_v62 = vmul.f32 0.0078125, %v4181_v63  ;;  %v4186_v33 = vmul.f32 %v9093_v60, %v9093_v60  ;;  %v4226_v63 = vld [vmem:[#allocation8 + $0x440] sm:$0xff] }
0x1456   :  { %5124 = vmatprep.subr.bf16.mxu0 %v7268_v36  ;;  %v7233_v59 = vcombine.low %v4218_v49, %v4226_v63 }
0x1457   :  { %v9097_v23 = vsub.f32 %v4173_v41, %v4183_v62  ;;  %4188 = vadd.xlane.f32.xlu0 %v4186_v33  ;;  %v7267_v41 = vcombine.low %v4251_v37, %v4259_v40  ;;  %v4219_v62 = vld [vmem:[#allocation8 + $0x408] sm:$0xff]  ;;  %v7234_v33 = vcombine.high %v4218_v49, %v4226_v63  ;;  %v4308_v37 = vld [vmem:[#allocation8 + $0x6d0] sm:$0xff]  ;;  %v7333_v40 = vcombine.low %v4316_v26, %v4324_v27 }
0x1458   :  { %v7317_v45 = vcombine.low %v4300_v35, %v4308_v37  ;;  %v4268_v49 = vld [vmem:[#allocation8 + $0x590] sm:$0xff] }
0x1459   :  { %v4187_v0 = vmul.f32 %v9097_v23, %v9097_v23  ;;  %5125 = vmatpush1.bf16.msra.mxu0 %v7267_v41  ;;  %5085 = vmatprep.subr.bf16.mxu1 %v7234_v33  ;;  %v7318_v41 = vcombine.high %v4300_v35, %v4308_v37  ;;  %v4276_v63 = vld [vmem:[#allocation8 + $0x5d0] sm:$0xff]  ;;  %v4277_v33 = vld [vmem:[#allocation8 + $0x5d8] sm:$0xff] }
0x145a   :  { %5126 = vmatprep.subr.bf16.mxu0 %v7252_v32  ;;  %5086 = vmatpush1.bf16.msra.mxu1 %v7233_v59  ;;  %v7304_v32 = vcombine.high %v4285_v44, %v4293_v47  ;;  %v7303_v59 = vcombine.low %v4285_v44, %v4293_v47 }
0x145b   :  { %4190 = vadd.xlane.f32.xlu1 %v4187_v0  ;;  %v4227_v0 = vld [vmem:[#allocation8 + $0x448] sm:$0xff]  ;;  %5157 = vmatprep.subr.bf16.mxu1 %v7350_v6  ;;  %v7285_v6 = vcombine.low %v4268_v49, %v4276_v63 }
0x145c   :  { %v7235_v10 = vcombine.low %v4219_v62, %v4227_v0  ;;  %v7236_v29 = vcombine.high %v4219_v62, %v4227_v0  ;;  %v4269_v62 = vld [vmem:[#allocation8 + $0x598] sm:$0xff]  ;;  %v7301_v0 = vcombine.low %v4284_v42, %v4292_v43 }
0x145d   :  { %5127 = vmatpush1.bf16.msra.mxu0 %v7251_v46  ;;  %v7302_v46 = vcombine.high %v4284_v42, %v4292_v43  ;;  %v7287_v8 = vcombine.low %v4269_v62, %v4277_v33  ;;  %v7353_v42 = vcombine.low %v4334_v28, %v4342_v11 }
0x145e   :  { %5128 = vmatprep.subr.bf16.mxu0 %v7236_v29  ;;  %v7288_v29 = vcombine.high %v4269_v62, %v4277_v33 }
0x1461   :  { %5129 = vmatpush1.bf16.msra.mxu0 %v7235_v10  ;;  %v7286_v10 = vcombine.high %v4268_v49, %v4276_v63 }
0x1462   :  { %5200 = vmatprep.subr.bf16.mxu0 %v7352_v50 }
0x14e0   :  { %v4189_v12 = vpop.xlane.xlu0 %4188 }
0x14e1   :  { %v4192_v13 = vmul.f32 0.0078125, %v4189_v12  ;;  %v4236_v12 = vld [vmem:[#allocation8 + $0x490] sm:$0xff] }
0x14e3   :  { %v4194_v2 = vadd.f32 1e-05, %v4192_v13  ;;  %v4244_v13 = vld [vmem:[#allocation8 + $0x4d0] sm:$0xff] }
0x14e4   :  { %v4191_v51 = vpop.xlane.xlu1 %4190 }
0x14e5   :  { %8438 = vrsqrt.f32 %v4194_v2  ;;  %v4193_v15 = vmul.f32 0.0078125, %v4191_v51  ;;  %v4237_v2 = vld [vmem:[#allocation8 + $0x498] sm:$0xff] }
0x14e6   :  { %v4245_v51 = vld [vmem:[#allocation8 + $0x4d8] sm:$0xff] }
0x14e7   :  { %v4195_v16 = vadd.f32 1e-05, %v4193_v15  ;;  %v7269_v15 = vcombine.low %v4252_v1, %v4260_v3 }
0x14e9   :  { %8440 = vrsqrt.f32 %v4195_v16 }
0x14f2   :  { %v8439_v17 = vpop.eup %8438 }
0x14f3   :  { %v4198_v19 = vmul.f32 %v8439_v17, %v9093_v60  ;;  %v7254_v17 = vcombine.high %v4236_v12, %v4244_v13 }
0x14f5   :  { %v4206_v22 = vmul.f32 %v7231_v20, %v4198_v19  ;;  %v7256_v19 = vcombine.high %v4237_v2, %v4245_v51 }
0x14f6   :  { %v8441_v21 = vpop.eup %8440 }
0x14f7   :  { %v4199_v53 = vmul.f32 %v8441_v21, %v9097_v23  ;;  %v9106_v31 = vadd.f32 %v7232_v24, %v4206_v22  ;;  %v4309_v23 = vld [vmem:[#allocation8 + $0x6d8] sm:$0xff]  ;;  %v4228_v21 = vld [vmem:[#allocation8 + $0x450] sm:$0xff] }
0x14f8   :  { %v7320_v36 = vcombine.high %v4301_v39, %v4309_v23  ;;  %v7319_v48 = vcombine.low %v4301_v39, %v4309_v23  ;;  %v4221_v22 = vld [vmem:[#allocation8 + $0x418] sm:$0xff]  ;;  %v7354_v39 = vcombine.high %v4334_v28, %v4342_v11 }
0x14f9   :  { %v4207_v25 = vmul.f32 %v7231_v20, %v4199_v53  ;;  %v4220_v20 = vld [vmem:[#allocation8 + $0x410] sm:$0xff]  ;;  %v4229_v53 = vld [vmem:[#allocation8 + $0x458] sm:$0xff] }
0x14fa   :  { %v7238_v26 = vcombine.high %v4220_v20, %v4228_v21  ;;  %v7240_v27 = vcombine.high %v4221_v22, %v4229_v53  ;;  %v7237_v35 = vcombine.low %v4220_v20, %v4228_v21  ;;  %v7239_v37 = vcombine.low %v4221_v22, %v4229_v53 }
0x14fb   :  { %v9108_v4 = vadd.f32 %v7232_v24, %v4207_v25  ;;  %v7253_v24 = vcombine.low %v4236_v12, %v4244_v13  ;;  %v7255_v25 = vcombine.low %v4237_v2, %v4245_v51 }
0x14fd   :  { %v9112_v60 = vpack.c.bf16 %v9108_v4, %v9106_v31 }
0x14ff   :  { %5104 = vmatmul.mubr.bf16.vlgmr.msra.gmra.mxu1 %v9112_v60  ;;  %5147 = vmatmul.mubr.bf16.vlgmr.msra.gmra.mxu0 %v9112_v60 }
0x1500   :  { %5158 = vmatpush1.bf16.msra.mxu1 %v7349_v5  ;;  %5201 = vmatpush1.bf16.msra.mxu0 %v7351_v9  ;;  %v4261_v5 = vld [vmem:[#allocation8 + $0x558] sm:$0xff]  ;;  %v7270_v9 = vcombine.high %v4252_v1, %v4260_v3 }
0x1501   :  { %5159 = vmatprep.subr.bf16.mxu1 %v7334_v18  ;;  %5202 = vmatprep.subr.bf16.mxu0 %v7336_v34  ;;  %v7272_v50 = vcombine.high %v4253_v54, %v4261_v5  ;;  %v7271_v16 = vcombine.low %v4253_v54, %v4261_v5  ;;  %v4335_v18 = vld [vmem:[#allocation8 + $0x7a8] sm:$0xff] }
0x1502   :  { %5189 = vmatprep.mubr.bf16.mxu1 %v8657_v30  ;;  %5232 = vmatprep.mubr.bf16.mxu0 %v8657_v30  ;;  %v4343_v34 = vld [vmem:[#allocation8 + $0x7e8] sm:$0xff] }
0x1503   :  { %v7356_v23 = vcombine.high %v4335_v18, %v4343_v34  ;;  %v7355_v43 = vcombine.low %v4335_v18, %v4343_v34 }
0x1504   :  { %5160 = vmatpush1.bf16.msra.mxu1 %v7333_v40  ;;  %5203 = vmatpush1.bf16.msra.mxu0 %v7335_v38  ;;  %v4318_v40 = vld [vmem:[#allocation8 + $0x720] sm:$0xff] }
0x1505   :  { %5161 = vmatprep.subr.bf16.mxu1 %v7318_v41  ;;  %5204 = vmatprep.subr.bf16.mxu0 %v7320_v36  ;;  %v4326_v38 = vld [vmem:[#allocation8 + $0x760] sm:$0xff]  ;;  %v4319_v41 = vld [vmem:[#allocation8 + $0x728] sm:$0xff] }
0x1506   :  { %v4327_v36 = vld [vmem:[#allocation8 + $0x768] sm:$0xff]  ;;  %v7338_v44 = vcombine.high %v4318_v40, %v4326_v38  ;;  %v7337_v49 = vcombine.low %v4318_v40, %v4326_v38 }
0x1507   :  { %v7340_v47 = vcombine.high %v4319_v41, %v4327_v36  ;;  %v7339_v63 = vcombine.low %v4319_v41, %v4327_v36 }
0x1508   :  { %5162 = vmatpush1.bf16.msra.mxu1 %v7317_v45  ;;  %5205 = vmatpush1.bf16.msra.mxu0 %v7319_v48  ;;  %v4302_v45 = vld [vmem:[#allocation8 + $0x6a0] sm:$0xff] }
0x1509   :  { %5163 = vmatprep.subr.bf16.mxu1 %v7302_v46  ;;  %5206 = vmatprep.subr.bf16.mxu0 %v7304_v32  ;;  %v4310_v48 = vld [vmem:[#allocation8 + $0x6e0] sm:$0xff]  ;;  %v4303_v46 = vld [vmem:[#allocation8 + $0x6a8] sm:$0xff] }
0x150a   :  { %v4311_v32 = vld [vmem:[#allocation8 + $0x6e8] sm:$0xff]  ;;  %v7322_v62 = vcombine.high %v4302_v45, %v4310_v48  ;;  %v7321_v1 = vcombine.low %v4302_v45, %v4310_v48 }
0x150b   :  { %v7324_v33 = vcombine.high %v4303_v46, %v4311_v32  ;;  %v7323_v3 = vcombine.low %v4303_v46, %v4311_v32 }
0x150c   :  { %5164 = vmatpush1.bf16.msra.mxu1 %v7301_v0  ;;  %5207 = vmatpush1.bf16.msra.mxu0 %v7303_v59  ;;  %v4286_v0 = vld [vmem:[#allocation8 + $0x620] sm:$0xff] }
0x150d   :  { %5165 = vmatprep.subr.bf16.mxu1 %v7286_v10  ;;  %5208 = vmatprep.subr.bf16.mxu0 %v7288_v29  ;;  %v4294_v59 = vld [vmem:[#allocation8 + $0x660] sm:$0xff]  ;;  %v4287_v10 = vld [vmem:[#allocation8 + $0x628] sm:$0xff] }
0x150e   :  { %v4295_v29 = vld [vmem:[#allocation8 + $0x668] sm:$0xff]  ;;  %v7306_v54 = vcombine.high %v4286_v0, %v4294_v59  ;;  %v7305_v12 = vcombine.low %v4286_v0, %v4294_v59 }
0x150f   :  { %v7308_v5 = vcombine.high %v4287_v10, %v4295_v29  ;;  %v7307_v13 = vcombine.low %v4287_v10, %v4295_v29 }
0x1510   :  { %5166 = vmatpush1.bf16.msra.mxu1 %v7285_v6  ;;  %5209 = vmatpush1.bf16.msra.mxu0 %v7287_v8  ;;  %v4270_v6 = vld [vmem:[#allocation8 + $0x5a0] sm:$0xff] }
0x1511   :  { %5167 = vmatprep.subr.bf16.mxu1 %v7270_v9  ;;  %5210 = vmatprep.subr.bf16.mxu0 %v7272_v50  ;;  %v4278_v8 = vld [vmem:[#allocation8 + $0x5e0] sm:$0xff]  ;;  %v4271_v9 = vld [vmem:[#allocation8 + $0x5a8] sm:$0xff] }
0x1512   :  { %v4279_v50 = vld [vmem:[#allocation8 + $0x5e8] sm:$0xff]  ;;  %v7290_v2 = vcombine.high %v4270_v6, %v4278_v8  ;;  %v7289_v20 = vcombine.low %v4270_v6, %v4278_v8 }
0x1513   :  { %v7292_v51 = vcombine.high %v4271_v9, %v4279_v50  ;;  %v7291_v21 = vcombine.low %v4271_v9, %v4279_v50 }
0x1514   :  { %5168 = vmatpush1.bf16.msra.mxu1 %v7269_v15  ;;  %5211 = vmatpush1.bf16.msra.mxu0 %v7271_v16  ;;  %v4254_v15 = vld [vmem:[#allocation8 + $0x520] sm:$0xff] }
0x1515   :  { %5169 = vmatprep.subr.bf16.mxu1 %v7254_v17  ;;  %5212 = vmatprep.subr.bf16.mxu0 %v7256_v19  ;;  %v4262_v16 = vld [vmem:[#allocation8 + $0x560] sm:$0xff]  ;;  %v4255_v17 = vld [vmem:[#allocation8 + $0x528] sm:$0xff] }
0x1516   :  { %v4263_v19 = vld [vmem:[#allocation8 + $0x568] sm:$0xff]  ;;  %v7274_v22 = vcombine.high %v4254_v15, %v4262_v16  ;;  %v7273_v28 = vcombine.low %v4254_v15, %v4262_v16 }
0x1517   :  { %v7276_v53 = vcombine.high %v4255_v17, %v4263_v19  ;;  %v7275_v11 = vcombine.low %v4255_v17, %v4263_v19 }
0x1518   :  { %5170 = vmatpush1.bf16.msra.mxu1 %v7253_v24  ;;  %5213 = vmatpush1.bf16.msra.mxu0 %v7255_v25  ;;  %v4238_v24 = vld [vmem:[#allocation8 + $0x4a0] sm:$0xff] }
0x1519   :  { %5171 = vmatprep.subr.bf16.mxu1 %v7238_v26  ;;  %5214 = vmatprep.subr.bf16.mxu0 %v7240_v27  ;;  %v4246_v25 = vld [vmem:[#allocation8 + $0x4e0] sm:$0xff]  ;;  %v4239_v26 = vld [vmem:[#allocation8 + $0x4a8] sm:$0xff] }
0x151a   :  { %v4247_v27 = vld [vmem:[#allocation8 + $0x4e8] sm:$0xff]  ;;  %v7258_v18 = vcombine.high %v4238_v24, %v4246_v25  ;;  %v7257_v40 = vcombine.low %v4238_v24, %v4246_v25 }
0x151b   :  { %v7260_v34 = vcombine.high %v4239_v26, %v4247_v27  ;;  %v7259_v38 = vcombine.low %v4239_v26, %v4247_v27  ;;  %v4256_v27 = vld [vmem:[#allocation8 + $0x530] sm:$0xff] }
0x151c   :  { %5172 = vmatpush1.bf16.msra.mxu1 %v7237_v35  ;;  %5215 = vmatpush1.bf16.msra.mxu0 %v7239_v37  ;;  %v4222_v35 = vld [vmem:[#allocation8 + $0x420] sm:$0xff] }
0x151d   :  { %5243 = vmatprep.subr.bf16.mxu1 %v7354_v39  ;;  %5286 = vmatprep.subr.bf16.mxu0 %v7356_v23  ;;  %v4230_v37 = vld [vmem:[#allocation8 + $0x460] sm:$0xff]  ;;  %v4223_v39 = vld [vmem:[#allocation8 + $0x428] sm:$0xff] }
0x151e   :  { %v4231_v23 = vld [vmem:[#allocation8 + $0x468] sm:$0xff]  ;;  %v7242_v41 = vcombine.high %v4222_v35, %v4230_v37  ;;  %v7241_v45 = vcombine.low %v4222_v35, %v4230_v37 }
0x151f   :  { %5190 = vmatmul.mubr.bf16.vlgmr.msra.gmra.mxu1 %v9112_v60  ;;  %5233 = vmatmul.mubr.bf16.vlgmr.msra.gmra.mxu0 %v9112_v60  ;;  %v7244_v36 = vcombine.high %v4223_v39, %v4231_v23  ;;  %v7243_v48 = vcombine.low %v4223_v39, %v4231_v23  ;;  %v4240_v23 = vld [vmem:[#allocation8 + $0x4b0] sm:$0xff] }
0x1520   :  { %5244 = vmatpush1.bf16.msra.mxu1 %v7353_v42  ;;  %5287 = vmatpush1.bf16.msra.mxu0 %v7355_v43  ;;  %v4336_v42 = vld [vmem:[#allocation8 + $0x7b0] sm:$0xff] }
0x1521   :  { %5245 = vmatprep.subr.bf16.mxu1 %v7338_v44  ;;  %5288 = vmatprep.subr.bf16.mxu0 %v7340_v47  ;;  %v4344_v43 = vld [vmem:[#allocation8 + $0x7f0] sm:$0xff]  ;;  %v4337_v44 = vld [vmem:[#allocation8 + $0x7b8] sm:$0xff] }
0x1522   :  { %5275 = vmatprep.mubr.bf16.mxu1 %v8657_v30  ;;  %5318 = vmatprep.mubr.bf16.mxu0 %v8657_v30  ;;  %v4345_v47 = vld [vmem:[#allocation8 + $0x7f8] sm:$0xff]  ;;  %v7358_v46 = vcombine.high %v4336_v42, %v4344_v43  ;;  %v7357_v0 = vcombine.low %v4336_v42, %v4344_v43 }
0x1523   :  { %v7360_v32 = vcombine.high %v4337_v44, %v4345_v47  ;;  %v7359_v59 = vcombine.low %v4337_v44, %v4345_v47  ;;  %v4224_v47 = vld [vmem:[#allocation8 + $0x430] sm:$0xff] }
0x1524   :  { %5246 = vmatpush1.bf16.msra.mxu1 %v7337_v49  ;;  %5289 = vmatpush1.bf16.msra.mxu0 %v7339_v63  ;;  %v4320_v49 = vld [vmem:[#allocation8 + $0x730] sm:$0xff] }
0x1525   :  { %5247 = vmatprep.subr.bf16.mxu1 %v7322_v62  ;;  %5290 = vmatprep.subr.bf16.mxu0 %v7324_v33  ;;  %v4328_v63 = vld [vmem:[#allocation8 + $0x770] sm:$0xff]  ;;  %v4321_v62 = vld [vmem:[#allocation8 + $0x738] sm:$0xff] }
0x1526   :  { %v4329_v33 = vld [vmem:[#allocation8 + $0x778] sm:$0xff]  ;;  %v7342_v10 = vcombine.high %v4320_v49, %v4328_v63  ;;  %v7341_v6 = vcombine.low %v4320_v49, %v4328_v63 }
0x1527   :  { %v7344_v29 = vcombine.high %v4321_v62, %v4329_v33  ;;  %v7343_v8 = vcombine.low %v4321_v62, %v4329_v33 }
0x1528   :  { %5248 = vmatpush1.bf16.msra.mxu1 %v7321_v1  ;;  %5291 = vmatpush1.bf16.msra.mxu0 %v7323_v3  ;;  %v4304_v1 = vld [vmem:[#allocation8 + $0x6b0] sm:$0xff] }
0x1529   :  { %5249 = vmatprep.subr.bf16.mxu1 %v7306_v54  ;;  %5292 = vmatprep.subr.bf16.mxu0 %v7308_v5  ;;  %v4312_v3 = vld [vmem:[#allocation8 + $0x6f0] sm:$0xff]  ;;  %v4305_v54 = vld [vmem:[#allocation8 + $0x6b8] sm:$0xff] }
0x152a   :  { %v4313_v5 = vld [vmem:[#allocation8 + $0x6f8] sm:$0xff]  ;;  %v7326_v9 = vcombine.high %v4304_v1, %v4312_v3  ;;  %v7325_v15 = vcombine.low %v4304_v1, %v4312_v3  ;;  %v8270_v3 = vld [vmem:[#allocation11 + $0x470] sm:$0xff]  }
0x152b   :  { %v7328_v50 = vcombine.high %v4305_v54, %v4313_v5  ;;  %v7327_v16 = vcombine.low %v4305_v54, %v4313_v5  ;;  %v8269_v1 = vld [vmem:[#allocation11 + $0x4b8] sm:$0xff]   ;;  %v8271_v54 = vld [vmem:[#allocation11 + $0x4f0] sm:$0xff]  }
0x152c   :  { %5250 = vmatpush1.bf16.msra.mxu1 %v7305_v12  ;;  %5293 = vmatpush1.bf16.msra.mxu0 %v7307_v13  ;;  %v4288_v12 = vld [vmem:[#allocation8 + $0x630] sm:$0xff] }
0x152d   :  { %5251 = vmatprep.subr.bf16.mxu1 %v7290_v2  ;;  %5294 = vmatprep.subr.bf16.mxu0 %v7292_v51  ;;  %v4296_v13 = vld [vmem:[#allocation8 + $0x670] sm:$0xff]  ;;  %v4289_v2 = vld [vmem:[#allocation8 + $0x638] sm:$0xff] }
0x152e   :  { %v4297_v51 = vld [vmem:[#allocation8 + $0x678] sm:$0xff]  ;;  %v7310_v17 = vcombine.high %v4288_v12, %v4296_v13  ;;  %v7309_v24 = vcombine.low %v4288_v12, %v4296_v13  ;;  %v8272_v5 = vld [vmem:[#allocation11 + $0x430] sm:$0xff]   ;;  %v8277_v12 = vld [vmem:[#allocation11 + $0x4a8] sm:$0xff]  }
0x152f   :  { %v7312_v19 = vcombine.high %v4289_v2, %v4297_v51  ;;  %v7311_v25 = vcombine.low %v4289_v2, %v4297_v51  ;;  %v8278_v13 = vld [vmem:[#allocation11 + $0x460] sm:$0xff]  }
0x1530   :  { %5252 = vmatpush1.bf16.msra.mxu1 %v7289_v20  ;;  %5295 = vmatpush1.bf16.msra.mxu0 %v7291_v21  ;;  %v4272_v20 = vld [vmem:[#allocation8 + $0x5b0] sm:$0xff]  ;;  %v8279_v2 = vld [vmem:[#allocation11 + $0x4e0] sm:$0xff]  }
0x1531   :  { %5253 = vmatprep.subr.bf16.mxu1 %v7274_v22  ;;  %5296 = vmatprep.subr.bf16.mxu0 %v7276_v53  ;;  %v4280_v21 = vld [vmem:[#allocation8 + $0x5f0] sm:$0xff]  ;;  %v4273_v22 = vld [vmem:[#allocation8 + $0x5b8] sm:$0xff]  ;;  %v8280_v51 = vld [vmem:[#allocation11 + $0x420] sm:$0xff]  }
0x1532   :  { %v4281_v53 = vld [vmem:[#allocation8 + $0x5f8] sm:$0xff]  ;;  %v7294_v26 = vcombine.high %v4272_v20, %v4280_v21 }
0x1533   :  { %v7295_v35 = vcombine.low %v4273_v22, %v4281_v53 }
0x1534   :  { %5254 = vmatpush1.bf16.msra.mxu1 %v7273_v28  ;;  %5297 = vmatpush1.bf16.msra.mxu0 %v7275_v11  ;;  %v4264_v28 = vld [vmem:[#allocation8 + $0x570] sm:$0xff]  ;;  %v4257_v11 = vld [vmem:[#allocation8 + $0x538] sm:$0xff] }
0x1535   :  { %5255 = vmatprep.subr.bf16.mxu1 %v7258_v18  ;;  %5298 = vmatprep.subr.bf16.mxu0 %v7260_v34  ;;  %v4265_v18 = vld [vmem:[#allocation8 + $0x578] sm:$0xff]  ;;  %v7293_v34 = vcombine.low %v4272_v20, %v4280_v21  ;;  %v7278_v37 = vcombine.high %v4256_v27, %v4264_v28  ;;  %v8286_v20 = vld [vmem:[#allocation11 + $0x450] sm:$0xff]  }
0x1536   :  { %v7280_v39 = vcombine.high %v4257_v11, %v4265_v18  ;;  %v7279_v42 = vcombine.low %v4257_v11, %v4265_v18  ;;  %v8287_v21 = vld [vmem:[#allocation11 + $0x4d0] sm:$0xff]   ;;  %v8296_v11 = vld [vmem:[#allocation11 + $0x400] sm:$0xff]  }
0x1537   :  { %v8297_v18 = vld [vmem:[#allocation11 + $0x480] sm:$0xff]  }
0x1538   :  { %5256 = vmatpush1.bf16.msra.mxu1 %v7257_v40  ;;  %5299 = vmatpush1.bf16.msra.mxu0 %v7259_v38  ;;  %v4248_v40 = vld [vmem:[#allocation8 + $0x4f0] sm:$0xff]  ;;  %v4241_v38 = vld [vmem:[#allocation8 + $0x4b8] sm:$0xff] }
0x1539   :  { %5257 = vmatprep.subr.bf16.mxu1 %v7242_v41  ;;  %5300 = vmatprep.subr.bf16.mxu0 %v7244_v36  ;;  %v4249_v41 = vld [vmem:[#allocation8 + $0x4f8] sm:$0xff]  ;;  %v7277_v36 = vcombine.low %v4256_v27, %v4264_v28  ;;  %v7262_v43 = vcombine.high %v4240_v23, %v4248_v40  ;;  %v8294_v27 = vld [vmem:[#allocation11 + $0x440] sm:$0xff]  }
0x153a   :  { %v7264_v44 = vcombine.high %v4241_v38, %v4249_v41  ;;  %v7263_v49 = vcombine.low %v4241_v38, %v4249_v41  ;;  %v8295_v28 = vld [vmem:[#allocation11 + $0x4c0] sm:$0xff]  }
0x153c   :  { %5258 = vmatpush1.bf16.msra.mxu1 %v7241_v45  ;;  %5301 = vmatpush1.bf16.msra.mxu0 %v7243_v48  ;;  %v4232_v45 = vld [vmem:[#allocation8 + $0x470] sm:$0xff]  ;;  %v4225_v48 = vld [vmem:[#allocation8 + $0x438] sm:$0xff] }
0x153d   :  { %5329 = vmatprep.subr.bf16.mxu1 %v7358_v46  ;;  %5372 = vmatprep.subr.bf16.mxu0 %v7360_v32  ;;  %v4233_v46 = vld [vmem:[#allocation8 + $0x478] sm:$0xff]  ;;  %v7261_v32 = vcombine.low %v4240_v23, %v4248_v40  ;;  %v7246_v63 = vcombine.high %v4224_v47, %v4232_v45  ;;  %v7245_v33 = vcombine.low %v4224_v47, %v4232_v45 }
0x153e   :  { %v7248_v62 = vcombine.high %v4225_v48, %v4233_v46 }
0x153f   :  { %5276 = vmatmul.mubr.bf16.vlgmr.msra.gmra.mxu1 %v9112_v60  ;;  %5319 = vmatmul.mubr.bf16.vlgmr.msra.gmra.mxu0 %v9112_v60 }
0x1540   :  { %5330 = vmatpush1.bf16.msra.mxu1 %v7357_v0  ;;  %5373 = vmatpush1.bf16.msra.mxu0 %v7359_v59  ;;  %v7247_v0 = vcombine.low %v4225_v48, %v4233_v46  ;;  %v8266_v59 = vld [vmem:[#allocation11 + $0x478] sm:$0xff]  }
0x1541   :  { %5331 = vmatprep.subr.bf16.mxu1 %v7342_v10  ;;  %5374 = vmatprep.subr.bf16.mxu0 %v7344_v29  ;;  %v8267_v10 = vld [vmem:[#allocation11 + $0x4f8] sm:$0xff]  }
0x1542   :  { %5361 = vmatprep.mubr.bf16.mxu1 %v8657_v30  ;;  %5404 = vmatprep.mubr.bf16.mxu0 %v8657_v30  ;;  %v7296_v30 = vcombine.high %v4273_v22, %v4281_v53  ;;  %v8268_v29 = vld [vmem:[#allocation11 + $0x438] sm:$0xff]   ;;  %v8288_v22 = vld [vmem:[#allocation11 + $0x410] sm:$0xff]  }
0x1543   :  { %v8289_v53 = vld [vmem:[#allocation11 + $0x490] sm:$0xff]  }
0x1544   :  { %5332 = vmatpush1.bf16.msra.mxu1 %v7341_v6  ;;  %5375 = vmatpush1.bf16.msra.mxu0 %v7343_v8  ;;  %v8273_v6 = vld [vmem:[#allocation11 + $0x4b0] sm:$0xff]   ;;  %v8274_v8 = vld [vmem:[#allocation11 + $0x468] sm:$0xff]  }
0x1545   :  { %5333 = vmatprep.subr.bf16.mxu1 %v7326_v9  ;;  %5376 = vmatprep.subr.bf16.mxu0 %v7328_v50  ;;  %v8275_v9 = vld [vmem:[#allocation11 + $0x4e8] sm:$0xff]  }
0x1546   :  { %v8276_v50 = vld [vmem:[#allocation11 + $0x428] sm:$0xff]  }
0x1548   :  { %5334 = vmatpush1.bf16.msra.mxu1 %v7325_v15  ;;  %5377 = vmatpush1.bf16.msra.mxu0 %v7327_v16  ;;  %v8282_v15 = vld [vmem:[#allocation11 + $0x458] sm:$0xff]  }
0x1549   :  { %5335 = vmatprep.subr.bf16.mxu1 %v7310_v17  ;;  %5378 = vmatprep.subr.bf16.mxu0 %v7312_v19  ;;  %v8283_v16 = vld [vmem:[#allocation11 + $0x4d8] sm:$0xff]  }
0x154a   :  { %v8284_v17 = vld [vmem:[#allocation11 + $0x418] sm:$0xff]  }
0x154b   :  { %v8285_v19 = vld [vmem:[#allocation11 + $0x498] sm:$0xff]  }
0x154c   :  { %5336 = vmatpush1.bf16.msra.mxu1 %v7309_v24  ;;  %5379 = vmatpush1.bf16.msra.mxu0 %v7311_v25  ;;  %v8290_v24 = vld [vmem:[#allocation11 + $0x448] sm:$0xff]  }
0x154d   :  { %5337 = vmatprep.subr.bf16.mxu1 %v7294_v26  ;;  %5380 = vmatprep.subr.bf16.mxu0 %v7296_v30  ;;  %v8291_v25 = vld [vmem:[#allocation11 + $0x4c8] sm:$0xff]  }
0x154e   :  { %v8292_v26 = vld [vmem:[#allocation11 + $0x408] sm:$0xff]  }
0x154f   :  { %v8293_v30 = vld [vmem:[#allocation11 + $0x488] sm:$0xff]  }
0x1550   :  { %5338 = vmatpush1.bf16.msra.mxu1 %v7293_v34  ;;  %5381 = vmatpush1.bf16.msra.mxu0 %v7295_v35  ;;  %v8298_v34 = vld [vmem:[#allocation11 + $0x578] sm:$0xff]  }
0x1551   :  { %5339 = vmatprep.subr.bf16.mxu1 %v7278_v37  ;;  %5382 = vmatprep.subr.bf16.mxu0 %v7280_v39  ;;  %v8299_v35 = vld [vmem:[#allocation11 + $0x5f8] sm:$0xff]   ;;  %v9128_v37 = vld [vmem:[#allocation10 + $0x10] sm:$0xff] }
0x1552   :  { %v4358_v40 = vrot.slane %v9128_v37, %v8814_v55  ;;  %v4366_v38 = vrot.slane %v9128_v37, %v8935_v52  ;;  %v4354_v41 = vrot.slane %v9128_v37, %v8820_v61 }
0x1554   :  { %5340 = vmatpush1.bf16.msra.mxu1 %v7277_v36  ;;  %5383 = vmatpush1.bf16.msra.mxu0 %v7279_v42  ;;  %v4362_v36 = vrot.slane %v9128_v37, %v8825_v7 }
0x1555   :  { %5341 = vmatprep.subr.bf16.mxu1 %v7262_v43  ;;  %5384 = vmatprep.subr.bf16.mxu0 %v7264_v44 }
0x1558   :  { %5342 = vmatpush1.bf16.msra.mxu1 %v7261_v32  ;;  %5385 = vmatpush1.bf16.msra.mxu0 %v7263_v49 }
0x1559   :  { %5343 = vmatprep.subr.bf16.mxu1 %v7246_v63  ;;  %5386 = vmatprep.subr.bf16.mxu0 %v7248_v62 }
0x155c   :  { %5344 = vmatpush1.bf16.msra.mxu1 %v7245_v33  ;;  %5387 = vmatpush1.bf16.msra.mxu0 %v7247_v0 }
0x155d   :  { %7722 = vmatprep.subr.bf16.mxu1 %v8266_v59  ;;  %7744 = vmatprep.subr.bf16.mxu0 %v8267_v10 }
0x155f   :  { %5362 = vmatmul.mubr.bf16.vlgmr.msra.gmra.mxu1 %v9112_v60  ;;  %5405 = vmatmul.mubr.bf16.vlgmr.msra.gmra.mxu0 %v9112_v60  ;;  %v8281_v60 = vld [vmem:[#allocation11 + $0x4a0] sm:$0xff]  }
0x1560   :  { %7723 = vmatpush3.bf16.msra.mxu1 %v8268_v29  ;;  %7745 = vmatpush3.bf16.msra.mxu0 %v8269_v1 }
0x1561   :  { %7724 = vmatprep.subr.bf16.mxu1 %v8270_v3  ;;  %7746 = vmatprep.subr.bf16.mxu0 %v8271_v54 }
0x1564   :  { %7725 = vmatpush3.bf16.msra.mxu1 %v8272_v5  ;;  %7747 = vmatpush3.bf16.msra.mxu0 %v8273_v6 }
0x1565   :  { %7726 = vmatprep.subr.bf16.mxu1 %v8274_v8  ;;  %7748 = vmatprep.subr.bf16.mxu0 %v8275_v9 }
0x1568   :  { %7727 = vmatpush3.bf16.msra.mxu1 %v8276_v50  ;;  %7749 = vmatpush3.bf16.msra.mxu0 %v8277_v12  ;;  %v8300_v12 = vld [vmem:[#allocation11 + $0x538] sm:$0xff]  }
0x1569   :  { %7728 = vmatprep.subr.bf16.mxu1 %v8278_v13  ;;  %7750 = vmatprep.subr.bf16.mxu0 %v8279_v2  ;;  %v8301_v13 = vld [vmem:[#allocation11 + $0x5b8] sm:$0xff]  }
0x156c   :  { %7729 = vmatpush3.bf16.msra.mxu1 %v8280_v51  ;;  %7751 = vmatpush3.bf16.msra.mxu0 %v8281_v60  ;;  %v8302_v60 = vld [vmem:[#allocation11 + $0x570] sm:$0xff]  }
0x156d   :  { %7730 = vmatprep.subr.bf16.mxu1 %v8282_v15  ;;  %7752 = vmatprep.subr.bf16.mxu0 %v8283_v16  ;;  %v8303_v15 = vld [vmem:[#allocation11 + $0x5f0] sm:$0xff]  }
0x156e   :  { %v8304_v16 = vld [vmem:[#allocation11 + $0x530] sm:$0xff]  }
0x1570   :  { %7731 = vmatpush3.bf16.msra.mxu1 %v8284_v17  ;;  %7753 = vmatpush3.bf16.msra.mxu0 %v8285_v19  ;;  %v8305_v17 = vld [vmem:[#allocation11 + $0x5b0] sm:$0xff]   ;;  %v8306_v19 = vld [vmem:[#allocation11 + $0x568] sm:$0xff]  }
0x1571   :  { %7732 = vmatprep.subr.bf16.mxu1 %v8286_v20  ;;  %7754 = vmatprep.subr.bf16.mxu0 %v8287_v21  ;;  %v8307_v20 = vld [vmem:[#allocation11 + $0x5e8] sm:$0xff]  }
0x1572   :  { %v8308_v21 = vld [vmem:[#allocation11 + $0x528] sm:$0xff]  }
0x1574   :  { %7733 = vmatpush3.bf16.msra.mxu1 %v8288_v22  ;;  %7755 = vmatpush3.bf16.msra.mxu0 %v8289_v53  ;;  %v8309_v22 = vld [vmem:[#allocation11 + $0x5a8] sm:$0xff]   ;;  %v8310_v53 = vld [vmem:[#allocation11 + $0x560] sm:$0xff]  }
0x1575   :  { %7734 = vmatprep.subr.bf16.mxu1 %v8290_v24  ;;  %7756 = vmatprep.subr.bf16.mxu0 %v8291_v25  ;;  %v8311_v24 = vld [vmem:[#allocation11 + $0x5e0] sm:$0xff]  }
0x1576   :  { %v8312_v25 = vld [vmem:[#allocation11 + $0x520] sm:$0xff]  }
0x1578   :  { %7735 = vmatpush3.bf16.msra.mxu1 %v8292_v26  ;;  %7757 = vmatpush3.bf16.msra.mxu0 %v8293_v30  ;;  %v8313_v26 = vld [vmem:[#allocation11 + $0x5a0] sm:$0xff]   ;;  %v8314_v30 = vld [vmem:[#allocation11 + $0x558] sm:$0xff]  }
0x1579   :  { %7736 = vmatprep.subr.bf16.mxu1 %v8294_v27  ;;  %7758 = vmatprep.subr.bf16.mxu0 %v8295_v28  ;;  %v8315_v27 = vld [vmem:[#allocation11 + $0x5d8] sm:$0xff]  }
0x157a   :  { %v8316_v28 = vld [vmem:[#allocation11 + $0x518] sm:$0xff]  }
0x157c   :  { %7737 = vmatpush3.bf16.msra.mxu1 %v8296_v11  ;;  %7759 = vmatpush3.bf16.msra.mxu0 %v8297_v18  ;;  %v8317_v11 = vld [vmem:[#allocation11 + $0x598] sm:$0xff]   ;;  %v8318_v18 = vld [vmem:[#allocation11 + $0x550] sm:$0xff]  }
0x157d   :  { %7766 = vmatprep.subr.bf16.mxu1 %v8298_v34  ;;  %7788 = vmatprep.subr.bf16.mxu0 %v8299_v35  ;;  %v8319_v34 = vld [vmem:[#allocation11 + $0x5d0] sm:$0xff]  }
0x157e   :  { %v8320_v35 = vld [vmem:[#allocation11 + $0x510] sm:$0xff]  }
0x15bf   :  { %v5105_v39 = vpop.f32.mrf.mxu1  ;;  %v5148_v23 = vpop.f32.mrf.mxu0 }
0x15c0   :  { %v5106_v49 = vadd.f32 %v5105_v39, %v4354_v41  ;;  %v5149_v63 = vadd.f32 %v5148_v23, %v4362_v36  ;;  %v8321_v39 = vld [vmem:[#allocation11 + $0x590] sm:$0xff]  }
0x15c1   :  { %v5107_v42 = vpop.f32.mrf.mxu1  ;;  %v5150_v43 = vpop.f32.mrf.mxu0 }
0x15c2   :  { %v5108_v45 = vadd.f32 %v5107_v42, %v4358_v40  ;;  %v5151_v48 = vadd.f32 %v5150_v43, %v4366_v38  ;;  %v5415_v6 = vmax.f32 %v5106_v49, 0.0  ;;  %v5417_v8 = vmax.f32 %v5149_v63, 0.0  ;;  %v8326_v63 = vld [vmem:[#allocation11 + $0x540] sm:$0xff]  }
0x15c3   :  { %v5109_v44 = vpop.f32.mrf.mxu1  ;;  %v5152_v47 = vpop.f32.mrf.mxu0  ;;  %v4382_v42 = vrot.slane %v9128_v37, %v8951_v57  ;;  %v4370_v43 = vrot.slane %v9128_v37, %v8954_v14 }
0x15c4   :  { %v5110_v46 = vadd.f32 %v5109_v44, %v4354_v41  ;;  %v5153_v32 = vadd.f32 %v5152_v47, %v4362_v36  ;;  %v5416_v1 = vmax.f32 %v5108_v45, 0.0  ;;  %v5418_v3 = vmax.f32 %v5151_v48, 0.0  ;;  %v8323_v41 = vld [vmem:[#allocation11 + $0x5c8] sm:$0xff]  }
0x15c5   :  { %v5111_v62 = vpop.f32.mrf.mxu1  ;;  %v5154_v33 = vpop.f32.mrf.mxu0  ;;  %v4374_v36 = vrot.slane %v9128_v37, %v8948_v56  ;;  %v4378_v44 = vrot.slane %v9128_v37, %v8957_v58  ;;  %v8324_v48 = vld [vmem:[#allocation11 + $0x508] sm:$0xff]  }
0x15c6   :  { %v5112_v0 = vadd.f32 %v5111_v62, %v4358_v40  ;;  %v5155_v59 = vadd.f32 %v5154_v33, %v4366_v38  ;;  %v5431_v10 = vmax.f32 %v5110_v46, 0.0  ;;  %v5433_v29 = vmax.f32 %v5153_v32, 0.0  ;;  %v8322_v38 = vld [vmem:[#allocation11 + $0x548] sm:$0xff]   ;;  %v8327_v62 = vld [vmem:[#allocation11 + $0x5c0] sm:$0xff]  }
0x15c7   :  { %v8325_v46 = vld [vmem:[#allocation11 + $0x588] sm:$0xff]  }
0x15c8   :  { %v5432_v54 = vmax.f32 %v5112_v0, 0.0  ;;  %v5434_v5 = vmax.f32 %v5155_v59, 0.0  ;;  %v5447_v2 = vpack.c.bf16 %v5431_v10, %v5415_v6  ;;  %v5449_v51 = vpack.c.bf16 %v5433_v29, %v5417_v8  ;;  %v8328_v6 = vld [vmem:[#allocation11 + $0x500] sm:$0xff]  }
0x15c9   :  { %v8329_v8 = vld [vmem:[#allocation11 + $0x580] sm:$0xff]  }
0x15ca   :  { %v5448_v9 = vpack.c.bf16 %v5432_v54, %v5416_v1  ;;  %v5450_v50 = vpack.c.bf16 %v5434_v5, %v5418_v3 }
0x15cc   :  { %6528 = vmatprep.mubr.bf16.mxu1 %v5448_v9  ;;  %6569 = vmatprep.mubr.bf16.mxu0 %v5450_v50 }
0x15cd   :  { %6529 = vmatmul.mubr.bf16.vlgmr.msra.gmra.mxu1 %v5447_v2  ;;  %6570 = vmatmul.mubr.bf16.vlgmr.msra.gmra.mxu0 %v5449_v51 }
0x15ce   :  { %7767 = vmatpush3.bf16.msra.mxu1 %v8300_v12  ;;  %7789 = vmatpush3.bf16.msra.mxu0 %v8301_v13  ;;  %v8330_v12 = vld [vmem:[#allocation11 + $0x678] sm:$0xff]  }
0x15cf   :  { %7768 = vmatprep.subr.bf16.mxu1 %v8302_v60  ;;  %7790 = vmatprep.subr.bf16.mxu0 %v8303_v15  ;;  %v8331_v13 = vld [vmem:[#allocation11 + $0x6f8] sm:$0xff]  }
0x15d2   :  { %7769 = vmatpush3.bf16.msra.mxu1 %v8304_v16  ;;  %7791 = vmatpush3.bf16.msra.mxu0 %v8305_v17 }
0x15d3   :  { %7770 = vmatprep.subr.bf16.mxu1 %v8306_v19  ;;  %7792 = vmatprep.subr.bf16.mxu0 %v8307_v20 }
0x15d6   :  { %7771 = vmatpush3.bf16.msra.mxu1 %v8308_v21  ;;  %7793 = vmatpush3.bf16.msra.mxu0 %v8309_v22  ;;  %v8332_v21 = vld [vmem:[#allocation11 + $0x638] sm:$0xff]  }
0x15d7   :  { %7772 = vmatprep.subr.bf16.mxu1 %v8310_v53  ;;  %7794 = vmatprep.subr.bf16.mxu0 %v8311_v24  ;;  %v8333_v22 = vld [vmem:[#allocation11 + $0x6b8] sm:$0xff]  }
0x15da   :  { %7773 = vmatpush3.bf16.msra.mxu1 %v8312_v25  ;;  %7795 = vmatpush3.bf16.msra.mxu0 %v8313_v26  ;;  %v8334_v25 = vld [vmem:[#allocation11 + $0x670] sm:$0xff]  }
0x15db   :  { %7774 = vmatprep.subr.bf16.mxu1 %v8314_v30  ;;  %7796 = vmatprep.subr.bf16.mxu0 %v8315_v27  ;;  %v8335_v26 = vld [vmem:[#allocation11 + $0x6f0] sm:$0xff]  }
0x15dc   :  { %v8336_v30 = vld [vmem:[#allocation11 + $0x630] sm:$0xff]  }
0x15dd   :  { %v8337_v27 = vld [vmem:[#allocation11 + $0x6b0] sm:$0xff]  }
0x15de   :  { %7775 = vmatpush3.bf16.msra.mxu1 %v8316_v28  ;;  %7797 = vmatpush3.bf16.msra.mxu0 %v8317_v11  ;;  %v8338_v28 = vld [vmem:[#allocation11 + $0x668] sm:$0xff]  }
0x15df   :  { %v5191_v23 = vpop.f32.mrf.mxu1  ;;  %v5234_v40 = vpop.f32.mrf.mxu0  ;;  %7776 = vmatprep.subr.bf16.mxu1 %v8318_v18  ;;  %7798 = vmatprep.subr.bf16.mxu0 %v8319_v34  ;;  %v8339_v11 = vld [vmem:[#allocation11 + $0x6e8] sm:$0xff]  }
0x15e0   :  { %v5192_v29 = vadd.f32 %v5191_v23, %v4370_v43  ;;  %v5235_v1 = vadd.f32 %v5234_v40, %v4378_v44  ;;  %v8340_v18 = vld [vmem:[#allocation11 + $0x628] sm:$0xff]   ;;  %v8344_v23 = vld [vmem:[#allocation11 + $0x620] sm:$0xff]  }
0x15e1   :  { %v5193_v47 = vpop.f32.mrf.mxu1  ;;  %v5236_v45 = vpop.f32.mrf.mxu0  ;;  %v8341_v34 = vld [vmem:[#allocation11 + $0x6a8] sm:$0xff]   ;;  %v8345_v40 = vld [vmem:[#allocation11 + $0x6a0] sm:$0xff]  }
0x15e2   :  { %7777 = vmatpush3.bf16.msra.mxu1 %v8320_v35  ;;  %7799 = vmatpush3.bf16.msra.mxu0 %v8321_v39  ;;  %v5194_v33 = vadd.f32 %v5193_v47, %v4374_v36  ;;  %v5237_v0 = vadd.f32 %v5236_v45, %v4382_v42  ;;  %v5419_v16 = vmax.f32 %v5192_v29, 0.0  ;;  %v5421_v17 = vmax.f32 %v5235_v1, 0.0  ;;  %v8342_v35 = vld [vmem:[#allocation11 + $0x660] sm:$0xff]   ;;  %v9146_v47 = vld [vmem:[#allocation10 + $0x18] sm:$0xff]  ;;  %v8352_v45 = vld [vmem:[#allocation11 + $0x610] sm:$0xff]  }
0x15e3   :  { %v5195_v32 = vpop.f32.mrf.mxu1  ;;  %v5238_v49 = vpop.f32.mrf.mxu0  ;;  %7778 = vmatprep.subr.bf16.mxu1 %v8322_v38  ;;  %7800 = vmatprep.subr.bf16.mxu0 %v8323_v41  ;;  %v8343_v39 = vld [vmem:[#allocation11 + $0x6e0] sm:$0xff]   ;;  %v8346_v38 = vld [vmem:[#allocation11 + $0x658] sm:$0xff]   ;;  %v8356_v1 = vld [vmem:[#allocation11 + $0x608] sm:$0xff]  }
0x15e4   :  { %v5196_v59 = vadd.f32 %v5195_v32, %v4370_v43  ;;  %v5239_v10 = vadd.f32 %v5238_v49, %v4378_v44  ;;  %v5420_v2 = vmax.f32 %v5194_v33, 0.0  ;;  %v5422_v51 = vmax.f32 %v5237_v0, 0.0  ;;  %v8347_v41 = vld [vmem:[#allocation11 + $0x6d8] sm:$0xff]   ;;  %v8350_v43 = vld [vmem:[#allocation11 + $0x650] sm:$0xff]   ;;  %v8354_v49 = vld [vmem:[#allocation11 + $0x648] sm:$0xff]  }
0x15e5   :  { %v5197_v3 = vpop.f32.mrf.mxu1  ;;  %v5240_v37 = vpop.f32.mrf.mxu0  ;;  %v8351_v44 = vld [vmem:[#allocation11 + $0x6d0] sm:$0xff]   ;;  %v4398_v33 = vrot.slane %v9146_v47, %v8935_v52  ;;  %v4386_v0 = vrot.slane %v9146_v47, %v8820_v61 }
0x15e6   :  { %v5198_v54 = vadd.f32 %v5197_v3, %v4374_v36  ;;  %v5241_v5 = vadd.f32 %v5240_v37, %v4382_v42  ;;  %7779 = vmatpush3.bf16.msra.mxu1 %v8324_v48  ;;  %7801 = vmatpush3.bf16.msra.mxu0 %v8325_v46  ;;  %v5435_v9 = vmax.f32 %v5196_v59, 0.0  ;;  %v5437_v50 = vmax.f32 %v5239_v10, 0.0  ;;  %v8348_v36 = vld [vmem:[#allocation11 + $0x618] sm:$0xff]   ;;  %v8353_v48 = vld [vmem:[#allocation11 + $0x690] sm:$0xff]   ;;  %v8357_v3 = vld [vmem:[#allocation11 + $0x688] sm:$0xff]  }
0x15e7   :  { %7780 = vmatprep.subr.bf16.mxu1 %v8326_v63  ;;  %7802 = vmatprep.subr.bf16.mxu0 %v8327_v62  ;;  %v8349_v42 = vld [vmem:[#allocation11 + $0x698] sm:$0xff]   ;;  %v8355_v63 = vld [vmem:[#allocation11 + $0x6c8] sm:$0xff]   ;;  %v4390_v62 = vrot.slane %v9146_v47, %v8814_v55  ;;  %v4394_v59 = vrot.slane %v9146_v47, %v8825_v7  ;;  %v8358_v55 = vld [vmem:[#allocation11 + $0x640] sm:$0xff]  }
0x15e8   :  { %v5436_v60 = vmax.f32 %v5198_v54, 0.0  ;;  %v5438_v15 = vmax.f32 %v5241_v5, 0.0  ;;  %v5451_v53 = vpack.c.bf16 %v5435_v9, %v5419_v16  ;;  %v5453_v24 = vpack.c.bf16 %v5437_v50, %v5421_v17  ;;  %v8359_v5 = vld [vmem:[#allocation11 + $0x6c0] sm:$0xff]   ;;  %v8362_v17 = vld [vmem:[#allocation11 + $0x778] sm:$0xff]  }
0x15ea   :  { %v5452_v19 = vpack.c.bf16 %v5436_v60, %v5420_v2  ;;  %v5454_v20 = vpack.c.bf16 %v5438_v15, %v5422_v51  ;;  %7781 = vmatpush3.bf16.msra.mxu1 %v8328_v6  ;;  %7803 = vmatpush3.bf16.msra.mxu0 %v8329_v8  ;;  %v8360_v51 = vld [vmem:[#allocation11 + $0x600] sm:$0xff]  }
0x15eb   :  { %7810 = vmatprep.subr.bf16.mxu1 %v8330_v12  ;;  %7832 = vmatprep.subr.bf16.mxu0 %v8331_v13  ;;  %v8361_v60 = vld [vmem:[#allocation11 + $0x680] sm:$0xff]  }
0x15ec   :  { %6610 = vmatprep.mubr.bf16.mxu1 %v5452_v19  ;;  %6651 = vmatprep.mubr.bf16.mxu0 %v5454_v20  ;;  %v8363_v19 = vld [vmem:[#allocation11 + $0x7f8] sm:$0xff]  }
0x15ed   :  { %6611 = vmatmul.mubr.bf16.vlgmr.msra.gmra.mxu1 %v5451_v53  ;;  %6652 = vmatmul.mubr.bf16.vlgmr.msra.gmra.mxu0 %v5453_v24 }
0x15ee   :  { %7811 = vmatpush3.bf16.msra.mxu1 %v8332_v21  ;;  %7833 = vmatpush3.bf16.msra.mxu0 %v8333_v22 }
0x15ef   :  { %7812 = vmatprep.subr.bf16.mxu1 %v8334_v25  ;;  %7834 = vmatprep.subr.bf16.mxu0 %v8335_v26 }
0x15f2   :  { %7813 = vmatpush3.bf16.msra.mxu1 %v8336_v30  ;;  %7835 = vmatpush3.bf16.msra.mxu0 %v8337_v27  ;;  %v8364_v27 = vld [vmem:[#allocation11 + $0x738] sm:$0xff]  }
0x15f3   :  { %7814 = vmatprep.subr.bf16.mxu1 %v8338_v28  ;;  %7836 = vmatprep.subr.bf16.mxu0 %v8339_v11  ;;  %v8365_v28 = vld [vmem:[#allocation11 + $0x7b8] sm:$0xff]  }
0x15f6   :  { %7815 = vmatpush3.bf16.msra.mxu1 %v8340_v18  ;;  %7837 = vmatpush3.bf16.msra.mxu0 %v8341_v34  ;;  %v8366_v34 = vld [vmem:[#allocation11 + $0x770] sm:$0xff]  }
0x15f7   :  { %7816 = vmatprep.subr.bf16.mxu1 %v8342_v35  ;;  %7838 = vmatprep.subr.bf16.mxu0 %v8343_v39  ;;  %v8367_v35 = vld [vmem:[#allocation11 + $0x7f0] sm:$0xff]  }
0x15f8   :  { %v8368_v39 = vld [vmem:[#allocation11 + $0x730] sm:$0xff]  }
0x15fa   :  { %7817 = vmatpush3.bf16.msra.mxu1 %v8344_v23  ;;  %7839 = vmatpush3.bf16.msra.mxu0 %v8345_v40  ;;  %v8369_v23 = vld [vmem:[#allocation11 + $0x7b0] sm:$0xff]   ;;  %v8370_v40 = vld [vmem:[#allocation11 + $0x768] sm:$0xff]  }
0x15fb   :  { %7818 = vmatprep.subr.bf16.mxu1 %v8346_v38  ;;  %7840 = vmatprep.subr.bf16.mxu0 %v8347_v41  ;;  %v8371_v38 = vld [vmem:[#allocation11 + $0x7e8] sm:$0xff]  }
0x15fc   :  { %v8372_v41 = vld [vmem:[#allocation11 + $0x728] sm:$0xff]  }
0x15fe   :  { %7819 = vmatpush3.bf16.msra.mxu1 %v8348_v36  ;;  %7841 = vmatpush3.bf16.msra.mxu0 %v8349_v42  ;;  %v8373_v36 = vld [vmem:[#allocation11 + $0x7a8] sm:$0xff]   ;;  %v8374_v42 = vld [vmem:[#allocation11 + $0x760] sm:$0xff]  }
0x15ff   :  { %v5277_v46 = vpop.f32.mrf.mxu1  ;;  %v5320_v32 = vpop.f32.mrf.mxu0  ;;  %7820 = vmatprep.subr.bf16.mxu1 %v8350_v43  ;;  %7842 = vmatprep.subr.bf16.mxu0 %v8351_v44  ;;  %v8375_v43 = vld [vmem:[#allocation11 + $0x7e0] sm:$0xff]  }
0x1600   :  { %v5278_v61 = vadd.f32 %v5277_v46, %v4386_v0  ;;  %v5321_v50 = vadd.f32 %v5320_v32, %v4394_v59  ;;  %v8376_v44 = vld [vmem:[#allocation11 + $0x720] sm:$0xff]   ;;  %v8379_v46 = vld [vmem:[#allocation11 + $0x7d8] sm:$0xff]  }
0x1601   :  { %v5279_v10 = vpop.f32.mrf.mxu1  ;;  %v5322_v29 = vpop.f32.mrf.mxu0  ;;  %v8380_v32 = vld [vmem:[#allocation11 + $0x718] sm:$0xff]  }
0x1602   :  { %7821 = vmatpush3.bf16.msra.mxu1 %v8352_v45  ;;  %7843 = vmatpush3.bf16.msra.mxu0 %v8353_v48  ;;  %v5280_v6 = vadd.f32 %v5279_v10, %v4390_v62  ;;  %v5323_v52 = vadd.f32 %v5322_v29, %v4398_v33  ;;  %v5423_v24 = vmax.f32 %v5278_v61, 0.0  ;;  %v5425_v25 = vmax.f32 %v5321_v50, 0.0  ;;  %v8377_v45 = vld [vmem:[#allocation11 + $0x7a0] sm:$0xff]   ;;  %v8378_v48 = vld [vmem:[#allocation11 + $0x758] sm:$0xff]   ;;  %v8386_v29 = vld [vmem:[#allocation11 + $0x748] sm:$0xff]  }
0x1603   :  { %v5281_v37 = vpop.f32.mrf.mxu1  ;;  %v5324_v54 = vpop.f32.mrf.mxu0  ;;  %7822 = vmatprep.subr.bf16.mxu1 %v8354_v49  ;;  %7844 = vmatprep.subr.bf16.mxu0 %v8355_v63  ;;  %v8381_v49 = vld [vmem:[#allocation11 + $0x798] sm:$0xff]   ;;  %v8382_v63 = vld [vmem:[#allocation11 + $0x750] sm:$0xff]   ;;  %v8391_v50 = vld [vmem:[#allocation11 + $0x7c0] sm:$0xff]  }
0x1604   :  { %v5282_v8 = vadd.f32 %v5281_v37, %v4386_v0  ;;  %v5325_v9 = vadd.f32 %v5324_v54, %v4394_v59  ;;  %v5424_v20 = vmax.f32 %v5280_v6, 0.0  ;;  %v5426_v21 = vmax.f32 %v5323_v52, 0.0  ;;  %v8385_v0 = vld [vmem:[#allocation11 + $0x790] sm:$0xff]   ;;  %v8388_v52 = vld [vmem:[#allocation11 + $0x708] sm:$0xff]  }
0x1605   :  { %v5283_v12 = vpop.f32.mrf.mxu1  ;;  %v5326_v7 = vpop.f32.mrf.mxu0  ;;  %v4414_v37 = vrot.slane %v9146_v47, %v8951_v57  ;;  %v4402_v54 = vrot.slane %v9146_v47, %v8954_v14 }
0x1606   :  { %v5284_v13 = vadd.f32 %v5283_v12, %v4390_v62  ;;  %v5327_v2 = vadd.f32 %v5326_v7, %v4398_v33  ;;  %7823 = vmatpush3.bf16.msra.mxu1 %v8356_v1  ;;  %7845 = vmatpush3.bf16.msra.mxu0 %v8357_v3  ;;  %v5439_v15 = vmax.f32 %v5282_v8, 0.0  ;;  %v5441_v16 = vmax.f32 %v5325_v9, 0.0  ;;  %v8383_v62 = vld [vmem:[#allocation11 + $0x7d0] sm:$0xff]   ;;  %v8387_v1 = vld [vmem:[#allocation11 + $0x7c8] sm:$0xff]  }
0x1607   :  { %7824 = vmatprep.subr.bf16.mxu1 %v8358_v55  ;;  %7846 = vmatprep.subr.bf16.mxu0 %v8359_v5  ;;  %v8384_v33 = vld [vmem:[#allocation11 + $0x710] sm:$0xff]   ;;  %v4406_v3 = vrot.slane %v9146_v47, %v8948_v56  ;;  %v4410_v55 = vrot.slane %v9146_v47, %v8957_v58  ;;  %v8389_v8 = vld [vmem:[#allocation11 + $0x788] sm:$0xff]   ;;  %v8390_v56 = vld [vmem:[#allocation11 + $0x740] sm:$0xff]  }
0x1608   :  { %v5440_v22 = vmax.f32 %v5284_v13, 0.0  ;;  %v5442_v53 = vmax.f32 %v5327_v2, 0.0  ;;  %v5455_v11 = vpack.c.bf16 %v5439_v15, %v5423_v24  ;;  %v5457_v18 = vpack.c.bf16 %v5441_v16, %v5425_v25  ;;  %v8392_v15 = vld [vmem:[#allocation11 + $0x700] sm:$0xff]  }
0x1609   :  { %v8393_v16 = vld [vmem:[#allocation11 + $0x780] sm:$0xff]  }
0x160a   :  { %v5456_v26 = vpack.c.bf16 %v5440_v22, %v5424_v20  ;;  %v5458_v30 = vpack.c.bf16 %v5442_v53, %v5426_v21  ;;  %7825 = vmatpush3.bf16.msra.mxu1 %v8360_v51  ;;  %7847 = vmatpush3.bf16.msra.mxu0 %v8361_v60 }
0x160b   :  { %7854 = vmatprep.subr.bf16.mxu1 %v8362_v17  ;;  %7876 = vmatprep.subr.bf16.mxu0 %v8363_v19 }
0x160c   :  { %6692 = vmatprep.mubr.bf16.mxu1 %v5456_v26  ;;  %6733 = vmatprep.mubr.bf16.mxu0 %v5458_v30 }
0x160d   :  { %6693 = vmatmul.mubr.bf16.vlgmr.msra.gmra.mxu1 %v5455_v11  ;;  %6734 = vmatmul.mubr.bf16.vlgmr.msra.gmra.mxu0 %v5457_v18 }
0x160e   :  { %7855 = vmatpush3.bf16.msra.mxu1 %v8364_v27  ;;  %7877 = vmatpush3.bf16.msra.mxu0 %v8365_v28 }
0x160f   :  { %7856 = vmatprep.subr.bf16.mxu1 %v8366_v34  ;;  %7878 = vmatprep.subr.bf16.mxu0 %v8367_v35 }
0x1612   :  { %7857 = vmatpush3.bf16.msra.mxu1 %v8368_v39  ;;  %7879 = vmatpush3.bf16.msra.mxu0 %v8369_v23 }
0x1613   :  { %7858 = vmatprep.subr.bf16.mxu1 %v8370_v40  ;;  %7880 = vmatprep.subr.bf16.mxu0 %v8371_v38 }
0x1616   :  { %7859 = vmatpush3.bf16.msra.mxu1 %v8372_v41  ;;  %7881 = vmatpush3.bf16.msra.mxu0 %v8373_v36 }
0x1617   :  { %7860 = vmatprep.subr.bf16.mxu1 %v8374_v42  ;;  %7882 = vmatprep.subr.bf16.mxu0 %v8375_v43 }
0x161a   :  { %7861 = vmatpush3.bf16.msra.mxu1 %v8376_v44  ;;  %7883 = vmatpush3.bf16.msra.mxu0 %v8377_v45 }
0x161b   :  { %7862 = vmatprep.subr.bf16.mxu1 %v8378_v48  ;;  %7884 = vmatprep.subr.bf16.mxu0 %v8379_v46 }
0x161e   :  { %7863 = vmatpush3.bf16.msra.mxu1 %v8380_v32  ;;  %7885 = vmatpush3.bf16.msra.mxu0 %v8381_v49  ;;  %v7362_v32 = vld [vmem:[%s9188_s10 + $0x1] ss:$0 sm:$0xff] }
0x161f   :  { %v5363_v59 = vpop.f32.mrf.mxu1  ;;  %v5406_v10 = vpop.f32.mrf.mxu0  ;;  %7864 = vmatprep.subr.bf16.mxu1 %v8382_v63  ;;  %7886 = vmatprep.subr.bf16.mxu0 %v8383_v62 }
0x1620   :  { %v5364_v14 = vadd.f32 %v5363_v59, %v4402_v54  ;;  %v5407_v2 = vadd.f32 %v5406_v10, %v4410_v55 }
0x1621   :  { %v5365_v5 = vpop.f32.mrf.mxu1  ;;  %v5408_v6 = vpop.f32.mrf.mxu0 }
0x1622   :  { %7865 = vmatpush3.bf16.msra.mxu1 %v8384_v33  ;;  %7887 = vmatpush3.bf16.msra.mxu0 %v8385_v0  ;;  %v5366_v12 = vadd.f32 %v5365_v5, %v4406_v3  ;;  %v5409_v57 = vadd.f32 %v5408_v6, %v4414_v37  ;;  %v5427_v24 = vmax.f32 %v5364_v14, 0.0  ;;  %v5429_v25 = vmax.f32 %v5407_v2, 0.0 }
0x1623   :  { %v5367_v9 = vpop.f32.mrf.mxu1  ;;  %v5410_v61 = vpop.f32.mrf.mxu0  ;;  %7866 = vmatprep.subr.bf16.mxu1 %v8386_v29  ;;  %7888 = vmatprep.subr.bf16.mxu0 %v8387_v1 }
0x1624   :  { %v5368_v7 = vadd.f32 %v5367_v9, %v4402_v54  ;;  %v5411_v13 = vadd.f32 %v5410_v61, %v4410_v55  ;;  %v5428_v20 = vmax.f32 %v5366_v12, 0.0  ;;  %v5430_v21 = vmax.f32 %v5409_v57, 0.0 }
0x1625   :  { %v5369_v51 = vpop.f32.mrf.mxu1  ;;  %v5412_v58 = vpop.f32.mrf.mxu0 }
0x1626   :  { %v5370_v47 = vadd.f32 %v5369_v51, %v4406_v3  ;;  %v5413_v60 = vadd.f32 %v5412_v58, %v4414_v37  ;;  %7867 = vmatpush3.bf16.msra.mxu1 %v8388_v52  ;;  %7889 = vmatpush3.bf16.msra.mxu0 %v8389_v8  ;;  %v5443_v17 = vmax.f32 %v5368_v7, 0.0  ;;  %v5445_v19 = vmax.f32 %v5411_v13, 0.0 }
0x1627   :  { %7868 = vmatprep.subr.bf16.mxu1 %v8390_v56  ;;  %7890 = vmatprep.subr.bf16.mxu0 %v8391_v50 }
0x1628   :  { %v5444_v22 = vmax.f32 %v5370_v47, 0.0  ;;  %v5446_v53 = vmax.f32 %v5413_v60, 0.0  ;;  %v5459_v27 = vpack.c.bf16 %v5443_v17, %v5427_v24  ;;  %v5461_v28 = vpack.c.bf16 %v5445_v19, %v5429_v25 }
0x162a   :  { %v5460_v26 = vpack.c.bf16 %v5444_v22, %v5428_v20  ;;  %v5462_v30 = vpack.c.bf16 %v5446_v53, %v5430_v21  ;;  %7869 = vmatpush3.bf16.msra.mxu1 %v8392_v15  ;;  %7891 = vmatpush3.bf16.msra.mxu0 %v8393_v16 }
0x162c   :  { %6774 = vmatprep.mubr.bf16.mxu1 %v5460_v26  ;;  %6815 = vmatprep.mubr.bf16.mxu0 %v5462_v30 }
0x162d   :  { %6775 = vmatmul.mubr.bf16.vlgmr.msra.gmra.mxu1 %v5459_v27  ;;  %6816 = vmatmul.mubr.bf16.vlgmr.msra.gmra.mxu0 %v5461_v28 }
0x168d   :  { %v7738_v11 = vpop.f32.mrf.mxu1  ;;  %v7760_v18 = vpop.f32.mrf.mxu0 }
0x168f   :  { %v7739_v34 = vpop.f32.mrf.mxu1  ;;  %v7761_v35 = vpop.f32.mrf.mxu0 }
0x1690   :  { %v7740_v46 = vadd.f32 %v7739_v34, %v7738_v11  ;;  %v7762_v10 = vadd.f32 %v7761_v35, %v7760_v18 }
0x1691   :  { %v7741_v39 = vpop.f32.mrf.mxu1  ;;  %v7763_v23 = vpop.f32.mrf.mxu0 }
0x1692   :  { %v6531_v33 = vadd.f32 %v7740_v46, %v7362_v32 }
0x1693   :  { %v7742_v40 = vpop.f32.mrf.mxu1  ;;  %v7764_v38 = vpop.f32.mrf.mxu0 }
0x1694   :  { %v7743_v0 = vadd.f32 %v7742_v40, %v7741_v39  ;;  %v6572_v3 = vadd.f32 %v7762_v10, %v6531_v33  ;;  %v7765_v55 = vadd.f32 %v7764_v38, %v7763_v23  ;;  %v7493_v33 = vld [vmem:[#allocation14 + $0x1] ss:$0 sm:$0xff] }
0x1696   :  { %v6534_v37 = vadd.f32 %v7743_v0, %v7362_v32 }
0x1698   :  { %v6575_v8 = vadd.f32 %v7765_v55, %v6534_v37 }
0x16ad   :  { %v7782_v41 = vpop.f32.mrf.mxu1  ;;  %v7804_v36 = vpop.f32.mrf.mxu0 }
0x16af   :  { %v7783_v42 = vpop.f32.mrf.mxu1  ;;  %v7805_v43 = vpop.f32.mrf.mxu0 }
0x16b0   :  { %v7784_v29 = vadd.f32 %v7783_v42, %v7782_v41  ;;  %v7806_v9 = vadd.f32 %v7805_v43, %v7804_v36 }
0x16b1   :  { %v7785_v44 = vpop.f32.mrf.mxu1  ;;  %v7807_v45 = vpop.f32.mrf.mxu0 }
0x16b2   :  { %v6613_v5 = vadd.f32 %v7784_v29, %v6572_v3 }
0x16b3   :  { %v7786_v48 = vpop.f32.mrf.mxu1  ;;  %v7808_v49 = vpop.f32.mrf.mxu0 }
0x16b4   :  { %v7787_v6 = vadd.f32 %v7786_v48, %v7785_v44  ;;  %v6654_v50 = vadd.f32 %v7806_v9, %v6613_v5  ;;  %v7809_v7 = vadd.f32 %v7808_v49, %v7807_v45 }
0x16b6   :  { %v6616_v12 = vadd.f32 %v7787_v6, %v6575_v8 }
0x16b8   :  { %v6657_v58 = vadd.f32 %v7809_v7, %v6616_v12 }
0x16cd   :  { %v7826_v63 = vpop.f32.mrf.mxu1  ;;  %v7848_v62 = vpop.f32.mrf.mxu0 }
0x16cf   :  { %v7827_v59 = vpop.f32.mrf.mxu1  ;;  %v7849_v1 = vpop.f32.mrf.mxu0 }
0x16d0   :  { %v7828_v61 = vadd.f32 %v7827_v59, %v7826_v63  ;;  %v7850_v47 = vadd.f32 %v7849_v1, %v7848_v62  ;;  %v7492_v63 = vld [vmem:[%s9191_s13 + $0x1] ss:$0 sm:$0xff] }
0x16d1   :  { %v7829_v54 = vpop.f32.mrf.mxu1  ;;  %v7851_v52 = vpop.f32.mrf.mxu0 }
0x16d2   :  { %v6695_v13 = vadd.f32 %v7828_v61, %v6654_v50 }
0x16d3   :  { %v7830_v56 = vpop.f32.mrf.mxu1  ;;  %v7852_v57 = vpop.f32.mrf.mxu0 }
0x16d4   :  { %v7831_v14 = vadd.f32 %v7830_v56, %v7829_v54  ;;  %v6736_v16 = vadd.f32 %v7850_v47, %v6695_v13  ;;  %v7853_v22 = vadd.f32 %v7852_v57, %v7851_v52 }
0x16d6   :  { %v6698_v17 = vadd.f32 %v7831_v14, %v6657_v58 }
0x16d8   :  { %v6739_v30 = vadd.f32 %v7853_v22, %v6698_v17 }
0x16ed   :  { %v7870_v2 = vpop.f32.mrf.mxu1  ;;  %v7892_v51 = vpop.f32.mrf.mxu0 }
0x16ef   :  { %v7871_v60 = vpop.f32.mrf.mxu1  ;;  %v7893_v15 = vpop.f32.mrf.mxu0 }
0x16f0   :  { %v7872_v19 = vadd.f32 %v7871_v60, %v7870_v2  ;;  %v7894_v24 = vadd.f32 %v7893_v15, %v7892_v51 }
0x16f1   :  { %v7873_v20 = vpop.f32.mrf.mxu1  ;;  %v7895_v21 = vpop.f32.mrf.mxu0 }
0x16f2   :  { %v6777_v53 = vadd.f32 %v7872_v19, %v6736_v16 }
0x16f3   :  { %v7874_v25 = vpop.f32.mrf.mxu1  ;;  %v7896_v26 = vpop.f32.mrf.mxu0 }
0x16f4   :  { %v6818_v27 = vadd.f32 %v7894_v24, %v6777_v53  ;;  %v7875_v28 = vadd.f32 %v7874_v25, %v7873_v20  ;;  %v7897_v18 = vadd.f32 %v7896_v26, %v7895_v21 }
0x16f6   :  { %v6780_v11 = vadd.f32 %v7875_v28, %v6739_v30  ;;  %v6824_v34 = vadd.f32 %v6818_v27, %v9106_v31 }
0x16f8   :  { %v6821_v35 = vadd.f32 %v7897_v18, %v6780_v11  ;;  %6830 = vadd.xlane.f32.xlu0 %v6824_v34 }
0x16fa   :  { %v6825_v39 = vadd.f32 %v6821_v35, %v9108_v4 }
0x16fc   :  { %6832 = vadd.xlane.f32.xlu1 %v6825_v39 }
0x1781   :  { %v6831_v23 = vpop.xlane.xlu0 %6830 }
0x1782   :  { %v6834_v40 = vmul.f32 0.0078125, %v6831_v23 }
0x1784   :  { %v6836_v38 = vsub.f32 %v6824_v34, %v6834_v40 }
0x1785   :  { %v6833_v41 = vpop.xlane.xlu1 %6832 }
0x1786   :  { %v6835_v36 = vmul.f32 0.0078125, %v6833_v41  ;;  %v6838_v42 = vmul.f32 %v6836_v38, %v6836_v38 }
0x1788   :  { %v6837_v43 = vsub.f32 %v6825_v39, %v6835_v36  ;;  %6840 = vadd.xlane.f32.xlu0 %v6838_v42 }
0x178a   :  { %v6839_v44 = vmul.f32 %v6837_v43, %v6837_v43 }
0x178c   :  { %6842 = vadd.xlane.f32.xlu1 %v6839_v44 }
0x1811   :  { %v6841_v45 = vpop.xlane.xlu0 %6840 }
0x1812   :  { %v6844_v48 = vmul.f32 0.0078125, %v6841_v45 }
0x1814   :  { %v6846_v46 = vadd.f32 1e-05, %v6844_v48 }
0x1815   :  { %v6843_v32 = vpop.xlane.xlu1 %6842 }
0x1816   :  { %8442 = vrsqrt.f32 %v6846_v46  ;;  %v6845_v31 = vmul.f32 0.0078125, %v6843_v32 }
0x1818   :  { %v6847_v49 = vadd.f32 1e-05, %v6845_v31 }
0x181a   :  { %8444 = vrsqrt.f32 %v6847_v49 }
0x1823   :  { %v8443_v4 = vpop.eup %8442 }
0x1824   :  { %v6850_v62 = vmul.f32 %v8443_v4, %v6836_v38 }
0x1826   :  { %v6858_v0 = vmul.f32 %v7492_v63, %v6850_v62 }
0x1827   :  { %v8445_v59 = vpop.eup %8444 }
0x1828   :  { %v6851_v10 = vmul.f32 %v8445_v59, %v6837_v43  ;;  %v6866_v29 = vadd.f32 %v7493_v33, %v6858_v0 }
0x182a   :  { %v6859_v1 = vmul.f32 %v7492_v63, %v6851_v10  ;;  %6868 = vst [vmem:[#allocation16] sm:$0xff] %v6866_v29 }
0x182c   :  { %v6867_v3 = vadd.f32 %v7493_v33, %v6859_v1 }
0x182e   :  { %6869 = vst [vmem:[#allocation16 + $0x8] sm:$0xff] %v6867_v3 }
0x182f   :  { %8617 = shalt.err (!%p8614_p2)
}
0x1830   :  { %6881 = dma.vmem_to_hbm [thread:$0]  %s6876_s8, 256, %s9193_s15, [#allocation4], %s8647_s24, %s8647_s24, %s8648_s25  }
0x1831   :  { %8636 = dma.done.wait [#allocation4], 256  }
0x1832   :  { %8637 = vsyncadd [#allocation4], 4294967040 }
0x1833   :  { %6885 = vsyncpa [#allocation3], 1 }
0x1834   :  { %6886 = vsyncpa [#allocation6], 1 }
0x1835   :  { %6887 = vsyncpa [#allocation9], 1 }
0x1836   :  { %6888 = vsyncpa [#allocation12], 1 }
0x1837   :  { %6889 = vsyncpa [#allocation15], 1 }
0x1838   :  { %6890 = vsyncpa [#allocation4], 1 }

</bundles_post_ra>
